<compile_context>
chip_gen: v7x
topology: tpu7x:2x2x1
jax: 0.10.0
libtpu: 0.0.40
codegen_flags: <defaults>
</compile_context>

<pallas_src>
import functools

import jax
import jax.numpy as jnp
from jax import lax
from jax.experimental import pallas as pl
from jax.experimental.pallas import tpu as pltpu

MIN_NORM = 1e-15          # PoincareBall.min_norm
EPS_F32 = 4e-3            # PoincareBall.eps[float32]
C = 1.0                   # args.c (curvature)
POOL_RATIO = 0.5

ADJ_DTYPE = jnp.bfloat16  # halves the dominant N^2 HBM stream of HypAgg
TAN_DTYPE = jnp.bfloat16  # tangent handoff between layers / into readout
ADJ_BYTES = 2


def _vmem_capacity_bytes():
    try:
        return int(pltpu.get_tpu_info().vmem_capacity_bytes)
    except Exception:
        return 64 * 1024 * 1024   # conservative (v7x) fallback


_VMEM_CAP = _vmem_capacity_bytes()
# Explicit scoped-VMEM limit (v5e default is only 16 MiB); half the physical
# capacity leaves headroom on every generation (32 MiB on v7x, 64 MiB on
# v5e/v6e).  With the K-tiled hyp_agg the actual buffer sums are a few MiB.
VMEM_LIMIT = min(_VMEM_CAP // 2, 64 * 1024 * 1024)
# Budget for the double-buffered bf16 adjacency block of hyp_agg.
ADJ_BLOCK_BUDGET = VMEM_LIMIT // 3


# ----------------------- Poincare-ball math (kernel-side) ---------------------

def _recip(x):
    return pl.reciprocal(x, approx=True)


def _artanh(x):
    # Reference clamps at 1 - 1e-15 (a no-op in f32); projected inputs keep
    # sqrt(c)*norm <= 1 - 4e-3 so this clamp never triggers in practice.
    x = jnp.clip(x, -1.0 + 1e-7, 1.0 - 1e-7)
    return 0.5 * (jnp.log1p(x) - jnp.log1p(-x))


def _tanh(x):
    return jnp.tanh(jnp.clip(x, -15.0, 15.0))


def _l2norm(x):
    return jnp.maximum(jnp.sqrt(jnp.sum(x * x, axis=-1, keepdims=True)), MIN_NORM)


def _proj(x, c):
    sqrt_c = c ** 0.5
    norm = _l2norm(x)
    maxnorm = (1.0 - EPS_F32) / sqrt_c
    return jnp.where(norm > maxnorm, x * (maxnorm * _recip(norm)), x)


def _expmap0(u, c):
    sqrt_c = c ** 0.5
    u_norm = _l2norm(u)
    return _tanh(sqrt_c * u_norm) * u * _recip(sqrt_c * u_norm)


def _logmap0(p, c):
    sqrt_c = c ** 0.5
    p_norm = _l2norm(p)
    return (1.0 / sqrt_c) * _artanh(sqrt_c * p_norm) * _recip(p_norm) * p


def _mobius_add(x, y, c):
    x2 = jnp.sum(x * x, axis=-1, keepdims=True)
    y2 = jnp.sum(y * y, axis=-1, keepdims=True)
    xy = jnp.sum(x * y, axis=-1, keepdims=True)
    num = (1.0 + 2.0 * c * xy + c * y2) * x + (1.0 - c * x2) * y
    denom = jnp.maximum(1.0 + 2.0 * c * xy + c * c * x2 * y2, MIN_NORM)
    return num / denom            # exact division (correctness review)


# ------------------------------ tiling helpers --------------------------------

def _tiles(n):
    """Padded node count and per-kernel tiles.

    Returns (n_pad, tm_lin, tm_rd, tm_agg, tk):
      tm_lin : row tile of hyp_linear_tan (capped at 256 to bound live ranges)
      tm_rd  : row tile of readout_head (512 when divisible)
      tm_agg : adjacency row tile of hyp_agg
      tk     : hyp_agg reduction (column) tile; grows while the double-buffered
               bf16 adjacency block stays under the generation-aware budget.
    """
    n8 = max(8, ((n + 7) // 8) * 8)
    if n8 <= 512:
        return n8, n8, n8, n8, n8
    n_pad = ((n8 + 255) // 256) * 256
    tm_lin = 256
    tm_agg = 256
    tm_rd = 512 if n_pad % 512 == 0 else 256
    tk = 256
    while (tk * 2 <= 4096 and n_pad % (tk * 2) == 0
           and 2 * tm_agg * (tk * 2) * ADJ_BYTES <= ADJ_BLOCK_BUDGET):
        tk *= 2
    return n_pad, tm_lin, tm_rd, tm_agg, tk


# ------------------------------ Pallas kernels --------------------------------

def _hyp_linear_kernel(x_ref, keep_ref, wt_ref, b_ref, out_ref, *, c, lift):
    """HypLinear on one row tile, tangent-in -> tangent-out.

    keep folds the (approximated) pooling mask of the previous layer: dropped
    nodes go to the ball origin (tangent 0) before the Mobius linear map.
    Uses the exact identity mobius_matvec(W, expmap0(t)) == expmap0(t @ W^T).
    """
    x = x_ref[...].astype(jnp.float32) * keep_ref[...]
    if lift:
        # Reference lift: x_hyp = proj(expmap0(proj_tan0(x))); take its tangent
        # (keeps the proj clamp semantics exact).
        x = _logmap0(_proj(_expmap0(x, c), c), c)
    mx = jnp.dot(x, wt_ref[...], preferred_element_type=jnp.float32)
    res = _proj(_expmap0(mx, c), c)                       # = proj(mobius_matvec)
    hyp_bias = _proj(_expmap0(b_ref[...], c), c)          # proj_tan0 is identity
    res = _proj(_mobius_add(res, hyp_bias, c), c)
    # Tangent features for HypAgg, emitted bf16 for the aggregation MXU stream.
    out_ref[...] = _logmap0(res, c).astype(out_ref.dtype)


def hyp_linear_tan(x, keep_col, w, b, tm, *, c=C, lift=False):
    n_pad, f_in = x.shape
    f_out = w.shape[0]
    return pl.pallas_call(
        functools.partial(_hyp_linear_kernel, c=c, lift=lift),
        out_shape=jax.ShapeDtypeStruct((n_pad, f_out), TAN_DTYPE),
        grid=(n_pad // tm,),
        in_specs=[
            pl.BlockSpec((tm, f_in), lambda i: (i, 0)),
            pl.BlockSpec((tm, 1), lambda i: (i, 0)),
            pl.BlockSpec((f_in, f_out), lambda i: (0, 0)),   # resident weights
            pl.BlockSpec((1, f_out), lambda i: (0, 0)),      # resident bias
        ],
        out_specs=pl.BlockSpec((tm, f_out), lambda i: (i, 0)),
        compiler_params=pltpu.CompilerParams(
            dimension_semantics=("parallel",),
            vmem_limit_bytes=VMEM_LIMIT),
    )(x, keep_col, jnp.transpose(w), b.reshape(1, f_out))


def _hyp_agg_kernel(adj_ref, xt_ref, htan_ref, acc_ref, *, c):
    """HypAgg (tangent aggregation) + HypAct(ReLU), K-tiled with f32 accumulator.

    Emits ONLY the tangent of the HypAct output (exact logmap0 of the
    hyperbolic point the next layer / the readout would see).
    """
    k = pl.program_id(1)

    @pl.when(k == 0)
    def _():
        acc_ref[...] = jnp.zeros_like(acc_ref)

    acc_ref[...] += jnp.dot(adj_ref[...], xt_ref[...],
                            preferred_element_type=jnp.float32)

    @pl.when(k == pl.num_programs(1) - 1)
    def _():
        support = acc_ref[...]
        h = _proj(_expmap0(support, c), c)            # HypAgg output (ball)
        ht = jnp.maximum(_logmap0(h, c), 0.0)         # HypAct: ReLU in tangent space
        out = _proj(_expmap0(ht, c), c)               # HypAct output (ball)
        htan_ref[...] = _logmap0(out, c).astype(htan_ref.dtype)


def hyp_agg_tan(adj_bf16, xt_bf16, tm, tk, *, c=C):
    n_pad, f = xt_bf16.shape
    cost = pl.CostEstimate(
        flops=int(2 * n_pad * n_pad * f),
        transcendentals=int(10 * n_pad * f),
        bytes_accessed=int(n_pad * n_pad * ADJ_BYTES + 2 * n_pad * f * ADJ_BYTES))
    return pl.pallas_call(
        functools.partial(_hyp_agg_kernel, c=c),
        out_shape=jax.ShapeDtypeStruct((n_pad, f), TAN_DTYPE),
        grid=(n_pad // tm, n_pad // tk),
        in_specs=[
            pl.BlockSpec((tm, tk), lambda i, k: (i, k)),   # bf16 adjacency block
            pl.BlockSpec((tk, f), lambda i, k: (k, 0)),    # bf16 tangent block
        ],
        out_specs=pl.BlockSpec((tm, f), lambda i, k: (i, 0)),
        scratch_shapes=[pltpu.VMEM((tm, f), jnp.float32)],
        compiler_params=pltpu.CompilerParams(
            dimension_semantics=("parallel", "arbitrary"),
            vmem_limit_bytes=VMEM_LIMIT),
        cost_estimate=cost,
    )(adj_bf16, xt_bf16)


def _readout_head_kernel(t1_ref, t2_ref, t3_ref, batch_ref, keep1_ref, keep2_ref,
                         w3t_ref, b3_ref, out_ref, acc1, acc2, acc3, *, num_graphs):
    """Masked global_add_pool of x1/x2/x3 accumulated over node tiles, then
    relu-sum -> lin3 -> log_softmax on the last tile.  The (G, TM) assignment
    blocks are built in-kernel from the streamed int32 batch row + keep rows."""
    step = pl.program_id(0)
    tm = t1_ref.shape[0]

    @pl.when(step == 0)
    def _():
        acc1[...] = jnp.zeros_like(acc1)
        acc2[...] = jnp.zeros_like(acc2)
        acc3[...] = jnp.zeros_like(acc3)

    gids = lax.broadcasted_iota(jnp.int32, (num_graphs, tm), 0)
    onehot = (gids == batch_ref[...]).astype(jnp.float32)   # padded nodes never match
    a1 = (onehot * keep1_ref[...]).astype(TAN_DTYPE)
    a2 = (onehot * keep2_ref[...]).astype(TAN_DTYPE)
    a3 = onehot.astype(TAN_DTYPE)

    acc1[...] += jnp.dot(a1, t1_ref[...], preferred_element_type=jnp.float32)
    acc2[...] += jnp.dot(a2, t2_ref[...], preferred_element_type=jnp.float32)
    acc3[...] += jnp.dot(a3, t3_ref[...], preferred_element_type=jnp.float32)

    @pl.when(step == pl.num_programs(0) - 1)
    def _():
        x = (jnp.maximum(acc1[...], 0.0) + jnp.maximum(acc2[...], 0.0)
             + jnp.maximum(acc3[...], 0.0))
        logits = jnp.dot(x, w3t_ref[...], preferred_element_type=jnp.float32) + b3_ref[...]
        m = jnp.max(logits, axis=-1, keepdims=True)
        lse = m + jnp.log(jnp.sum(jnp.exp(logits - m), axis=-1, keepdims=True))
        out_ref[...] = logits - lse


def readout_head(tan1, tan2, tan3, batch_row, keep1_row, keep2_row,
                 lin3_w, lin3_b, num_graphs, tm):
    n_pad, f = tan1.shape
    nclass = lin3_w.shape[0]
    row_spec = pl.BlockSpec((tm, f), lambda i: (i, 0))
    vec_spec = pl.BlockSpec((1, tm), lambda i: (0, i))
    return pl.pallas_call(
        functools.partial(_readout_head_kernel, num_graphs=num_graphs),
        out_shape=jax.ShapeDtypeStruct((num_graphs, nclass), jnp.float32),
        grid=(n_pad // tm,),
        in_specs=[row_spec, row_spec, row_spec, vec_spec, vec_spec, vec_spec,
                  pl.BlockSpec((f, nclass), lambda i: (0, 0)),
                  pl.BlockSpec((1, nclass), lambda i: (0, 0))],
        out_specs=pl.BlockSpec((num_graphs, nclass), lambda i: (0, 0)),
        scratch_shapes=[pltpu.VMEM((num_graphs, f), jnp.float32)] * 3,
        compiler_params=pltpu.CompilerParams(
            dimension_semantics=("arbitrary",),          # accumulation axis
            vmem_limit_bytes=VMEM_LIMIT),
    )(tan1, tan2, tan3, batch_row, keep1_row, keep2_row,
      jnp.transpose(lin3_w), lin3_b.reshape(1, nclass))


# ------------------------------ JAX glue --------------------------------------

def topk_pool_mask(score, batch, valid, num_graphs, ratio):
    """Per-graph top-ceil(ratio * graph_size) node selection, O(N log N).

    Ties broken by lower node index.  Returns a boolean keep mask over the
    padded node axis (padded nodes never kept).
    """
    n = score.shape[0]
    idx = jnp.arange(n, dtype=jnp.int32)
    seg = jnp.where(valid, batch, num_graphs).astype(jnp.int32)   # padded -> extra segment
    masked_score = jnp.where(valid, score, -jnp.inf)
    order = jnp.lexsort((idx, -masked_score, seg))                # graph asc, score desc
    pos = jnp.zeros((n,), jnp.int32).at[order].set(idx)           # global sorted rank
    counts = jnp.zeros((num_graphs + 1,), jnp.int32).at[seg].add(valid.astype(jnp.int32))
    starts = jnp.concatenate([jnp.zeros((1,), jnp.int32), jnp.cumsum(counts)[:-1]])
    k = jnp.ceil(ratio * counts[:num_graphs].astype(jnp.float32)).astype(jnp.int32)
    k = jnp.concatenate([k, jnp.zeros((1,), jnp.int32)])
    within = pos - starts[seg]
    return valid & (within < k[seg])


def hyp_gcn3_forward(x, edge_index, batch, num_graphs, params, c=C):
    n = x.shape[0]
    n_pad, tm_lin, tm_rd, tm_agg, tk = _tiles(n)
    pad = n_pad - n

    x_p = jnp.pad(x.astype(jnp.float32), ((0, pad), (0, 0)))
    batch_p = jnp.pad(batch.astype(jnp.int32), (0, pad), constant_values=num_graphs)
    valid = jnp.arange(n_pad) < n
    valid_col = valid.astype(jnp.float32)[:, None]

    # Dense adjacency built ONCE from the raw node features and reused by all
    # three layers (as in the reference forward).  Scattered directly into a
    # bf16 buffer (no f32 N^2 temporary); duplicate edges overwrite
    # (torch indexing semantics).
    row, col = edge_index[0], edge_index[1]
    weights = (jnp.sum(x[row], axis=-1) + jnp.sum(x[col], axis=-1)) * 0.5
    adj = jnp.zeros((n_pad, n_pad), ADJ_DTYPE).at[row, col].set(
        weights.astype(ADJ_DTYPE))

    # TODO(synk): HypAgg is implemented without attention (args.use_att=False).

    # ---- layer 1 (Euclidean lift fused into the HypLinear kernel) ----
    xt1 = hyp_linear_tan(x_p, valid_col, params["w1"], params["b1"], tm_lin,
                         c=c, lift=True)
    h1_tan = hyp_agg_tan(adj, xt1, tm_agg, tk, c=c)

    # ---- pool1 ----
    # TODO(synk): NewPoolTb's score network / structure learning / sampling has
    # no published implementation; approximated by per-graph top-k on a
    # tangent-space score; dropped nodes map to the ball origin (adjacency and
    # batch stay unchanged, matching the reference which reuses them downstream).
    score1 = jnp.sum(h1_tan.astype(jnp.float32), axis=-1)
    keep1 = topk_pool_mask(score1, batch_p, valid, num_graphs, POOL_RATIO)
    keep1_col = keep1.astype(jnp.float32)[:, None]

    # ---- layer 2 (input tangent = pooled h1 tangent; pool mask folded in) ----
    xt2 = hyp_linear_tan(h1_tan, keep1_col, params["w2"], params["b2"], tm_lin, c=c)
    h2_tan = hyp_agg_tan(adj, xt2, tm_agg, tk, c=c)

    # ---- pool2 ----
    score2 = jnp.sum(h2_tan.astype(jnp.float32), axis=-1)
    keep2 = topk_pool_mask(score2, batch_p, valid, num_graphs, POOL_RATIO)
    keep2_col = keep2.astype(jnp.float32)[:, None]

    # ---- layer 3 (no pool afterwards; readout over all valid nodes) ----
    xt3 = hyp_linear_tan(h2_tan, keep2_col, params["w3"], params["b3"], tm_lin, c=c)
    h3_tan = hyp_agg_tan(adj, xt3, tm_agg, tk, c=c)

    # Fused: x1/x2/x3 = global_add_pool(masked tangents) -> relu-sum -> lin3
    # -> log_softmax.  Assignment matrices are built inside the kernel.
    batch_row = batch_p.reshape(1, n_pad)
    keep1_row = keep1_col.reshape(1, n_pad)
    keep2_row = keep2_col.reshape(1, n_pad)
    return readout_head(h1_tan, h2_tan, h3_tan, batch_row, keep1_row, keep2_row,
                        params["lin3_w"], params["lin3_b"], num_graphs, tm_rd)


# ------------------------------ driver -----------------------------------------

if __name__ == "__main__":
    nfeat, nhid, nclass = 16, 32, 4
    nodes_per_graph, num_graphs = 8, 2
    n = nodes_per_graph * num_graphs

    key = jax.random.PRNGKey(0)
    k_x, k1, kb1, k2, kb2, k3, kb3, kl3, kl3b = jax.random.split(key, 9)

    # node features
    x = (0.5 * jax.random.normal(k_x, (n, nfeat))).astype(jnp.float32)

    # two ring graphs (bidirectional edges), deterministic
    rows, cols = [], []
    for g in range(num_graphs):
        off = g * nodes_per_graph
        for i in range(nodes_per_graph):
            j = (i + 1) % nodes_per_graph
            rows += [off + i, off + j]
            cols += [off + j, off + i]
    edge_index = jnp.array([rows, cols], dtype=jnp.int32)
    batch = jnp.array([g for g in range(num_graphs) for _ in range(nodes_per_graph)],
                      dtype=jnp.int32)

    def _init(k, shape, scale=0.1):
        return (scale * jax.random.normal(k, shape)).astype(jnp.float32)

    params = {
        # HypLinear weights are (out_features, in_features), like nn.Linear
        "w1": _init(k1, (nhid, nfeat)), "b1": _init(kb1, (nhid,), 0.01),
        "w2": _init(k2, (nhid, nhid)),  "b2": _init(kb2, (nhid,), 0.01),
        "w3": _init(k3, (nhid, nhid)),  "b3": _init(kb3, (nhid,), 0.01),
        "lin3_w": _init(kl3, (nclass, nhid)), "lin3_b": _init(kl3b, (nclass,), 0.01),
    }

    fwd = jax.jit(hyp_gcn3_forward, static_argnums=(3,))
    out = fwd(x, edge_index, batch, num_graphs, params)
    out = jax.block_until_ready(out)
    assert out.shape == (num_graphs, nclass)
    print("KERNEL_OK")
</pallas_src>

<mosaic_0001>
module attributes {stable_mosaic.version = 11 : i64} {
  func.func private @main(%arg0: i32) attributes {dimension_semantics = [#tpu.dimension_semantics<core_parallel>], iteration_bounds = array<i64: 2>, tpu.core_type = #tpu.core_type<sc_scalar_subcore>, window_params = []} {
    return
  }
}

module attributes {stable_mosaic.version = 11 : i64} {
  func.func private @main(%arg0: i32) attributes {dimension_semantics = [#tpu.dimension_semantics<core_parallel>], iteration_bounds = array<i64: 2>, tpu.core_type = #tpu.core_type<sc_scalar_subcore>, window_params = []} {
    return
  }
}

module attributes {stable_mosaic.version = 11 : i64} {
  func.func @_hyp_linear_kernel(%arg0: i32, %arg1: memref<16x16xf32, #tpu.memory_space<vmem>>, %arg2: memref<16x1xf32, #tpu.memory_space<vmem>>, %arg3: memref<16x32xf32, #tpu.memory_space<vmem>>, %arg4: memref<1x32xf32, #tpu.memory_space<vmem>>, %arg5: memref<16x32xbf16, #tpu.memory_space<vmem>>) attributes {dimension_semantics = [#tpu.dimension_semantics<parallel>], iteration_bounds = array<i64: 1>, scalar_prefetch = 0 : i64, scratch_operands = 0 : i64, tpu.core_type = #tpu.core_type<tc>, window_params = [{transform_indices = @transform_0, window_bounds = array<i64: 16, 16>}, {transform_indices = @transform_1, window_bounds = array<i64: 16, 1>}, {pipeline_mode = #tpu.pipeline_mode<synchronous>, transform_indices = @transform_2, window_bounds = array<i64: 16, 32>}, {pipeline_mode = #tpu.pipeline_mode<synchronous>, transform_indices = @transform_3, window_bounds = array<i64: 1, 32>}, {transform_indices = @transform_4, window_bounds = array<i64: 16, 32>}]} {
    %c0 = arith.constant 0 : index
    %c0_0 = arith.constant 0 : index
    %0 = vector.load %arg1[%c0, %c0_0] : memref<16x16xf32, #tpu.memory_space<vmem>>, vector<16x16xf32>
    %c0_1 = arith.constant 0 : index
    %c0_2 = arith.constant 0 : index
    %1 = vector.load %arg2[%c0_1, %c0_2] : memref<16x1xf32, #tpu.memory_space<vmem>>, vector<16x1xf32>
    %2 = vector.broadcast %1 : vector<16x1xf32> to vector<16x16xf32>
    %3 = arith.mulf %0, %2 : vector<16x16xf32>
    %4 = arith.mulf %3, %3 : vector<16x16xf32>
    %cst = arith.constant dense<0.000000e+00> : vector<16xf32>
    %5 = vector.multi_reduction <add>, %4, %cst [1] : vector<16x16xf32> to vector<16xf32>
    %6 = vector.shape_cast %5 : vector<16xf32> to vector<16x1xf32>
    %7 = math.sqrt %6 : vector<16x1xf32>
    %cst_3 = arith.constant 1.000000e-15 : f32
    %8 = vector.broadcast %cst_3 : f32 to vector<16x1xf32>
    %9 = arith.maximumf %7, %8 : vector<16x1xf32>
    %cst_4 = arith.constant 1.000000e+00 : f32
    %10 = vector.broadcast %cst_4 : f32 to vector<16x1xf32>
    %11 = arith.mulf %10, %9 : vector<16x1xf32>
    %cst_5 = arith.constant -1.500000e+01 : f32
    %cst_6 = arith.constant 1.500000e+01 : f32
    %12 = vector.broadcast %cst_5 : f32 to vector<16x1xf32>
    %13 = arith.maximumf %12, %11 : vector<16x1xf32>
    %14 = vector.broadcast %cst_6 : f32 to vector<16x1xf32>
    %15 = arith.minimumf %14, %13 : vector<16x1xf32>
    %16 = math.tanh %15 : vector<16x1xf32>
    %17 = vector.broadcast %16 : vector<16x1xf32> to vector<16x16xf32>
    %18 = arith.mulf %17, %3 : vector<16x16xf32>
    %cst_7 = arith.constant 1.000000e+00 : f32
    %19 = vector.broadcast %cst_7 : f32 to vector<16x1xf32>
    %20 = arith.mulf %19, %9 : vector<16x1xf32>
    %21 = tpu.reciprocal %20 {approx = true} : vector<16x1xf32> -> vector<16x1xf32>
    %22 = vector.broadcast %21 : vector<16x1xf32> to vector<16x16xf32>
    %23 = arith.mulf %18, %22 : vector<16x16xf32>
    %24 = arith.mulf %23, %23 : vector<16x16xf32>
    %cst_8 = arith.constant dense<0.000000e+00> : vector<16xf32>
    %25 = vector.multi_reduction <add>, %24, %cst_8 [1] : vector<16x16xf32> to vector<16xf32>
    %26 = vector.shape_cast %25 : vector<16xf32> to vector<16x1xf32>
    %27 = math.sqrt %26 : vector<16x1xf32>
    %cst_9 = arith.constant 1.000000e-15 : f32
    %28 = vector.broadcast %cst_9 : f32 to vector<16x1xf32>
    %29 = arith.maximumf %27, %28 : vector<16x1xf32>
    %cst_10 = arith.constant 0.995999991 : f32
    %30 = vector.broadcast %cst_10 : f32 to vector<16x1xf32>
    %31 = arith.cmpf ogt, %29, %30 : vector<16x1xf32>
    %32 = tpu.reciprocal %29 {approx = true} : vector<16x1xf32> -> vector<16x1xf32>
    %cst_11 = arith.constant 0.995999991 : f32
    %33 = vector.broadcast %cst_11 : f32 to vector<16x1xf32>
    %34 = arith.mulf %33, %32 : vector<16x1xf32>
    %35 = vector.broadcast %34 : vector<16x1xf32> to vector<16x16xf32>
    %36 = arith.mulf %23, %35 : vector<16x16xf32>
    %37 = vector.shape_cast %31 : vector<16x1xi1> to vector<16x1xi1>
    %38 = vector.broadcast %37 : vector<16x1xi1> to vector<16x16xi1>
    %39 = arith.select %38, %36, %23 : vector<16x16xi1>, vector<16x16xf32>
    %40 = arith.mulf %39, %39 : vector<16x16xf32>
    %cst_12 = arith.constant dense<0.000000e+00> : vector<16xf32>
    %41 = vector.multi_reduction <add>, %40, %cst_12 [1] : vector<16x16xf32> to vector<16xf32>
    %42 = vector.shape_cast %41 : vector<16xf32> to vector<16x1xf32>
    %43 = math.sqrt %42 : vector<16x1xf32>
    %cst_13 = arith.constant 1.000000e-15 : f32
    %44 = vector.broadcast %cst_13 : f32 to vector<16x1xf32>
    %45 = arith.maximumf %43, %44 : vector<16x1xf32>
    %cst_14 = arith.constant 1.000000e+00 : f32
    %46 = vector.broadcast %cst_14 : f32 to vector<16x1xf32>
    %47 = arith.mulf %46, %45 : vector<16x1xf32>
    %cst_15 = arith.constant -0.99999988 : f32
    %cst_16 = arith.constant 0.99999988 : f32
    %48 = vector.broadcast %cst_15 : f32 to vector<16x1xf32>
    %49 = arith.maximumf %48, %47 : vector<16x1xf32>
    %50 = vector.broadcast %cst_16 : f32 to vector<16x1xf32>
    %51 = arith.minimumf %50, %49 : vector<16x1xf32>
    %52 = math.log1p %51 : vector<16x1xf32>
    %cst_17 = arith.constant 0.000000e+00 : f32
    %53 = vector.broadcast %cst_17 : f32 to vector<16x1xf32>
    %54 = arith.subf %53, %51 : vector<16x1xf32>
    %55 = math.log1p %54 : vector<16x1xf32>
    %56 = arith.subf %52, %55 : vector<16x1xf32>
    %cst_18 = arith.constant 5.000000e-01 : f32
    %57 = vector.broadcast %cst_18 : f32 to vector<16x1xf32>
    %58 = arith.mulf %57, %56 : vector<16x1xf32>
    %cst_19 = arith.constant 1.000000e+00 : f32
    %59 = vector.broadcast %cst_19 : f32 to vector<16x1xf32>
    %60 = arith.mulf %59, %58 : vector<16x1xf32>
    %61 = tpu.reciprocal %45 {approx = true} : vector<16x1xf32> -> vector<16x1xf32>
    %62 = arith.mulf %60, %61 : vector<16x1xf32>
    %63 = vector.broadcast %62 : vector<16x1xf32> to vector<16x16xf32>
    %64 = arith.mulf %63, %39 : vector<16x16xf32>
    %c0_20 = arith.constant 0 : index
    %c0_21 = arith.constant 0 : index
    %65 = vector.load %arg3[%c0_20, %c0_21] : memref<16x32xf32, #tpu.memory_space<vmem>>, vector<16x32xf32>
    %cst_22 = arith.constant dense<0.000000e+00> : vector<16x32xf32>
    %66 = tpu.matmul %64, %65, %cst_22 {dimension_numbers = #tpu.dot_dimension_numbers<[1], [0], [0], [1], [0, 0, 1, 1], [], []>} : vector<16x16xf32>, vector<16x32xf32>, vector<16x32xf32> -> vector<16x32xf32>
    %67 = arith.mulf %66, %66 : vector<16x32xf32>
    %cst_23 = arith.constant dense<0.000000e+00> : vector<16xf32>
    %68 = vector.multi_reduction <add>, %67, %cst_23 [1] : vector<16x32xf32> to vector<16xf32>
    %69 = vector.shape_cast %68 : vector<16xf32> to vector<16x1xf32>
    %70 = math.sqrt %69 : vector<16x1xf32>
    %cst_24 = arith.constant 1.000000e-15 : f32
    %71 = vector.broadcast %cst_24 : f32 to vector<16x1xf32>
    %72 = arith.maximumf %70, %71 : vector<16x1xf32>
    %cst_25 = arith.constant 1.000000e+00 : f32
    %73 = vector.broadcast %cst_25 : f32 to vector<16x1xf32>
    %74 = arith.mulf %73, %72 : vector<16x1xf32>
    %cst_26 = arith.constant -1.500000e+01 : f32
    %cst_27 = arith.constant 1.500000e+01 : f32
    %75 = vector.broadcast %cst_26 : f32 to vector<16x1xf32>
    %76 = arith.maximumf %75, %74 : vector<16x1xf32>
    %77 = vector.broadcast %cst_27 : f32 to vector<16x1xf32>
    %78 = arith.minimumf %77, %76 : vector<16x1xf32>
    %79 = math.tanh %78 : vector<16x1xf32>
    %80 = vector.broadcast %79 : vector<16x1xf32> to vector<16x32xf32>
    %81 = arith.mulf %80, %66 : vector<16x32xf32>
    %cst_28 = arith.constant 1.000000e+00 : f32
    %82 = vector.broadcast %cst_28 : f32 to vector<16x1xf32>
    %83 = arith.mulf %82, %72 : vector<16x1xf32>
    %84 = tpu.reciprocal %83 {approx = true} : vector<16x1xf32> -> vector<16x1xf32>
    %85 = vector.broadcast %84 : vector<16x1xf32> to vector<16x32xf32>
    %86 = arith.mulf %81, %85 : vector<16x32xf32>
    %87 = arith.mulf %86, %86 : vector<16x32xf32>
    %cst_29 = arith.constant dense<0.000000e+00> : vector<16xf32>
    %88 = vector.multi_reduction <add>, %87, %cst_29 [1] : vector<16x32xf32> to vector<16xf32>
    %89 = vector.shape_cast %88 : vector<16xf32> to vector<16x1xf32>
    %90 = math.sqrt %89 : vector<16x1xf32>
    %cst_30 = arith.constant 1.000000e-15 : f32
    %91 = vector.broadcast %cst_30 : f32 to vector<16x1xf32>
    %92 = arith.maximumf %90, %91 : vector<16x1xf32>
    %cst_31 = arith.constant 0.995999991 : f32
    %93 = vector.broadcast %cst_31 : f32 to vector<16x1xf32>
    %94 = arith.cmpf ogt, %92, %93 : vector<16x1xf32>
    %95 = tpu.reciprocal %92 {approx = true} : vector<16x1xf32> -> vector<16x1xf32>
    %cst_32 = arith.constant 0.995999991 : f32
    %96 = vector.broadcast %cst_32 : f32 to vector<16x1xf32>
    %97 = arith.mulf %96, %95 : vector<16x1xf32>
    %98 = vector.broadcast %97 : vector<16x1xf32> to vector<16x32xf32>
    %99 = arith.mulf %86, %98 : vector<16x32xf32>
    %100 = vector.shape_cast %94 : vector<16x1xi1> to vector<16x1xi1>
    %101 = vector.broadcast %100 : vector<16x1xi1> to vector<16x32xi1>
    %102 = arith.select %101, %99, %86 : vector<16x32xi1>, vector<16x32xf32>
    %c0_33 = arith.constant 0 : index
    %c0_34 = arith.constant 0 : index
    %103 = vector.load %arg4[%c0_33, %c0_34] : memref<1x32xf32, #tpu.memory_space<vmem>>, vector<1x32xf32>
    %104 = arith.mulf %103, %103 : vector<1x32xf32>
    %cst_35 = arith.constant dense<0.000000e+00> : vector<1xf32>
    %105 = vector.multi_reduction <add>, %104, %cst_35 [1] : vector<1x32xf32> to vector<1xf32>
    %106 = vector.shape_cast %105 : vector<1xf32> to vector<1x1xf32>
    %107 = math.sqrt %106 : vector<1x1xf32>
    %cst_36 = arith.constant 1.000000e-15 : f32
    %108 = vector.broadcast %cst_36 : f32 to vector<1x1xf32>
    %109 = arith.maximumf %107, %108 : vector<1x1xf32>
    %cst_37 = arith.constant 1.000000e+00 : f32
    %110 = vector.broadcast %cst_37 : f32 to vector<1x1xf32>
    %111 = arith.mulf %110, %109 : vector<1x1xf32>
    %cst_38 = arith.constant -1.500000e+01 : f32
    %cst_39 = arith.constant 1.500000e+01 : f32
    %112 = vector.broadcast %cst_38 : f32 to vector<1x1xf32>
    %113 = arith.maximumf %112, %111 : vector<1x1xf32>
    %114 = vector.broadcast %cst_39 : f32 to vector<1x1xf32>
    %115 = arith.minimumf %114, %113 : vector<1x1xf32>
    %116 = math.tanh %115 : vector<1x1xf32>
    %117 = vector.broadcast %116 : vector<1x1xf32> to vector<1x32xf32>
    %118 = arith.mulf %117, %103 : vector<1x32xf32>
    %cst_40 = arith.constant 1.000000e+00 : f32
    %119 = vector.broadcast %cst_40 : f32 to vector<1x1xf32>
    %120 = arith.mulf %119, %109 : vector<1x1xf32>
    %121 = tpu.reciprocal %120 {approx = true} : vector<1x1xf32> -> vector<1x1xf32>
    %122 = vector.broadcast %121 : vector<1x1xf32> to vector<1x32xf32>
    %123 = arith.mulf %118, %122 : vector<1x32xf32>
    %124 = arith.mulf %123, %123 : vector<1x32xf32>
    %cst_41 = arith.constant dense<0.000000e+00> : vector<1xf32>
    %125 = vector.multi_reduction <add>, %124, %cst_41 [1] : vector<1x32xf32> to vector<1xf32>
    %126 = vector.shape_cast %125 : vector<1xf32> to vector<1x1xf32>
    %127 = math.sqrt %126 : vector<1x1xf32>
    %cst_42 = arith.constant 1.000000e-15 : f32
    %128 = vector.broadcast %cst_42 : f32 to vector<1x1xf32>
    %129 = arith.maximumf %127, %128 : vector<1x1xf32>
    %cst_43 = arith.constant 0.995999991 : f32
    %130 = vector.broadcast %cst_43 : f32 to vector<1x1xf32>
    %131 = arith.cmpf ogt, %129, %130 : vector<1x1xf32>
    %132 = tpu.reciprocal %129 {approx = true} : vector<1x1xf32> -> vector<1x1xf32>
    %cst_44 = arith.constant 0.995999991 : f32
    %133 = vector.broadcast %cst_44 : f32 to vector<1x1xf32>
    %134 = arith.mulf %133, %132 : vector<1x1xf32>
    %135 = vector.broadcast %134 : vector<1x1xf32> to vector<1x32xf32>
    %136 = arith.mulf %123, %135 : vector<1x32xf32>
    %137 = vector.shape_cast %131 : vector<1x1xi1> to vector<1x1xi1>
    %138 = vector.broadcast %137 : vector<1x1xi1> to vector<1x32xi1>
    %139 = arith.select %138, %136, %123 : vector<1x32xi1>, vector<1x32xf32>
    %140 = arith.mulf %102, %102 : vector<16x32xf32>
    %cst_45 = arith.constant dense<0.000000e+00> : vector<16xf32>
    %141 = vector.multi_reduction <add>, %140, %cst_45 [1] : vector<16x32xf32> to vector<16xf32>
    %142 = vector.shape_cast %141 : vector<16xf32> to vector<16x1xf32>
    %143 = arith.mulf %139, %139 : vector<1x32xf32>
    %cst_46 = arith.constant dense<0.000000e+00> : vector<1xf32>
    %144 = vector.multi_reduction <add>, %143, %cst_46 [1] : vector<1x32xf32> to vector<1xf32>
    %145 = vector.shape_cast %144 : vector<1xf32> to vector<1x1xf32>
    %146 = vector.broadcast %139 : vector<1x32xf32> to vector<16x32xf32>
    %147 = arith.mulf %102, %146 : vector<16x32xf32>
    %cst_47 = arith.constant dense<0.000000e+00> : vector<16xf32>
    %148 = vector.multi_reduction <add>, %147, %cst_47 [1] : vector<16x32xf32> to vector<16xf32>
    %149 = vector.shape_cast %148 : vector<16xf32> to vector<16x1xf32>
    %cst_48 = arith.constant 2.000000e+00 : f32
    %150 = vector.broadcast %cst_48 : f32 to vector<16x1xf32>
    %151 = arith.mulf %150, %149 : vector<16x1xf32>
    %cst_49 = arith.constant 1.000000e+00 : f32
    %152 = vector.broadcast %cst_49 : f32 to vector<16x1xf32>
    %153 = arith.addf %152, %151 : vector<16x1xf32>
    %cst_50 = arith.constant 1.000000e+00 : f32
    %154 = vector.broadcast %cst_50 : f32 to vector<1x1xf32>
    %155 = arith.mulf %154, %145 : vector<1x1xf32>
    %156 = vector.broadcast %155 : vector<1x1xf32> to vector<16x1xf32>
    %157 = arith.addf %153, %156 : vector<16x1xf32>
    %158 = vector.broadcast %157 : vector<16x1xf32> to vector<16x32xf32>
    %159 = arith.mulf %158, %102 : vector<16x32xf32>
    %cst_51 = arith.constant 1.000000e+00 : f32
    %160 = vector.broadcast %cst_51 : f32 to vector<16x1xf32>
    %161 = arith.mulf %160, %142 : vector<16x1xf32>
    %cst_52 = arith.constant 1.000000e+00 : f32
    %162 = vector.broadcast %cst_52 : f32 to vector<16x1xf32>
    %163 = arith.subf %162, %161 : vector<16x1xf32>
    %164 = vector.broadcast %163 : vector<16x1xf32> to vector<16x32xf32>
    %165 = vector.broadcast %139 : vector<1x32xf32> to vector<16x32xf32>
    %166 = arith.mulf %164, %165 : vector<16x32xf32>
    %167 = arith.addf %159, %166 : vector<16x32xf32>
    %cst_53 = arith.constant 2.000000e+00 : f32
    %168 = vector.broadcast %cst_53 : f32 to vector<16x1xf32>
    %169 = arith.mulf %168, %149 : vector<16x1xf32>
    %cst_54 = arith.constant 1.000000e+00 : f32
    %170 = vector.broadcast %cst_54 : f32 to vector<16x1xf32>
    %171 = arith.addf %170, %169 : vector<16x1xf32>
    %cst_55 = arith.constant 1.000000e+00 : f32
    %172 = vector.broadcast %cst_55 : f32 to vector<16x1xf32>
    %173 = arith.mulf %172, %142 : vector<16x1xf32>
    %174 = vector.broadcast %145 : vector<1x1xf32> to vector<16x1xf32>
    %175 = arith.mulf %173, %174 : vector<16x1xf32>
    %176 = arith.addf %171, %175 : vector<16x1xf32>
    %cst_56 = arith.constant 1.000000e-15 : f32
    %177 = vector.broadcast %cst_56 : f32 to vector<16x1xf32>
    %178 = arith.maximumf %176, %177 : vector<16x1xf32>
    %179 = vector.broadcast %178 : vector<16x1xf32> to vector<16x32xf32>
    %180 = arith.divf %167, %179 : vector<16x32xf32>
    %181 = arith.mulf %180, %180 : vector<16x32xf32>
    %cst_57 = arith.constant dense<0.000000e+00> : vector<16xf32>
    %182 = vector.multi_reduction <add>, %181, %cst_57 [1] : vector<16x32xf32> to vector<16xf32>
    %183 = vector.shape_cast %182 : vector<16xf32> to vector<16x1xf32>
    %184 = math.sqrt %183 : vector<16x1xf32>
    %cst_58 = arith.constant 1.000000e-15 : f32
    %185 = vector.broadcast %cst_58 : f32 to vector<16x1xf32>
    %186 = arith.maximumf %184, %185 : vector<16x1xf32>
    %cst_59 = arith.constant 0.995999991 : f32
    %187 = vector.broadcast %cst_59 : f32 to vector<16x1xf32>
    %188 = arith.cmpf ogt, %186, %187 : vector<16x1xf32>
    %189 = tpu.reciprocal %186 {approx = true} : vector<16x1xf32> -> vector<16x1xf32>
    %cst_60 = arith.constant 0.995999991 : f32
    %190 = vector.broadcast %cst_60 : f32 to vector<16x1xf32>
    %191 = arith.mulf %190, %189 : vector<16x1xf32>
    %192 = vector.broadcast %191 : vector<16x1xf32> to vector<16x32xf32>
    %193 = arith.mulf %180, %192 : vector<16x32xf32>
    %194 = vector.shape_cast %188 : vector<16x1xi1> to vector<16x1xi1>
    %195 = vector.broadcast %194 : vector<16x1xi1> to vector<16x32xi1>
    %196 = arith.select %195, %193, %180 : vector<16x32xi1>, vector<16x32xf32>
    %197 = arith.mulf %196, %196 : vector<16x32xf32>
    %cst_61 = arith.constant dense<0.000000e+00> : vector<16xf32>
    %198 = vector.multi_reduction <add>, %197, %cst_61 [1] : vector<16x32xf32> to vector<16xf32>
    %199 = vector.shape_cast %198 : vector<16xf32> to vector<16x1xf32>
    %200 = math.sqrt %199 : vector<16x1xf32>
    %cst_62 = arith.constant 1.000000e-15 : f32
    %201 = vector.broadcast %cst_62 : f32 to vector<16x1xf32>
    %202 = arith.maximumf %200, %201 : vector<16x1xf32>
    %cst_63 = arith.constant 1.000000e+00 : f32
    %203 = vector.broadcast %cst_63 : f32 to vector<16x1xf32>
    %204 = arith.mulf %203, %202 : vector<16x1xf32>
    %cst_64 = arith.constant -0.99999988 : f32
    %cst_65 = arith.constant 0.99999988 : f32
    %205 = vector.broadcast %cst_64 : f32 to vector<16x1xf32>
    %206 = arith.maximumf %205, %204 : vector<16x1xf32>
    %207 = vector.broadcast %cst_65 : f32 to vector<16x1xf32>
    %208 = arith.minimumf %207, %206 : vector<16x1xf32>
    %209 = math.log1p %208 : vector<16x1xf32>
    %cst_66 = arith.constant 0.000000e+00 : f32
    %210 = vector.broadcast %cst_66 : f32 to vector<16x1xf32>
    %211 = arith.subf %210, %208 : vector<16x1xf32>
    %212 = math.log1p %211 : vector<16x1xf32>
    %213 = arith.subf %209, %212 : vector<16x1xf32>
    %cst_67 = arith.constant 5.000000e-01 : f32
    %214 = vector.broadcast %cst_67 : f32 to vector<16x1xf32>
    %215 = arith.mulf %214, %213 : vector<16x1xf32>
    %cst_68 = arith.constant 1.000000e+00 : f32
    %216 = vector.broadcast %cst_68 : f32 to vector<16x1xf32>
    %217 = arith.mulf %216, %215 : vector<16x1xf32>
    %218 = tpu.reciprocal %202 {approx = true} : vector<16x1xf32> -> vector<16x1xf32>
    %219 = arith.mulf %217, %218 : vector<16x1xf32>
    %220 = vector.broadcast %219 : vector<16x1xf32> to vector<16x32xf32>
    %221 = arith.mulf %220, %196 : vector<16x32xf32>
    %222 = arith.truncf %221 : vector<16x32xf32> to vector<16x32xbf16>
    %c0_69 = arith.constant 0 : index
    %c0_70 = arith.constant 0 : index
    %223 = vector.load %arg5[%c0_69, %c0_70] : memref<16x32xbf16, #tpu.memory_space<vmem>>, vector<16x32xbf16>
    tpu.vector_store %arg5[%c0_69, %c0_70], %222 {strides = array<i32>} : memref<16x32xbf16, #tpu.memory_space<vmem>>, vector<16x32xbf16>,
    return
  }
  func.func @transform_0(%arg0: i32) -> (i32, i32) {
    %c0_i32 = arith.constant 0 : i32
    %c0_i32_0 = arith.constant 0 : i32
    return %arg0, %c0_i32 : i32, i32
  }
  func.func @transform_1(%arg0: i32) -> (i32, i32) {
    %c0_i32 = arith.constant 0 : i32
    %c0_i32_0 = arith.constant 0 : i32
    return %arg0, %c0_i32 : i32, i32
  }
  func.func @transform_2(%arg0: i32) -> (i32, i32) {
    %c0_i32 = arith.constant 0 : i32
    %c0_i32_0 = arith.constant 0 : i32
    %c0_i32_1 = arith.constant 0 : i32
    return %c0_i32, %c0_i32_0 : i32, i32
  }
  func.func @transform_3(%arg0: i32) -> (i32, i32) {
    %c0_i32 = arith.constant 0 : i32
    %c0_i32_0 = arith.constant 0 : i32
    %c0_i32_1 = arith.constant 0 : i32
    return %c0_i32, %c0_i32_0 : i32, i32
  }
  func.func @transform_4(%arg0: i32) -> (i32, i32) {
    %c0_i32 = arith.constant 0 : i32
    %c0_i32_0 = arith.constant 0 : i32
    return %arg0, %c0_i32 : i32, i32
  }
}

module attributes {stable_mosaic.version = 11 : i64} {
  func.func @_hyp_agg_kernel(%arg0: i32, %arg1: i32, %arg2: memref<16x16xbf16, #tpu.memory_space<vmem>>, %arg3: memref<16x32xbf16, #tpu.memory_space<vmem>>, %arg4: memref<16x32xbf16, #tpu.memory_space<vmem>>, %arg5: memref<16x32xf32, #tpu.memory_space<vmem>>) attributes {dimension_semantics = [#tpu.dimension_semantics<parallel>, #tpu.dimension_semantics<arbitrary>], iteration_bounds = array<i64: 1, 1>, scalar_prefetch = 0 : i64, scratch_operands = 1 : i64, tpu.core_type = #tpu.core_type<tc>, window_params = [{transform_indices = @transform_0, window_bounds = array<i64: 16, 16>}, {transform_indices = @transform_1, window_bounds = array<i64: 16, 32>}, {transform_indices = @transform_2, window_bounds = array<i64: 16, 32>}]} {
    %c0_i32 = arith.constant 0 : i32
    %0 = arith.cmpi eq, %arg1, %c0_i32 : i32
    %1 = arith.extui %0 : i1 to i32
    %c0_i32_0 = arith.constant 0 : i32
    %2 = arith.cmpi ne, %1, %c0_i32_0 : i32
    scf.if %2 {
      %cst_10 = arith.constant 0.000000e+00 : f32
      %12 = vector.broadcast %cst_10 : f32 to vector<16x32xf32>
      %c0_11 = arith.constant 0 : index
      %c0_12 = arith.constant 0 : index
      %13 = vector.load %arg5[%c0_11, %c0_12] : memref<16x32xf32, #tpu.memory_space<vmem>>, vector<16x32xf32>
      tpu.vector_store %arg5[%c0_11, %c0_12], %12 {strides = array<i32>} : memref<16x32xf32, #tpu.memory_space<vmem>>, vector<16x32xf32>,
    } else {
    }
    %c0 = arith.constant 0 : index
    %c0_1 = arith.constant 0 : index
    %3 = vector.load %arg5[%c0, %c0_1] : memref<16x32xf32, #tpu.memory_space<vmem>>, vector<16x32xf32>
    %c0_2 = arith.constant 0 : index
    %c0_3 = arith.constant 0 : index
    %4 = vector.load %arg2[%c0_2, %c0_3] : memref<16x16xbf16, #tpu.memory_space<vmem>>, vector<16x16xbf16>
    %c0_4 = arith.constant 0 : index
    %c0_5 = arith.constant 0 : index
    %5 = vector.load %arg3[%c0_4, %c0_5] : memref<16x32xbf16, #tpu.memory_space<vmem>>, vector<16x32xbf16>
    %cst = arith.constant dense<0.000000e+00> : vector<16x32xf32>
    %6 = tpu.matmul %4, %5, %cst {dimension_numbers = #tpu.dot_dimension_numbers<[1], [0], [0], [1], [0, 0, 1, 1], [], []>} : vector<16x16xbf16>, vector<16x32xbf16>, vector<16x32xf32> -> vector<16x32xf32>
    %7 = arith.addf %3, %6 : vector<16x32xf32>
    %c0_6 = arith.constant 0 : index
    %c0_7 = arith.constant 0 : index
    %8 = vector.load %arg5[%c0_6, %c0_7] : memref<16x32xf32, #tpu.memory_space<vmem>>, vector<16x32xf32>
    tpu.vector_store %arg5[%c0_6, %c0_7], %7 {strides = array<i32>} : memref<16x32xf32, #tpu.memory_space<vmem>>, vector<16x32xf32>,
    %c0_i32_8 = arith.constant 0 : i32
    %9 = arith.cmpi eq, %arg1, %c0_i32_8 : i32
    %10 = arith.extui %9 : i1 to i32
    %c0_i32_9 = arith.constant 0 : i32
    %11 = arith.cmpi ne, %10, %c0_i32_9 : i32
    scf.if %11 {
      %c0_10 = arith.constant 0 : index
      %c0_11 = arith.constant 0 : index
      %12 = vector.load %arg5[%c0_10, %c0_11] : memref<16x32xf32, #tpu.memory_space<vmem>>, vector<16x32xf32>
      %13 = arith.mulf %12, %12 : vector<16x32xf32>
      %cst_12 = arith.constant dense<0.000000e+00> : vector<16xf32>
      %14 = vector.multi_reduction <add>, %13, %cst_12 [1] : vector<16x32xf32> to vector<16xf32>
      %15 = vector.shape_cast %14 : vector<16xf32> to vector<16x1xf32>
      %16 = math.sqrt %15 : vector<16x1xf32>
      %cst_13 = arith.constant 1.000000e-15 : f32
      %17 = vector.broadcast %cst_13 : f32 to vector<16x1xf32>
      %18 = arith.maximumf %16, %17 : vector<16x1xf32>
      %cst_14 = arith.constant 1.000000e+00 : f32
      %19 = vector.broadcast %cst_14 : f32 to vector<16x1xf32>
      %20 = arith.mulf %19, %18 : vector<16x1xf32>
      %cst_15 = arith.constant -1.500000e+01 : f32
      %cst_16 = arith.constant 1.500000e+01 : f32
      %21 = vector.broadcast %cst_15 : f32 to vector<16x1xf32>
      %22 = arith.maximumf %21, %20 : vector<16x1xf32>
      %23 = vector.broadcast %cst_16 : f32 to vector<16x1xf32>
      %24 = arith.minimumf %23, %22 : vector<16x1xf32>
      %25 = math.tanh %24 : vector<16x1xf32>
      %26 = vector.broadcast %25 : vector<16x1xf32> to vector<16x32xf32>
      %27 = arith.mulf %26, %12 : vector<16x32xf32>
      %cst_17 = arith.constant 1.000000e+00 : f32
      %28 = vector.broadcast %cst_17 : f32 to vector<16x1xf32>
      %29 = arith.mulf %28, %18 : vector<16x1xf32>
      %30 = tpu.reciprocal %29 {approx = true} : vector<16x1xf32> -> vector<16x1xf32>
      %31 = vector.broadcast %30 : vector<16x1xf32> to vector<16x32xf32>
      %32 = arith.mulf %27, %31 : vector<16x32xf32>
      %33 = arith.mulf %32, %32 : vector<16x32xf32>
      %cst_18 = arith.constant dense<0.000000e+00> : vector<16xf32>
      %34 = vector.multi_reduction <add>, %33, %cst_18 [1] : vector<16x32xf32> to vector<16xf32>
      %35 = vector.shape_cast %34 : vector<16xf32> to vector<16x1xf32>
      %36 = math.sqrt %35 : vector<16x1xf32>
      %cst_19 = arith.constant 1.000000e-15 : f32
      %37 = vector.broadcast %cst_19 : f32 to vector<16x1xf32>
      %38 = arith.maximumf %36, %37 : vector<16x1xf32>
      %cst_20 = arith.constant 0.995999991 : f32
      %39 = vector.broadcast %cst_20 : f32 to vector<16x1xf32>
      %40 = arith.cmpf ogt, %38, %39 : vector<16x1xf32>
      %41 = tpu.reciprocal %38 {approx = true} : vector<16x1xf32> -> vector<16x1xf32>
      %cst_21 = arith.constant 0.995999991 : f32
      %42 = vector.broadcast %cst_21 : f32 to vector<16x1xf32>
      %43 = arith.mulf %42, %41 : vector<16x1xf32>
      %44 = vector.broadcast %43 : vector<16x1xf32> to vector<16x32xf32>
      %45 = arith.mulf %32, %44 : vector<16x32xf32>
      %46 = vector.shape_cast %40 : vector<16x1xi1> to vector<16x1xi1>
      %47 = vector.broadcast %46 : vector<16x1xi1> to vector<16x32xi1>
      %48 = arith.select %47, %45, %32 : vector<16x32xi1>, vector<16x32xf32>
      %49 = arith.mulf %48, %48 : vector<16x32xf32>
      %cst_22 = arith.constant dense<0.000000e+00> : vector<16xf32>
      %50 = vector.multi_reduction <add>, %49, %cst_22 [1] : vector<16x32xf32> to vector<16xf32>
      %51 = vector.shape_cast %50 : vector<16xf32> to vector<16x1xf32>
      %52 = math.sqrt %51 : vector<16x1xf32>
      %cst_23 = arith.constant 1.000000e-15 : f32
      %53 = vector.broadcast %cst_23 : f32 to vector<16x1xf32>
      %54 = arith.maximumf %52, %53 : vector<16x1xf32>
      %cst_24 = arith.constant 1.000000e+00 : f32
      %55 = vector.broadcast %cst_24 : f32 to vector<16x1xf32>
      %56 = arith.mulf %55, %54 : vector<16x1xf32>
      %cst_25 = arith.constant -0.99999988 : f32
      %cst_26 = arith.constant 0.99999988 : f32
      %57 = vector.broadcast %cst_25 : f32 to vector<16x1xf32>
      %58 = arith.maximumf %57, %56 : vector<16x1xf32>
      %59 = vector.broadcast %cst_26 : f32 to vector<16x1xf32>
      %60 = arith.minimumf %59, %58 : vector<16x1xf32>
      %61 = math.log1p %60 : vector<16x1xf32>
      %cst_27 = arith.constant 0.000000e+00 : f32
      %62 = vector.broadcast %cst_27 : f32 to vector<16x1xf32>
      %63 = arith.subf %62, %60 : vector<16x1xf32>
      %64 = math.log1p %63 : vector<16x1xf32>
      %65 = arith.subf %61, %64 : vector<16x1xf32>
      %cst_28 = arith.constant 5.000000e-01 : f32
      %66 = vector.broadcast %cst_28 : f32 to vector<16x1xf32>
      %67 = arith.mulf %66, %65 : vector<16x1xf32>
      %cst_29 = arith.constant 1.000000e+00 : f32
      %68 = vector.broadcast %cst_29 : f32 to vector<16x1xf32>
      %69 = arith.mulf %68, %67 : vector<16x1xf32>
      %70 = tpu.reciprocal %54 {approx = true} : vector<16x1xf32> -> vector<16x1xf32>
      %71 = arith.mulf %69, %70 : vector<16x1xf32>
      %72 = vector.broadcast %71 : vector<16x1xf32> to vector<16x32xf32>
      %73 = arith.mulf %72, %48 : vector<16x32xf32>
      %cst_30 = arith.constant 0.000000e+00 : f32
      %74 = vector.broadcast %cst_30 : f32 to vector<16x32xf32>
      %75 = arith.maximumf %73, %74 : vector<16x32xf32>
      %76 = arith.mulf %75, %75 : vector<16x32xf32>
      %cst_31 = arith.constant dense<0.000000e+00> : vector<16xf32>
      %77 = vector.multi_reduction <add>, %76, %cst_31 [1] : vector<16x32xf32> to vector<16xf32>
      %78 = vector.shape_cast %77 : vector<16xf32> to vector<16x1xf32>
      %79 = math.sqrt %78 : vector<16x1xf32>
      %cst_32 = arith.constant 1.000000e-15 : f32
      %80 = vector.broadcast %cst_32 : f32 to vector<16x1xf32>
      %81 = arith.maximumf %79, %80 : vector<16x1xf32>
      %cst_33 = arith.constant 1.000000e+00 : f32
      %82 = vector.broadcast %cst_33 : f32 to vector<16x1xf32>
      %83 = arith.mulf %82, %81 : vector<16x1xf32>
      %cst_34 = arith.constant -1.500000e+01 : f32
      %cst_35 = arith.constant 1.500000e+01 : f32
      %84 = vector.broadcast %cst_34 : f32 to vector<16x1xf32>
      %85 = arith.maximumf %84, %83 : vector<16x1xf32>
      %86 = vector.broadcast %cst_35 : f32 to vector<16x1xf32>
      %87 = arith.minimumf %86, %85 : vector<16x1xf32>
      %88 = math.tanh %87 : vector<16x1xf32>
      %89 = vector.broadcast %88 : vector<16x1xf32> to vector<16x32xf32>
      %90 = arith.mulf %89, %75 : vector<16x32xf32>
      %cst_36 = arith.constant 1.000000e+00 : f32
      %91 = vector.broadcast %cst_36 : f32 to vector<16x1xf32>
      %92 = arith.mulf %91, %81 : vector<16x1xf32>
      %93 = tpu.reciprocal %92 {approx = true} : vector<16x1xf32> -> vector<16x1xf32>
      %94 = vector.broadcast %93 : vector<16x1xf32> to vector<16x32xf32>
      %95 = arith.mulf %90, %94 : vector<16x32xf32>
      %96 = arith.mulf %95, %95 : vector<16x32xf32>
      %cst_37 = arith.constant dense<0.000000e+00> : vector<16xf32>
      %97 = vector.multi_reduction <add>, %96, %cst_37 [1] : vector<16x32xf32> to vector<16xf32>
      %98 = vector.shape_cast %97 : vector<16xf32> to vector<16x1xf32>
      %99 = math.sqrt %98 : vector<16x1xf32>
      %cst_38 = arith.constant 1.000000e-15 : f32
      %100 = vector.broadcast %cst_38 : f32 to vector<16x1xf32>
      %101 = arith.maximumf %99, %100 : vector<16x1xf32>
      %cst_39 = arith.constant 0.995999991 : f32
      %102 = vector.broadcast %cst_39 : f32 to vector<16x1xf32>
      %103 = arith.cmpf ogt, %101, %102 : vector<16x1xf32>
      %104 = tpu.reciprocal %101 {approx = true} : vector<16x1xf32> -> vector<16x1xf32>
      %cst_40 = arith.constant 0.995999991 : f32
      %105 = vector.broadcast %cst_40 : f32 to vector<16x1xf32>
      %106 = arith.mulf %105, %104 : vector<16x1xf32>
      %107 = vector.broadcast %106 : vector<16x1xf32> to vector<16x32xf32>
      %108 = arith.mulf %95, %107 : vector<16x32xf32>
      %109 = vector.shape_cast %103 : vector<16x1xi1> to vector<16x1xi1>
      %110 = vector.broadcast %109 : vector<16x1xi1> to vector<16x32xi1>
      %111 = arith.select %110, %108, %95 : vector<16x32xi1>, vector<16x32xf32>
      %112 = arith.mulf %111, %111 : vector<16x32xf32>
      %cst_41 = arith.constant dense<0.000000e+00> : vector<16xf32>
      %113 = vector.multi_reduction <add>, %112, %cst_41 [1] : vector<16x32xf32> to vector<16xf32>
      %114 = vector.shape_cast %113 : vector<16xf32> to vector<16x1xf32>
      %115 = math.sqrt %114 : vector<16x1xf32>
      %cst_42 = arith.constant 1.000000e-15 : f32
      %116 = vector.broadcast %cst_42 : f32 to vector<16x1xf32>
      %117 = arith.maximumf %115, %116 : vector<16x1xf32>
      %cst_43 = arith.constant 1.000000e+00 : f32
      %118 = vector.broadcast %cst_43 : f32 to vector<16x1xf32>
      %119 = arith.mulf %118, %117 : vector<16x1xf32>
      %cst_44 = arith.constant -0.99999988 : f32
      %cst_45 = arith.constant 0.99999988 : f32
      %120 = vector.broadcast %cst_44 : f32 to vector<16x1xf32>
      %121 = arith.maximumf %120, %119 : vector<16x1xf32>
      %122 = vector.broadcast %cst_45 : f32 to vector<16x1xf32>
      %123 = arith.minimumf %122, %121 : vector<16x1xf32>
      %124 = math.log1p %123 : vector<16x1xf32>
      %cst_46 = arith.constant 0.000000e+00 : f32
      %125 = vector.broadcast %cst_46 : f32 to vector<16x1xf32>
      %126 = arith.subf %125, %123 : vector<16x1xf32>
      %127 = math.log1p %126 : vector<16x1xf32>
      %128 = arith.subf %124, %127 : vector<16x1xf32>
      %cst_47 = arith.constant 5.000000e-01 : f32
      %129 = vector.broadcast %cst_47 : f32 to vector<16x1xf32>
      %130 = arith.mulf %129, %128 : vector<16x1xf32>
      %cst_48 = arith.constant 1.000000e+00 : f32
      %131 = vector.broadcast %cst_48 : f32 to vector<16x1xf32>
      %132 = arith.mulf %131, %130 : vector<16x1xf32>
      %133 = tpu.reciprocal %117 {approx = true} : vector<16x1xf32> -> vector<16x1xf32>
      %134 = arith.mulf %132, %133 : vector<16x1xf32>
      %135 = vector.broadcast %134 : vector<16x1xf32> to vector<16x32xf32>
      %136 = arith.mulf %135, %111 : vector<16x32xf32>
      %137 = arith.truncf %136 : vector<16x32xf32> to vector<16x32xbf16>
      %c0_49 = arith.constant 0 : index
      %c0_50 = arith.constant 0 : index
      %138 = vector.load %arg4[%c0_49, %c0_50] : memref<16x32xbf16, #tpu.memory_space<vmem>>, vector<16x32xbf16>
      tpu.vector_store %arg4[%c0_49, %c0_50], %137 {strides = array<i32>} : memref<16x32xbf16, #tpu.memory_space<vmem>>, vector<16x32xbf16>,
    } else {
    }
    return
  }
  func.func @transform_0(%arg0: i32, %arg1: i32) -> (i32, i32) {
    %c0_i32 = arith.constant 0 : i32
    return %arg0, %arg1 : i32, i32
  }
  func.func @transform_1(%arg0: i32, %arg1: i32) -> (i32, i32) {
    %c0_i32 = arith.constant 0 : i32
    %c0_i32_0 = arith.constant 0 : i32
    return %arg1, %c0_i32 : i32, i32
  }
  func.func @transform_2(%arg0: i32, %arg1: i32) -> (i32, i32) {
    %c0_i32 = arith.constant 0 : i32
    %c0_i32_0 = arith.constant 0 : i32
    return %arg0, %c0_i32 : i32, i32
  }
}

module attributes {stable_mosaic.version = 11 : i64} {
  func.func @_hyp_linear_kernel(%arg0: i32, %arg1: memref<16x32xbf16, #tpu.memory_space<vmem>>, %arg2: memref<16x1xf32, #tpu.memory_space<vmem>>, %arg3: memref<32x32xf32, #tpu.memory_space<vmem>>, %arg4: memref<1x32xf32, #tpu.memory_space<vmem>>, %arg5: memref<16x32xbf16, #tpu.memory_space<vmem>>) attributes {dimension_semantics = [#tpu.dimension_semantics<parallel>], iteration_bounds = array<i64: 1>, scalar_prefetch = 0 : i64, scratch_operands = 0 : i64, tpu.core_type = #tpu.core_type<tc>, window_params = [{transform_indices = @transform_0, window_bounds = array<i64: 16, 32>}, {transform_indices = @transform_1, window_bounds = array<i64: 16, 1>}, {pipeline_mode = #tpu.pipeline_mode<synchronous>, transform_indices = @transform_2, window_bounds = array<i64: 32, 32>}, {pipeline_mode = #tpu.pipeline_mode<synchronous>, transform_indices = @transform_3, window_bounds = array<i64: 1, 32>}, {transform_indices = @transform_4, window_bounds = array<i64: 16, 32>}]} {
    %c0 = arith.constant 0 : index
    %c0_0 = arith.constant 0 : index
    %0 = vector.load %arg1[%c0, %c0_0] : memref<16x32xbf16, #tpu.memory_space<vmem>>, vector<16x32xbf16>
    %1 = arith.extf %0 : vector<16x32xbf16> to vector<16x32xf32>
    %c0_1 = arith.constant 0 : index
    %c0_2 = arith.constant 0 : index
    %2 = vector.load %arg2[%c0_1, %c0_2] : memref<16x1xf32, #tpu.memory_space<vmem>>, vector<16x1xf32>
    %3 = vector.broadcast %2 : vector<16x1xf32> to vector<16x32xf32>
    %4 = arith.mulf %1, %3 : vector<16x32xf32>
    %c0_3 = arith.constant 0 : index
    %c0_4 = arith.constant 0 : index
    %5 = vector.load %arg3[%c0_3, %c0_4] : memref<32x32xf32, #tpu.memory_space<vmem>>, vector<32x32xf32>
    %cst = arith.constant dense<0.000000e+00> : vector<16x32xf32>
    %6 = tpu.matmul %4, %5, %cst {dimension_numbers = #tpu.dot_dimension_numbers<[1], [0], [0], [1], [0, 0, 1, 1], [], []>} : vector<16x32xf32>, vector<32x32xf32>, vector<16x32xf32> -> vector<16x32xf32>
    %7 = arith.mulf %6, %6 : vector<16x32xf32>
    %cst_5 = arith.constant dense<0.000000e+00> : vector<16xf32>
    %8 = vector.multi_reduction <add>, %7, %cst_5 [1] : vector<16x32xf32> to vector<16xf32>
    %9 = vector.shape_cast %8 : vector<16xf32> to vector<16x1xf32>
    %10 = math.sqrt %9 : vector<16x1xf32>
    %cst_6 = arith.constant 1.000000e-15 : f32
    %11 = vector.broadcast %cst_6 : f32 to vector<16x1xf32>
    %12 = arith.maximumf %10, %11 : vector<16x1xf32>
    %cst_7 = arith.constant 1.000000e+00 : f32
    %13 = vector.broadcast %cst_7 : f32 to vector<16x1xf32>
    %14 = arith.mulf %13, %12 : vector<16x1xf32>
    %cst_8 = arith.constant -1.500000e+01 : f32
    %cst_9 = arith.constant 1.500000e+01 : f32
    %15 = vector.broadcast %cst_8 : f32 to vector<16x1xf32>
    %16 = arith.maximumf %15, %14 : vector<16x1xf32>
    %17 = vector.broadcast %cst_9 : f32 to vector<16x1xf32>
    %18 = arith.minimumf %17, %16 : vector<16x1xf32>
    %19 = math.tanh %18 : vector<16x1xf32>
    %20 = vector.broadcast %19 : vector<16x1xf32> to vector<16x32xf32>
    %21 = arith.mulf %20, %6 : vector<16x32xf32>
    %cst_10 = arith.constant 1.000000e+00 : f32
    %22 = vector.broadcast %cst_10 : f32 to vector<16x1xf32>
    %23 = arith.mulf %22, %12 : vector<16x1xf32>
    %24 = tpu.reciprocal %23 {approx = true} : vector<16x1xf32> -> vector<16x1xf32>
    %25 = vector.broadcast %24 : vector<16x1xf32> to vector<16x32xf32>
    %26 = arith.mulf %21, %25 : vector<16x32xf32>
    %27 = arith.mulf %26, %26 : vector<16x32xf32>
    %cst_11 = arith.constant dense<0.000000e+00> : vector<16xf32>
    %28 = vector.multi_reduction <add>, %27, %cst_11 [1] : vector<16x32xf32> to vector<16xf32>
    %29 = vector.shape_cast %28 : vector<16xf32> to vector<16x1xf32>
    %30 = math.sqrt %29 : vector<16x1xf32>
    %cst_12 = arith.constant 1.000000e-15 : f32
    %31 = vector.broadcast %cst_12 : f32 to vector<16x1xf32>
    %32 = arith.maximumf %30, %31 : vector<16x1xf32>
    %cst_13 = arith.constant 0.995999991 : f32
    %33 = vector.broadcast %cst_13 : f32 to vector<16x1xf32>
    %34 = arith.cmpf ogt, %32, %33 : vector<16x1xf32>
    %35 = tpu.reciprocal %32 {approx = true} : vector<16x1xf32> -> vector<16x1xf32>
    %cst_14 = arith.constant 0.995999991 : f32
    %36 = vector.broadcast %cst_14 : f32 to vector<16x1xf32>
    %37 = arith.mulf %36, %35 : vector<16x1xf32>
    %38 = vector.broadcast %37 : vector<16x1xf32> to vector<16x32xf32>
    %39 = arith.mulf %26, %38 : vector<16x32xf32>
    %40 = vector.shape_cast %34 : vector<16x1xi1> to vector<16x1xi1>
    %41 = vector.broadcast %40 : vector<16x1xi1> to vector<16x32xi1>
    %42 = arith.select %41, %39, %26 : vector<16x32xi1>, vector<16x32xf32>
    %c0_15 = arith.constant 0 : index
    %c0_16 = arith.constant 0 : index
    %43 = vector.load %arg4[%c0_15, %c0_16] : memref<1x32xf32, #tpu.memory_space<vmem>>, vector<1x32xf32>
    %44 = arith.mulf %43, %43 : vector<1x32xf32>
    %cst_17 = arith.constant dense<0.000000e+00> : vector<1xf32>
    %45 = vector.multi_reduction <add>, %44, %cst_17 [1] : vector<1x32xf32> to vector<1xf32>
    %46 = vector.shape_cast %45 : vector<1xf32> to vector<1x1xf32>
    %47 = math.sqrt %46 : vector<1x1xf32>
    %cst_18 = arith.constant 1.000000e-15 : f32
    %48 = vector.broadcast %cst_18 : f32 to vector<1x1xf32>
    %49 = arith.maximumf %47, %48 : vector<1x1xf32>
    %cst_19 = arith.constant 1.000000e+00 : f32
    %50 = vector.broadcast %cst_19 : f32 to vector<1x1xf32>
    %51 = arith.mulf %50, %49 : vector<1x1xf32>
    %cst_20 = arith.constant -1.500000e+01 : f32
    %cst_21 = arith.constant 1.500000e+01 : f32
    %52 = vector.broadcast %cst_20 : f32 to vector<1x1xf32>
    %53 = arith.maximumf %52, %51 : vector<1x1xf32>
    %54 = vector.broadcast %cst_21 : f32 to vector<1x1xf32>
    %55 = arith.minimumf %54, %53 : vector<1x1xf32>
    %56 = math.tanh %55 : vector<1x1xf32>
    %57 = vector.broadcast %56 : vector<1x1xf32> to vector<1x32xf32>
    %58 = arith.mulf %57, %43 : vector<1x32xf32>
    %cst_22 = arith.constant 1.000000e+00 : f32
    %59 = vector.broadcast %cst_22 : f32 to vector<1x1xf32>
    %60 = arith.mulf %59, %49 : vector<1x1xf32>
    %61 = tpu.reciprocal %60 {approx = true} : vector<1x1xf32> -> vector<1x1xf32>
    %62 = vector.broadcast %61 : vector<1x1xf32> to vector<1x32xf32>
    %63 = arith.mulf %58, %62 : vector<1x32xf32>
    %64 = arith.mulf %63, %63 : vector<1x32xf32>
    %cst_23 = arith.constant dense<0.000000e+00> : vector<1xf32>
    %65 = vector.multi_reduction <add>, %64, %cst_23 [1] : vector<1x32xf32> to vector<1xf32>
    %66 = vector.shape_cast %65 : vector<1xf32> to vector<1x1xf32>
    %67 = math.sqrt %66 : vector<1x1xf32>
    %cst_24 = arith.constant 1.000000e-15 : f32
    %68 = vector.broadcast %cst_24 : f32 to vector<1x1xf32>
    %69 = arith.maximumf %67, %68 : vector<1x1xf32>
    %cst_25 = arith.constant 0.995999991 : f32
    %70 = vector.broadcast %cst_25 : f32 to vector<1x1xf32>
    %71 = arith.cmpf ogt, %69, %70 : vector<1x1xf32>
    %72 = tpu.reciprocal %69 {approx = true} : vector<1x1xf32> -> vector<1x1xf32>
    %cst_26 = arith.constant 0.995999991 : f32
    %73 = vector.broadcast %cst_26 : f32 to vector<1x1xf32>
    %74 = arith.mulf %73, %72 : vector<1x1xf32>
    %75 = vector.broadcast %74 : vector<1x1xf32> to vector<1x32xf32>
    %76 = arith.mulf %63, %75 : vector<1x32xf32>
    %77 = vector.shape_cast %71 : vector<1x1xi1> to vector<1x1xi1>
    %78 = vector.broadcast %77 : vector<1x1xi1> to vector<1x32xi1>
    %79 = arith.select %78, %76, %63 : vector<1x32xi1>, vector<1x32xf32>
    %80 = arith.mulf %42, %42 : vector<16x32xf32>
    %cst_27 = arith.constant dense<0.000000e+00> : vector<16xf32>
    %81 = vector.multi_reduction <add>, %80, %cst_27 [1] : vector<16x32xf32> to vector<16xf32>
    %82 = vector.shape_cast %81 : vector<16xf32> to vector<16x1xf32>
    %83 = arith.mulf %79, %79 : vector<1x32xf32>
    %cst_28 = arith.constant dense<0.000000e+00> : vector<1xf32>
    %84 = vector.multi_reduction <add>, %83, %cst_28 [1] : vector<1x32xf32> to vector<1xf32>
    %85 = vector.shape_cast %84 : vector<1xf32> to vector<1x1xf32>
    %86 = vector.broadcast %79 : vector<1x32xf32> to vector<16x32xf32>
    %87 = arith.mulf %42, %86 : vector<16x32xf32>
    %cst_29 = arith.constant dense<0.000000e+00> : vector<16xf32>
    %88 = vector.multi_reduction <add>, %87, %cst_29 [1] : vector<16x32xf32> to vector<16xf32>
    %89 = vector.shape_cast %88 : vector<16xf32> to vector<16x1xf32>
    %cst_30 = arith.constant 2.000000e+00 : f32
    %90 = vector.broadcast %cst_30 : f32 to vector<16x1xf32>
    %91 = arith.mulf %90, %89 : vector<16x1xf32>
    %cst_31 = arith.constant 1.000000e+00 : f32
    %92 = vector.broadcast %cst_31 : f32 to vector<16x1xf32>
    %93 = arith.addf %92, %91 : vector<16x1xf32>
    %cst_32 = arith.constant 1.000000e+00 : f32
    %94 = vector.broadcast %cst_32 : f32 to vector<1x1xf32>
    %95 = arith.mulf %94, %85 : vector<1x1xf32>
    %96 = vector.broadcast %95 : vector<1x1xf32> to vector<16x1xf32>
    %97 = arith.addf %93, %96 : vector<16x1xf32>
    %98 = vector.broadcast %97 : vector<16x1xf32> to vector<16x32xf32>
    %99 = arith.mulf %98, %42 : vector<16x32xf32>
    %cst_33 = arith.constant 1.000000e+00 : f32
    %100 = vector.broadcast %cst_33 : f32 to vector<16x1xf32>
    %101 = arith.mulf %100, %82 : vector<16x1xf32>
    %cst_34 = arith.constant 1.000000e+00 : f32
    %102 = vector.broadcast %cst_34 : f32 to vector<16x1xf32>
    %103 = arith.subf %102, %101 : vector<16x1xf32>
    %104 = vector.broadcast %103 : vector<16x1xf32> to vector<16x32xf32>
    %105 = vector.broadcast %79 : vector<1x32xf32> to vector<16x32xf32>
    %106 = arith.mulf %104, %105 : vector<16x32xf32>
    %107 = arith.addf %99, %106 : vector<16x32xf32>
    %cst_35 = arith.constant 2.000000e+00 : f32
    %108 = vector.broadcast %cst_35 : f32 to vector<16x1xf32>
    %109 = arith.mulf %108, %89 : vector<16x1xf32>
    %cst_36 = arith.constant 1.000000e+00 : f32
    %110 = vector.broadcast %cst_36 : f32 to vector<16x1xf32>
    %111 = arith.addf %110, %109 : vector<16x1xf32>
    %cst_37 = arith.constant 1.000000e+00 : f32
    %112 = vector.broadcast %cst_37 : f32 to vector<16x1xf32>
    %113 = arith.mulf %112, %82 : vector<16x1xf32>
    %114 = vector.broadcast %85 : vector<1x1xf32> to vector<16x1xf32>
    %115 = arith.mulf %113, %114 : vector<16x1xf32>
    %116 = arith.addf %111, %115 : vector<16x1xf32>
    %cst_38 = arith.constant 1.000000e-15 : f32
    %117 = vector.broadcast %cst_38 : f32 to vector<16x1xf32>
    %118 = arith.maximumf %116, %117 : vector<16x1xf32>
    %119 = vector.broadcast %118 : vector<16x1xf32> to vector<16x32xf32>
    %120 = arith.divf %107, %119 : vector<16x32xf32>
    %121 = arith.mulf %120, %120 : vector<16x32xf32>
    %cst_39 = arith.constant dense<0.000000e+00> : vector<16xf32>
    %122 = vector.multi_reduction <add>, %121, %cst_39 [1] : vector<16x32xf32> to vector<16xf32>
    %123 = vector.shape_cast %122 : vector<16xf32> to vector<16x1xf32>
    %124 = math.sqrt %123 : vector<16x1xf32>
    %cst_40 = arith.constant 1.000000e-15 : f32
    %125 = vector.broadcast %cst_40 : f32 to vector<16x1xf32>
    %126 = arith.maximumf %124, %125 : vector<16x1xf32>
    %cst_41 = arith.constant 0.995999991 : f32
    %127 = vector.broadcast %cst_41 : f32 to vector<16x1xf32>
    %128 = arith.cmpf ogt, %126, %127 : vector<16x1xf32>
    %129 = tpu.reciprocal %126 {approx = true} : vector<16x1xf32> -> vector<16x1xf32>
    %cst_42 = arith.constant 0.995999991 : f32
    %130 = vector.broadcast %cst_42 : f32 to vector<16x1xf32>
    %131 = arith.mulf %130, %129 : vector<16x1xf32>
    %132 = vector.broadcast %131 : vector<16x1xf32> to vector<16x32xf32>
    %133 = arith.mulf %120, %132 : vector<16x32xf32>
    %134 = vector.shape_cast %128 : vector<16x1xi1> to vector<16x1xi1>
    %135 = vector.broadcast %134 : vector<16x1xi1> to vector<16x32xi1>
    %136 = arith.select %135, %133, %120 : vector<16x32xi1>, vector<16x32xf32>
    %137 = arith.mulf %136, %136 : vector<16x32xf32>
    %cst_43 = arith.constant dense<0.000000e+00> : vector<16xf32>
    %138 = vector.multi_reduction <add>, %137, %cst_43 [1] : vector<16x32xf32> to vector<16xf32>
    %139 = vector.shape_cast %138 : vector<16xf32> to vector<16x1xf32>
    %140 = math.sqrt %139 : vector<16x1xf32>
    %cst_44 = arith.constant 1.000000e-15 : f32
    %141 = vector.broadcast %cst_44 : f32 to vector<16x1xf32>
    %142 = arith.maximumf %140, %141 : vector<16x1xf32>
    %cst_45 = arith.constant 1.000000e+00 : f32
    %143 = vector.broadcast %cst_45 : f32 to vector<16x1xf32>
    %144 = arith.mulf %143, %142 : vector<16x1xf32>
    %cst_46 = arith.constant -0.99999988 : f32
    %cst_47 = arith.constant 0.99999988 : f32
    %145 = vector.broadcast %cst_46 : f32 to vector<16x1xf32>
    %146 = arith.maximumf %145, %144 : vector<16x1xf32>
    %147 = vector.broadcast %cst_47 : f32 to vector<16x1xf32>
    %148 = arith.minimumf %147, %146 : vector<16x1xf32>
    %149 = math.log1p %148 : vector<16x1xf32>
    %cst_48 = arith.constant 0.000000e+00 : f32
    %150 = vector.broadcast %cst_48 : f32 to vector<16x1xf32>
    %151 = arith.subf %150, %148 : vector<16x1xf32>
    %152 = math.log1p %151 : vector<16x1xf32>
    %153 = arith.subf %149, %152 : vector<16x1xf32>
    %cst_49 = arith.constant 5.000000e-01 : f32
    %154 = vector.broadcast %cst_49 : f32 to vector<16x1xf32>
    %155 = arith.mulf %154, %153 : vector<16x1xf32>
    %cst_50 = arith.constant 1.000000e+00 : f32
    %156 = vector.broadcast %cst_50 : f32 to vector<16x1xf32>
    %157 = arith.mulf %156, %155 : vector<16x1xf32>
    %158 = tpu.reciprocal %142 {approx = true} : vector<16x1xf32> -> vector<16x1xf32>
    %159 = arith.mulf %157, %158 : vector<16x1xf32>
    %160 = vector.broadcast %159 : vector<16x1xf32> to vector<16x32xf32>
    %161 = arith.mulf %160, %136 : vector<16x32xf32>
    %162 = arith.truncf %161 : vector<16x32xf32> to vector<16x32xbf16>
    %c0_51 = arith.constant 0 : index
    %c0_52 = arith.constant 0 : index
    %163 = vector.load %arg5[%c0_51, %c0_52] : memref<16x32xbf16, #tpu.memory_space<vmem>>, vector<16x32xbf16>
    tpu.vector_store %arg5[%c0_51, %c0_52], %162 {strides = array<i32>} : memref<16x32xbf16, #tpu.memory_space<vmem>>, vector<16x32xbf16>,
    return
  }
  func.func @transform_0(%arg0: i32) -> (i32, i32) {
    %c0_i32 = arith.constant 0 : i32
    %c0_i32_0 = arith.constant 0 : i32
    return %arg0, %c0_i32 : i32, i32
  }
  func.func @transform_1(%arg0: i32) -> (i32, i32) {
    %c0_i32 = arith.constant 0 : i32
    %c0_i32_0 = arith.constant 0 : i32
    return %arg0, %c0_i32 : i32, i32
  }
  func.func @transform_2(%arg0: i32) -> (i32, i32) {
    %c0_i32 = arith.constant 0 : i32
    %c0_i32_0 = arith.constant 0 : i32
    %c0_i32_1 = arith.constant 0 : i32
    return %c0_i32, %c0_i32_0 : i32, i32
  }
  func.func @transform_3(%arg0: i32) -> (i32, i32) {
    %c0_i32 = arith.constant 0 : i32
    %c0_i32_0 = arith.constant 0 : i32
    %c0_i32_1 = arith.constant 0 : i32
    return %c0_i32, %c0_i32_0 : i32, i32
  }
  func.func @transform_4(%arg0: i32) -> (i32, i32) {
    %c0_i32 = arith.constant 0 : i32
    %c0_i32_0 = arith.constant 0 : i32
    return %arg0, %c0_i32 : i32, i32
  }
}

module attributes {stable_mosaic.version = 11 : i64} {
  func.func @_readout_head_kernel(%arg0: i32, %arg1: memref<16x32xbf16, #tpu.memory_space<vmem>>, %arg2: memref<16x32xbf16, #tpu.memory_space<vmem>>, %arg3: memref<16x32xbf16, #tpu.memory_space<vmem>>, %arg4: memref<1x16xi32, #tpu.memory_space<vmem>>, %arg5: memref<1x16xf32, #tpu.memory_space<vmem>>, %arg6: memref<1x16xf32, #tpu.memory_space<vmem>>, %arg7: memref<32x4xf32, #tpu.memory_space<vmem>>, %arg8: memref<1x4xf32, #tpu.memory_space<vmem>>, %arg9: memref<2x4xf32, #tpu.memory_space<vmem>>, %arg10: memref<2x32xf32, #tpu.memory_space<vmem>>, %arg11: memref<2x32xf32, #tpu.memory_space<vmem>>, %arg12: memref<2x32xf32, #tpu.memory_space<vmem>>) attributes {dimension_semantics = [#tpu.dimension_semantics<arbitrary>], iteration_bounds = array<i64: 1>, scalar_prefetch = 0 : i64, scratch_operands = 3 : i64, tpu.core_type = #tpu.core_type<tc>, window_params = [{transform_indices = @transform_0, window_bounds = array<i64: 16, 32>}, {transform_indices = @transform_1, window_bounds = array<i64: 16, 32>}, {transform_indices = @transform_2, window_bounds = array<i64: 16, 32>}, {transform_indices = @transform_3, window_bounds = array<i64: 1, 16>}, {transform_indices = @transform_4, window_bounds = array<i64: 1, 16>}, {transform_indices = @transform_5, window_bounds = array<i64: 1, 16>}, {pipeline_mode = #tpu.pipeline_mode<synchronous>, transform_indices = @transform_6, window_bounds = array<i64: 32, 4>}, {pipeline_mode = #tpu.pipeline_mode<synchronous>, transform_indices = @transform_7, window_bounds = array<i64: 1, 4>}, {pipeline_mode = #tpu.pipeline_mode<synchronous>, transform_indices = @transform_8, window_bounds = array<i64: 2, 4>}]} {
    %c0_i32 = arith.constant 0 : i32
    %0 = arith.cmpi eq, %arg0, %c0_i32 : i32
    %1 = arith.extui %0 : i1 to i32
    %c0_i32_0 = arith.constant 0 : i32
    %2 = arith.cmpi ne, %1, %c0_i32_0 : i32
    scf.if %2 {
      %cst_28 = arith.constant 0.000000e+00 : f32
      %36 = vector.broadcast %cst_28 : f32 to vector<2x32xf32>
      %c0_29 = arith.constant 0 : index
      %c0_30 = arith.constant 0 : index
      %37 = vector.load %arg10[%c0_29, %c0_30] : memref<2x32xf32, #tpu.memory_space<vmem>>, vector<2x32xf32>
      tpu.vector_store %arg10[%c0_29, %c0_30], %36 {strides = array<i32>} : memref<2x32xf32, #tpu.memory_space<vmem>>, vector<2x32xf32>,
      %cst_31 = arith.constant 0.000000e+00 : f32
      %38 = vector.broadcast %cst_31 : f32 to vector<2x32xf32>
      %c0_32 = arith.constant 0 : index
      %c0_33 = arith.constant 0 : index
      %39 = vector.load %arg11[%c0_32, %c0_33] : memref<2x32xf32, #tpu.memory_space<vmem>>, vector<2x32xf32>
      tpu.vector_store %arg11[%c0_32, %c0_33], %38 {strides = array<i32>} : memref<2x32xf32, #tpu.memory_space<vmem>>, vector<2x32xf32>,
      %cst_34 = arith.constant 0.000000e+00 : f32
      %40 = vector.broadcast %cst_34 : f32 to vector<2x32xf32>
      %c0_35 = arith.constant 0 : index
      %c0_36 = arith.constant 0 : index
      %41 = vector.load %arg12[%c0_35, %c0_36] : memref<2x32xf32, #tpu.memory_space<vmem>>, vector<2x32xf32>
      tpu.vector_store %arg12[%c0_35, %c0_36], %40 {strides = array<i32>} : memref<2x32xf32, #tpu.memory_space<vmem>>, vector<2x32xf32>,
    } else {
    }
    %3 = tpu.iota {dimensions = array<i32: 0>} : vector<2x16xi32>
    %c0 = arith.constant 0 : index
    %c0_1 = arith.constant 0 : index
    %4 = vector.load %arg4[%c0, %c0_1] : memref<1x16xi32, #tpu.memory_space<vmem>>, vector<1x16xi32>
    %5 = vector.broadcast %4 : vector<1x16xi32> to vector<2x16xi32>
    %6 = arith.cmpi eq, %3, %5 : vector<2x16xi32>
    %7 = arith.extui %6 : vector<2x16xi1> to vector<2x16xi32>
    %8 = arith.sitofp %7 : vector<2x16xi32> to vector<2x16xf32>
    %c0_2 = arith.constant 0 : index
    %c0_3 = arith.constant 0 : index
    %9 = vector.load %arg5[%c0_2, %c0_3] : memref<1x16xf32, #tpu.memory_space<vmem>>, vector<1x16xf32>
    %10 = vector.broadcast %9 : vector<1x16xf32> to vector<2x16xf32>
    %11 = arith.mulf %8, %10 : vector<2x16xf32>
    %12 = arith.truncf %11 : vector<2x16xf32> to vector<2x16xbf16>
    %c0_4 = arith.constant 0 : index
    %c0_5 = arith.constant 0 : index
    %13 = vector.load %arg6[%c0_4, %c0_5] : memref<1x16xf32, #tpu.memory_space<vmem>>, vector<1x16xf32>
    %14 = vector.broadcast %13 : vector<1x16xf32> to vector<2x16xf32>
    %15 = arith.mulf %8, %14 : vector<2x16xf32>
    %16 = arith.truncf %15 : vector<2x16xf32> to vector<2x16xbf16>
    %17 = arith.truncf %8 : vector<2x16xf32> to vector<2x16xbf16>
    %c0_6 = arith.constant 0 : index
    %c0_7 = arith.constant 0 : index
    %18 = vector.load %arg10[%c0_6, %c0_7] : memref<2x32xf32, #tpu.memory_space<vmem>>, vector<2x32xf32>
    %c0_8 = arith.constant 0 : index
    %c0_9 = arith.constant 0 : index
    %19 = vector.load %arg1[%c0_8, %c0_9] : memref<16x32xbf16, #tpu.memory_space<vmem>>, vector<16x32xbf16>
    %cst = arith.constant dense<0.000000e+00> : vector<2x32xf32>
    %20 = tpu.matmul %12, %19, %cst {dimension_numbers = #tpu.dot_dimension_numbers<[1], [0], [0], [1], [0, 0, 1, 1], [], []>} : vector<2x16xbf16>, vector<16x32xbf16>, vector<2x32xf32> -> vector<2x32xf32>
    %21 = arith.addf %18, %20 : vector<2x32xf32>
    %c0_10 = arith.constant 0 : index
    %c0_11 = arith.constant 0 : index
    %22 = vector.load %arg10[%c0_10, %c0_11] : memref<2x32xf32, #tpu.memory_space<vmem>>, vector<2x32xf32>
    tpu.vector_store %arg10[%c0_10, %c0_11], %21 {strides = array<i32>} : memref<2x32xf32, #tpu.memory_space<vmem>>, vector<2x32xf32>,
    %c0_12 = arith.constant 0 : index
    %c0_13 = arith.constant 0 : index
    %23 = vector.load %arg11[%c0_12, %c0_13] : memref<2x32xf32, #tpu.memory_space<vmem>>, vector<2x32xf32>
    %c0_14 = arith.constant 0 : index
    %c0_15 = arith.constant 0 : index
    %24 = vector.load %arg2[%c0_14, %c0_15] : memref<16x32xbf16, #tpu.memory_space<vmem>>, vector<16x32xbf16>
    %cst_16 = arith.constant dense<0.000000e+00> : vector<2x32xf32>
    %25 = tpu.matmul %16, %24, %cst_16 {dimension_numbers = #tpu.dot_dimension_numbers<[1], [0], [0], [1], [0, 0, 1, 1], [], []>} : vector<2x16xbf16>, vector<16x32xbf16>, vector<2x32xf32> -> vector<2x32xf32>
    %26 = arith.addf %23, %25 : vector<2x32xf32>
    %c0_17 = arith.constant 0 : index
    %c0_18 = arith.constant 0 : index
    %27 = vector.load %arg11[%c0_17, %c0_18] : memref<2x32xf32, #tpu.memory_space<vmem>>, vector<2x32xf32>
    tpu.vector_store %arg11[%c0_17, %c0_18], %26 {strides = array<i32>} : memref<2x32xf32, #tpu.memory_space<vmem>>, vector<2x32xf32>,
    %c0_19 = arith.constant 0 : index
    %c0_20 = arith.constant 0 : index
    %28 = vector.load %arg12[%c0_19, %c0_20] : memref<2x32xf32, #tpu.memory_space<vmem>>, vector<2x32xf32>
    %c0_21 = arith.constant 0 : index
    %c0_22 = arith.constant 0 : index
    %29 = vector.load %arg3[%c0_21, %c0_22] : memref<16x32xbf16, #tpu.memory_space<vmem>>, vector<16x32xbf16>
    %cst_23 = arith.constant dense<0.000000e+00> : vector<2x32xf32>
    %30 = tpu.matmul %17, %29, %cst_23 {dimension_numbers = #tpu.dot_dimension_numbers<[1], [0], [0], [1], [0, 0, 1, 1], [], []>} : vector<2x16xbf16>, vector<16x32xbf16>, vector<2x32xf32> -> vector<2x32xf32>
    %31 = arith.addf %28, %30 : vector<2x32xf32>
    %c0_24 = arith.constant 0 : index
    %c0_25 = arith.constant 0 : index
    %32 = vector.load %arg12[%c0_24, %c0_25] : memref<2x32xf32, #tpu.memory_space<vmem>>, vector<2x32xf32>
    tpu.vector_store %arg12[%c0_24, %c0_25], %31 {strides = array<i32>} : memref<2x32xf32, #tpu.memory_space<vmem>>, vector<2x32xf32>,
    %c0_i32_26 = arith.constant 0 : i32
    %33 = arith.cmpi eq, %arg0, %c0_i32_26 : i32
    %34 = arith.extui %33 : i1 to i32
    %c0_i32_27 = arith.constant 0 : i32
    %35 = arith.cmpi ne, %34, %c0_i32_27 : i32
    scf.if %35 {
      %c0_28 = arith.constant 0 : index
      %c0_29 = arith.constant 0 : index
      %36 = vector.load %arg10[%c0_28, %c0_29] : memref<2x32xf32, #tpu.memory_space<vmem>>, vector<2x32xf32>
      %cst_30 = arith.constant 0.000000e+00 : f32
      %37 = vector.broadcast %cst_30 : f32 to vector<2x32xf32>
      %38 = arith.maximumf %36, %37 : vector<2x32xf32>
      %c0_31 = arith.constant 0 : index
      %c0_32 = arith.constant 0 : index
      %39 = vector.load %arg11[%c0_31, %c0_32] : memref<2x32xf32, #tpu.memory_space<vmem>>, vector<2x32xf32>
      %cst_33 = arith.constant 0.000000e+00 : f32
      %40 = vector.broadcast %cst_33 : f32 to vector<2x32xf32>
      %41 = arith.maximumf %39, %40 : vector<2x32xf32>
      %42 = arith.addf %38, %41 : vector<2x32xf32>
      %c0_34 = arith.constant 0 : index
      %c0_35 = arith.constant 0 : index
      %43 = vector.load %arg12[%c0_34, %c0_35] : memref<2x32xf32, #tpu.memory_space<vmem>>, vector<2x32xf32>
      %cst_36 = arith.constant 0.000000e+00 : f32
      %44 = vector.broadcast %cst_36 : f32 to vector<2x32xf32>
      %45 = arith.maximumf %43, %44 : vector<2x32xf32>
      %46 = arith.addf %42, %45 : vector<2x32xf32>
      %c0_37 = arith.constant 0 : index
      %c0_38 = arith.constant 0 : index
      %47 = vector.load %arg7[%c0_37, %c0_38] : memref<32x4xf32, #tpu.memory_space<vmem>>, vector<32x4xf32>
      %cst_39 = arith.constant dense<0.000000e+00> : vector<2x4xf32>
      %48 = tpu.matmul %46, %47, %cst_39 {dimension_numbers = #tpu.dot_dimension_numbers<[1], [0], [0], [1], [0, 0, 1, 1], [], []>} : vector<2x32xf32>, vector<32x4xf32>, vector<2x4xf32> -> vector<2x4xf32>
      %c0_40 = arith.constant 0 : index
      %c0_41 = arith.constant 0 : index
      %49 = vector.load %arg8[%c0_40, %c0_41] : memref<1x4xf32, #tpu.memory_space<vmem>>, vector<1x4xf32>
      %50 = vector.broadcast %49 : vector<1x4xf32> to vector<2x4xf32>
      %51 = arith.addf %48, %50 : vector<2x4xf32>
      %cst_42 = arith.constant dense<0xFF800000> : vector<2xf32>
      %52 = vector.multi_reduction <maximumf>, %51, %cst_42 [1] : vector<2x4xf32> to vector<2xf32>
      %53 = vector.shape_cast %52 : vector<2xf32> to vector<2x1xf32>
      %54 = vector.broadcast %53 : vector<2x1xf32> to vector<2x4xf32>
      %55 = arith.subf %51, %54 : vector<2x4xf32>
      %56 = math.exp %55 : vector<2x4xf32>
      %cst_43 = arith.constant dense<0.000000e+00> : vector<2xf32>
      %57 = vector.multi_reduction <add>, %56, %cst_43 [1] : vector<2x4xf32> to vector<2xf32>
      %58 = vector.shape_cast %57 : vector<2xf32> to vector<2x1xf32>
      %59 = math.log %58 : vector<2x1xf32>
      %60 = arith.addf %53, %59 : vector<2x1xf32>
      %61 = vector.broadcast %60 : vector<2x1xf32> to vector<2x4xf32>
      %62 = arith.subf %51, %61 : vector<2x4xf32>
      %c0_44 = arith.constant 0 : index
      %c0_45 = arith.constant 0 : index
      %63 = vector.load %arg9[%c0_44, %c0_45] : memref<2x4xf32, #tpu.memory_space<vmem>>, vector<2x4xf32>
      tpu.vector_store %arg9[%c0_44, %c0_45], %62 {strides = array<i32>} : memref<2x4xf32, #tpu.memory_space<vmem>>, vector<2x4xf32>,
    } else {
    }
    return
  }
  func.func @transform_0(%arg0: i32) -> (i32, i32) {
    %c0_i32 = arith.constant 0 : i32
    %c0_i32_0 = arith.constant 0 : i32
    return %arg0, %c0_i32 : i32, i32
  }
  func.func @transform_1(%arg0: i32) -> (i32, i32) {
    %c0_i32 = arith.constant 0 : i32
    %c0_i32_0 = arith.constant 0 : i32
    return %arg0, %c0_i32 : i32, i32
  }
  func.func @transform_2(%arg0: i32) -> (i32, i32) {
    %c0_i32 = arith.constant 0 : i32
    %c0_i32_0 = arith.constant 0 : i32
    return %arg0, %c0_i32 : i32, i32
  }
  func.func @transform_3(%arg0: i32) -> (i32, i32) {
    %c0_i32 = arith.constant 0 : i32
    %c0_i32_0 = arith.constant 0 : i32
    return %c0_i32, %arg0 : i32, i32
  }
  func.func @transform_4(%arg0: i32) -> (i32, i32) {
    %c0_i32 = arith.constant 0 : i32
    %c0_i32_0 = arith.constant 0 : i32
    return %c0_i32, %arg0 : i32, i32
  }
  func.func @transform_5(%arg0: i32) -> (i32, i32) {
    %c0_i32 = arith.constant 0 : i32
    %c0_i32_0 = arith.constant 0 : i32
    return %c0_i32, %arg0 : i32, i32
  }
  func.func @transform_6(%arg0: i32) -> (i32, i32) {
    %c0_i32 = arith.constant 0 : i32
    %c0_i32_0 = arith.constant 0 : i32
    %c0_i32_1 = arith.constant 0 : i32
    return %c0_i32, %c0_i32_0 : i32, i32
  }
  func.func @transform_7(%arg0: i32) -> (i32, i32) {
    %c0_i32 = arith.constant 0 : i32
    %c0_i32_0 = arith.constant 0 : i32
    %c0_i32_1 = arith.constant 0 : i32
    return %c0_i32, %c0_i32_0 : i32, i32
  }
  func.func @transform_8(%arg0: i32) -> (i32, i32) {
    %c0_i32 = arith.constant 0 : i32
    %c0_i32_0 = arith.constant 0 : i32
    %c0_i32_1 = arith.constant 0 : i32
    return %c0_i32, %c0_i32_0 : i32, i32
  }
}

</mosaic_0001>

<bundles_post_ra>
// kernel: hyp_gcn3_forward.7
= control target key start
LH: loop header
LB: loop body
LE: loop exit
PB: predicated region body
PF: predicated region fallthrough
CT: control target
= control target key end

     0   :  { %v688_v0 = vmov 0   ;;  %vm35_vm0 = vcmask 130048   ;;  %vm344_vm11 = vcmask 253952   ;;  %s795_s1 = inlined_call_operand.vmem [shape: f32[16,1], index: 1, kind: input, shape index: {}]   ;;  %s796_s0 = inlined_call_operand.vmem [shape: f32[16,16], index: 0, kind: input, shape index: {}]   ;;  %s797_s2 = inlined_call_operand.vmem [shape: f32[16,32], index: 2, kind: input, shape index: {}]   ;;  %s798_s3 = inlined_call_operand.vmem [shape: f32[1,32], index: 3, kind: input, shape index: {}]   ;;  %s799_s4 = inlined_call_operand.vmem [shape: bf16[16,32], index: 4, kind: output, shape index: {}]  }
   0x1   :  { %593 = vset.pattern.permute.xlu0 %v688_v0  ;;  %v19_v1 = vld [vmem:[%s795_s1] sm:$0xff]  ;;  %v20_v2 = vld [vmem:[%s795_s1 + $0x8] sm:$0xff] }
   0x2   :  { %23 = vperm.xlu0 %593, %v19_v1   ;;  %v17_v3 = vld [vmem:[%s796_s0] sm:$0xff]  ;;  %v18_v6 = vld [vmem:[%s796_s0 + $0x8] sm:$0xff] }
   0x6   :  { %28 = vperm.xlu0 %593, %v20_v2  }
  0x81   :  { %v24_v4 = vpop.permute.xlu0 %23 }
  0x82   :  { %v31_v5 = vmul.f32 %v24_v4, %v17_v3  ;;  %v184_v3 = vld [vmem:[%s797_s2] sm:$0xff]  ;;  %v185_v4 = vld [vmem:[%s797_s2 + $0x8] sm:$0xff] }
  0x84   :  { %v33_v7 = vmul.f32 %v31_v5, %v31_v5 }
  0x85   :  { %v29_v8 = vpop.permute.xlu0 %28 }
  0x86   :  { %v32_v9 = vmul.f32 %v29_v8, %v18_v6  ;;  %v36_v10 = vsel %vm35_vm0, %v33_v7, 0.0  ;;  %v749_v6 = vld [vmem:[%s798_s3] sm:$0x1] }
  0x87   :  { %37 = vadd.xlane.f32.xlu1 %v36_v10  ;;  %v343_v7 = vmul.f32 %v749_v6, %v749_v6 }
  0x88   :  { %v34_v11 = vmul.f32 %v32_v9, %v32_v9 }
  0x89   :  { %v345_v8 = vsel %vm344_vm11, %v343_v7, 0.0 }
  0x8a   :  { %v39_v12 = vsel %vm35_vm0, %v34_v11, 0.0 }
  0x8b   :  { %40 = vadd.xlane.f32.xlu1 %v39_v12 }
 0x114   :  { %v38_v13 = vpop.xlane.xlu1 %37 }
 0x115   :  { %594 = vrsqrt.f32 %v38_v13  ;;  %vm44_vm1 = vcmp.eq.f32.partialorder %v38_v13, inf  ;;  %v47_v17 = vand.u32 2147483648, %v38_v13  ;;  %vm46_vm2 = vcmp.eq.f32.partialorder %v38_v13, 0.0 }
 0x118   :  { %v41_v14 = vpop.xlane.xlu1 %40 }
 0x119   :  { %596 = vrsqrt.f32 %v41_v14  ;;  %vm51_vm3 = vcmp.eq.f32.partialorder %v41_v14, inf  ;;  %v54_v23 = vand.u32 2147483648, %v41_v14  ;;  %vm53_vm4 = vcmp.eq.f32.partialorder %v41_v14, 0.0 }
 0x11f   :  { %v595_v15 = vpop.eup %594 }
 0x120   :  { %v43_v16 = vmul.f32 %v595_v15, %v38_v13 }
 0x122   :  { %v45_v18 = vsel %vm44_vm1, %v38_v13, %v43_v16 }
 0x123   :  { %v597_v19 = vpop.eup %596  ;;  %v48_v20 = vsel %vm46_vm2, %v47_v17, %v45_v18 }
 0x124   :  { %v56_v21 = vmax.f32 %v48_v20, 1e-15  ;;  %v50_v22 = vmul.f32 %v597_v19, %v41_v14 }
 0x126   :  { %v562_v24 = vclamps-f32 %v56_v21, 15.0  ;;  %v52_v25 = vsel %vm51_vm3, %v41_v14, %v50_v22 }
 0x127   :  { %v55_v26 = vsel %vm53_vm4, %v54_v23, %v52_v25 }
 0x128   :  { %598 = vtanh.f32 %v562_v24  ;;  %v57_v27 = vmax.f32 %v55_v26, 1e-15 }
 0x129   :  { %600 = vrcp.f32 %v56_v21 }
 0x12a   :  { %v563_v28 = vclamps-f32 %v57_v27, 15.0 }
 0x12c   :  { %602 = vtanh.f32 %v563_v28 }
 0x12d   :  { %604 = vrcp.f32 %v57_v27 }
 0x132   :  { %v599_v29 = vpop.eup %598 }
 0x133   :  { %v64_v30 = vmul.f32 %v599_v29, %v31_v5  ;;  %v601_v31 = vpop.eup %600  ;;  %v588_v5 = vpack.c.bf16 %v185_v4, %v184_v3 }
 0x135   :  { %v68_v32 = vmul.f32 %v601_v31, %v64_v30  ;;  %589 = vmatprep.subr.bf16.mxu0 %v588_v5 }
 0x136   :  { %v603_v33 = vpop.eup %602  ;;  %591 = vmatpush3.bf16.msra.mxu0 %v588_v5 }
 0x137   :  { %v70_v34 = vmul.f32 %v68_v32, %v68_v32  ;;  %v65_v35 = vmul.f32 %v603_v33, %v32_v9  ;;  %v605_v36 = vpop.eup %604 }
 0x139   :  { %v72_v37 = vsel %vm35_vm0, %v70_v34, 0.0  ;;  %v69_v38 = vmul.f32 %v605_v36, %v65_v35 }
 0x13a   :  { %73 = vadd.xlane.f32.xlu0 %v72_v37 }
 0x13b   :  { %v71_v39 = vmul.f32 %v69_v38, %v69_v38 }
 0x13d   :  { %v75_v40 = vsel %vm35_vm0, %v71_v39, 0.0 }
 0x13e   :  { %76 = vadd.xlane.f32.xlu1 %v75_v40 }
 0x1c7   :  { %v74_v41 = vpop.xlane.xlu0 %73 }
 0x1c8   :  { %606 = vrsqrt.f32 %v74_v41  ;;  %vm80_vm5 = vcmp.eq.f32.partialorder %v74_v41, inf  ;;  %v83_v45 = vand.u32 2147483648, %v74_v41  ;;  %vm82_vm6 = vcmp.eq.f32.partialorder %v74_v41, 0.0 }
 0x1cb   :  { %v77_v42 = vpop.xlane.xlu1 %76 }
 0x1cc   :  { %608 = vrsqrt.f32 %v77_v42  ;;  %vm87_vm7 = vcmp.eq.f32.partialorder %v77_v42, inf  ;;  %v90_v51 = vand.u32 2147483648, %v77_v42  ;;  %vm89_vm8 = vcmp.eq.f32.partialorder %v77_v42, 0.0 }
 0x1d2   :  { %v607_v43 = vpop.eup %606 }
 0x1d3   :  { %v79_v44 = vmul.f32 %v607_v43, %v74_v41 }
 0x1d5   :  { %v81_v46 = vsel %vm80_vm5, %v74_v41, %v79_v44 }
 0x1d6   :  { %v609_v47 = vpop.eup %608  ;;  %v84_v48 = vsel %vm82_vm6, %v83_v45, %v81_v46 }
 0x1d7   :  { %v86_v49 = vmul.f32 %v609_v47, %v77_v42  ;;  %v92_v50 = vmax.f32 %v84_v48, 1e-15 }
 0x1d9   :  { %610 = vrcp.f32 %v92_v50  ;;  %v88_v52 = vsel %vm87_vm7, %v77_v42, %v86_v49  ;;  %vm94_vm9 = vcmp.gt.f32.partialorder %v92_v50, 0.996 }
 0x1da   :  { %v91_v53 = vsel %vm89_vm8, %v90_v51, %v88_v52 }
 0x1db   :  { %v93_v54 = vmax.f32 %v91_v53, 1e-15 }
 0x1dd   :  { %612 = vrcp.f32 %v93_v54  ;;  %vm95_vm10 = vcmp.gt.f32.partialorder %v93_v54, 0.996 }
 0x1e3   :  { %v611_v55 = vpop.eup %610 }
 0x1e4   :  { %v98_v56 = vmul.f32 0.996, %v611_v55 }
 0x1e6   :  { %v100_v57 = vmul.f32 %v98_v56, %v68_v32 }
 0x1e7   :  { %v613_v58 = vpop.eup %612 }
 0x1e8   :  { %v730_v59 = vsel %vm94_vm9, %v100_v57, %v68_v32  ;;  %v99_v60 = vmul.f32 0.996, %v613_v58 }
 0x1e9   :  { %v108_v61 = vmul.f32 %v730_v59, %v730_v59 }
 0x1ea   :  { %v101_v62 = vmul.f32 %v99_v60, %v69_v38 }
 0x1eb   :  { %v110_v63 = vsel %vm35_vm0, %v108_v61, 0.0 }
 0x1ec   :  { %111 = vadd.xlane.f32.xlu1 %v110_v63  ;;  %v735_v0 = vsel %vm95_vm10, %v101_v62, %v69_v38 }
 0x1ed   :  { %v109_v1 = vmul.f32 %v735_v0, %v735_v0 }
 0x1ef   :  { %v113_v2 = vsel %vm35_vm0, %v109_v1, 0.0 }
 0x1f0   :  { %114 = vadd.xlane.f32.xlu1 %v113_v2 }
 0x1f4   :  { %346 = vadd.xlane.f32.xlu1 %v345_v8 }
 0x279   :  { %v112_v9 = vpop.xlane.xlu1 %111 }
 0x27a   :  { %614 = vrsqrt.f32 %v112_v9  ;;  %vm118_vm12 = vcmp.eq.f32.partialorder %v112_v9, inf  ;;  %v121_v13 = vand.u32 2147483648, %v112_v9  ;;  %vm120_vm13 = vcmp.eq.f32.partialorder %v112_v9, 0.0 }
 0x27d   :  { %v115_v10 = vpop.xlane.xlu1 %114 }
 0x27e   :  { %616 = vrsqrt.f32 %v115_v10  ;;  %vm125_vm14 = vcmp.eq.f32.partialorder %v115_v10, inf  ;;  %v128_v19 = vand.u32 2147483648, %v115_v10  ;;  %vm127_vm15 = vcmp.eq.f32.partialorder %v115_v10, 0.0 }
 0x281   :  { %v347_v8 = vpop.xlane.xlu1 %346 }
 0x282   :  { %vm350_vm5 = vcmp.eq.f32.partialorder %v347_v8, inf  ;;  %vm352_vm6 = vcmp.eq.f32.partialorder %v347_v8, 0.0 }
 0x284   :  { %v615_v11 = vpop.eup %614 }
 0x285   :  { %v117_v12 = vmul.f32 %v615_v11, %v112_v9  ;;  %v353_v11 = vand.u32 2147483648, %v347_v8 }
 0x287   :  { %v119_v14 = vsel %vm118_vm12, %v112_v9, %v117_v12 }
 0x288   :  { %v617_v15 = vpop.eup %616  ;;  %v122_v16 = vsel %vm120_vm13, %v121_v13, %v119_v14 }
 0x289   :  { %v130_v17 = vmax.f32 %v122_v16, 1e-15  ;;  %v124_v18 = vmul.f32 %v617_v15, %v115_v10 }
 0x28b   :  { %v564_v20 = vclamps-f32 %v130_v17, 0.9999999  ;;  %v126_v21 = vsel %vm125_vm14, %v115_v10, %v124_v18 }
 0x28c   :  { %v129_v22 = vsel %vm127_vm15, %v128_v19, %v126_v21 }
 0x28d   :  { %v131_v23 = vmax.f32 %v129_v22, 1e-15  ;;  %v136_v24 = vadd.f32 1.0, %v564_v20  ;;  %v154_v25 = vsub.f32 0.0, %v564_v20  ;;  %v139_v30 = vmul.f32 -0.5, %v564_v20 }
 0x28e   :  { %v142_v34 = vand.u32 2147483647, %v564_v20 }
 0x28f   :  { %v565_v26 = vclamps-f32 %v131_v23, 0.9999999  ;;  %618 = vlog2.f32 %v136_v24  ;;  %v156_v27 = vadd.f32 1.0, %v154_v25  ;;  %v159_v32 = vmul.f32 -0.5, %v154_v25 }
 0x290   :  { %v140_v33 = vadd.f32 1.0, %v139_v30  ;;  %v162_v39 = vand.u32 2147483647, %v154_v25  ;;  %vm143_vm1 = vcmp.lt.f32.partialorder %v142_v34, 0.0004427343 }
 0x291   :  { %v145_v28 = vadd.f32 1.0, %v565_v26  ;;  %620 = vlog2.f32 %v156_v27  ;;  %v155_v29 = vsub.f32 0.0, %v565_v26  ;;  %v160_v35 = vadd.f32 1.0, %v159_v32 }
 0x292   :  { %v148_v36 = vmul.f32 -0.5, %v565_v26  ;;  %v141_v42 = vmul.f32 %v564_v20, %v140_v33  ;;  %vm163_vm2 = vcmp.lt.f32.partialorder %v162_v39, 0.0004427343  ;;  %v151_v48 = vand.u32 2147483647, %v565_v26 }
 0x293   :  { %622 = vlog2.f32 %v145_v28  ;;  %v165_v31 = vadd.f32 1.0, %v155_v29  ;;  %v168_v37 = vmul.f32 -0.5, %v155_v29  ;;  %v161_v45 = vmul.f32 %v160_v35, %v154_v25 }
 0x294   :  { %v149_v46 = vadd.f32 1.0, %v148_v36  ;;  %v171_v49 = vand.u32 2147483647, %v155_v29  ;;  %vm152_vm3 = vcmp.lt.f32.partialorder %v151_v48, 0.0004427343 }
 0x295   :  { %624 = vlog2.f32 %v165_v31  ;;  %v169_v47 = vadd.f32 1.0, %v168_v37 }
 0x296   :  { %626 = vrcp.f32 %v130_v17  ;;  %v150_v55 = vmul.f32 %v565_v26, %v149_v46  ;;  %vm172_vm4 = vcmp.lt.f32.partialorder %v171_v49, 0.0004427343 }
 0x297   :  { %628 = vrcp.f32 %v131_v23  ;;  %v170_v57 = vmul.f32 %v169_v47, %v155_v29 }
 0x298   :  { %630 = vrsqrt.f32 %v347_v8 }
 0x299   :  { %v619_v38 = vpop.eup %618 }
 0x29a   :  { %v138_v40 = vmul.f32 0.6931472, %v619_v38 }
 0x29b   :  { %v621_v41 = vpop.eup %620 }
 0x29c   :  { %v158_v44 = vmul.f32 0.6931472, %v621_v41  ;;  %v144_v50 = vsel %vm143_vm1, %v141_v42, %v138_v40 }
 0x29d   :  { %v623_v43 = vpop.eup %622 }
 0x29e   :  { %v164_v51 = vsel %vm163_vm2, %v161_v45, %v158_v44  ;;  %v147_v52 = vmul.f32 0.6931472, %v623_v43 }
 0x29f   :  { %v625_v53 = vpop.eup %624  ;;  %v174_v54 = vsub.f32 %v144_v50, %v164_v51 }
 0x2a0   :  { %v167_v56 = vmul.f32 0.6931472, %v625_v53  ;;  %v627_v60 = vpop.eup %626  ;;  %v153_v61 = vsel %vm152_vm3, %v150_v55, %v147_v52 }
 0x2a1   :  { %v176_v58 = vmul.f32 0.5, %v174_v54  ;;  %v629_v2 = vpop.eup %628 }
 0x2a2   :  { %v173_v62 = vsel %vm172_vm4, %v170_v57, %v167_v56  ;;  %v631_v9 = vpop.eup %630 }
 0x2a3   :  { %v180_v63 = vmul.f32 %v627_v60, %v176_v58  ;;  %v175_v1 = vsub.f32 %v153_v61, %v173_v62  ;;  %v349_v10 = vmul.f32 %v631_v9, %v347_v8 }
 0x2a5   :  { %v182_v3 = vmul.f32 %v180_v63, %v730_v59  ;;  %v177_v4 = vmul.f32 0.5, %v175_v1  ;;  %v351_v12 = vsel %vm350_vm5, %v347_v8, %v349_v10 }
 0x2a6   :  { %v354_v13 = vsel %vm352_vm6, %v353_v11, %v351_v12 }
 0x2a7   :  { %585 = vmatprep.mubr.msk.f32.mxu0 %vm35_vm0, %v182_v3  ;;  %v181_v5 = vmul.f32 %v629_v2, %v177_v4  ;;  %v355_v14 = vmax.f32 %v354_v13, 1e-15 }
 0x2a9   :  { %v183_v7 = vmul.f32 %v181_v5, %v735_v0  ;;  %v570_v15 = vclamps-f32 %v355_v14, 15.0 }
 0x2ab   :  { %586 = vmatmul.mubr.msk.f32.vlgmr.msra.gmra.mrb[0].mxu0 %vm35_vm0, %v183_v7  ;;  %632 = vtanh.f32 %v570_v15  ;;  %vm269_vm0 = vcmask 261120  }
 0x2ac   :  { %634 = vrcp.f32 %v355_v14 }
 0x2b5   :  { %v633_v59 = vpop.eup %632 }
 0x2b6   :  { %v359_v16 = vmul.f32 %v633_v59, %v749_v6  ;;  %v635_v17 = vpop.eup %634 }
 0x2b8   :  { %v759_v20 = vmul.f32 %v635_v17, %v359_v16  ;;  %v393_v17 = vlaneseq }
 0x2ba   :  { %v362_v23 = vmul.f32 %v759_v20, %v759_v20 }
 0x2bc   :  { %v363_v25 = vsel %vm344_vm11, %v362_v23, 0.0 }
 0x37e   :  { %v587_v0 = vpop.f32.mrb[0].mxu0 }
 0x37f   :  { %v258_v18 = vpop.f32.mrb[1].mxu0  ;;  %v268_v21 = vmul.f32 %v587_v0, %v587_v0 }
 0x380   :  { %v267_v19 = vmul.f32 %v258_v18, %v258_v18 }
 0x381   :  { %v273_v24 = vsel %vm269_vm0, %v268_v21, 0.0 }
 0x382   :  { %v270_v22 = vsel %vm269_vm0, %v267_v19, 0.0 }
 0x383   :  { %271 = vadd.xlane.f32.xlu1 %v270_v22 }
 0x387   :  { %274 = vadd.xlane.f32.xlu1 %v273_v24 }
 0x38b   :  { %364 = vadd.xlane.f32.xlu1 %v363_v25 }
 0x410   :  { %v272_v6 = vpop.xlane.xlu1 %271 }
 0x411   :  { %636 = vrsqrt.f32 %v272_v6  ;;  %vm278_vm7 = vcmp.eq.f32.partialorder %v272_v6, inf  ;;  %v281_v30 = vand.u32 2147483648, %v272_v6  ;;  %vm280_vm8 = vcmp.eq.f32.partialorder %v272_v6, 0.0 }
 0x414   :  { %v275_v26 = vpop.xlane.xlu1 %274 }
 0x415   :  { %638 = vrsqrt.f32 %v275_v26  ;;  %vm285_vm9 = vcmp.eq.f32.partialorder %v275_v26, inf  ;;  %v288_v36 = vand.u32 2147483648, %v275_v26  ;;  %vm287_vm10 = vcmp.eq.f32.partialorder %v275_v26, 0.0 }
 0x418   :  { %v365_v27 = vpop.xlane.xlu1 %364 }
 0x419   :  { %640 = vrsqrt.f32 %v365_v27  ;;  %vm368_vm12 = vcmp.eq.f32.partialorder %v365_v27, inf  ;;  %v371_v41 = vand.u32 2147483648, %v365_v27  ;;  %vm370_vm13 = vcmp.eq.f32.partialorder %v365_v27, 0.0 }
 0x41b   :  { %v637_v28 = vpop.eup %636 }
 0x41c   :  { %v277_v29 = vmul.f32 %v637_v28, %v272_v6 }
 0x41e   :  { %v279_v31 = vsel %vm278_vm7, %v272_v6, %v277_v29 }
 0x41f   :  { %v639_v32 = vpop.eup %638  ;;  %v282_v33 = vsel %vm280_vm8, %v281_v30, %v279_v31 }
 0x420   :  { %v290_v34 = vmax.f32 %v282_v33, 1e-15  ;;  %v284_v35 = vmul.f32 %v639_v32, %v275_v26 }
 0x422   :  { %v568_v37 = vclamps-f32 %v290_v34, 15.0  ;;  %v286_v38 = vsel %vm285_vm9, %v275_v26, %v284_v35 }
 0x423   :  { %v641_v39 = vpop.eup %640  ;;  %v289_v40 = vsel %vm287_vm10, %v288_v36, %v286_v38 }
 0x424   :  { %642 = vtanh.f32 %v568_v37  ;;  %v291_v42 = vmax.f32 %v289_v40, 1e-15  ;;  %v367_v43 = vmul.f32 %v641_v39, %v365_v27 }
 0x425   :  { %644 = vrcp.f32 %v290_v34 }
 0x426   :  { %v569_v44 = vclamps-f32 %v291_v42, 15.0  ;;  %v369_v45 = vsel %vm368_vm12, %v365_v27, %v367_v43 }
 0x427   :  { %v372_v46 = vsel %vm370_vm13, %v371_v41, %v369_v45 }
 0x428   :  { %646 = vtanh.f32 %v569_v44  ;;  %v373_v47 = vmax.f32 %v372_v46, 1e-15 }
 0x429   :  { %648 = vrcp.f32 %v291_v42 }
 0x42a   :  { %650 = vrcp.f32 %v373_v47  ;;  %vm374_vm14 = vcmp.gt.f32.partialorder %v373_v47, 0.996 }
 0x42e   :  { %v643_v48 = vpop.eup %642 }
 0x42f   :  { %v298_v49 = vmul.f32 %v643_v48, %v258_v18  ;;  %v645_v50 = vpop.eup %644  ;;  %v394_v18 = vshrl.u32 %v393_v17, 7 }
 0x431   :  { %v302_v51 = vmul.f32 %v645_v50, %v298_v49 }
 0x432   :  { %v647_v52 = vpop.eup %646 }
 0x433   :  { %v649_v53 = vpop.eup %648  ;;  %v304_v54 = vmul.f32 %v302_v51, %v302_v51  ;;  %v299_v55 = vmul.f32 %v647_v52, %v587_v0 }
 0x434   :  { %v651_v56 = vpop.eup %650 }
 0x435   :  { %v306_v57 = vsel %vm269_vm0, %v304_v54, 0.0  ;;  %v303_v58 = vmul.f32 %v649_v53, %v299_v55  ;;  %v376_v60 = vmul.f32 0.996, %v651_v56 }
 0x436   :  { %307 = vadd.xlane.f32.xlu1 %v306_v57 }
 0x437   :  { %v305_v61 = vmul.f32 %v303_v58, %v303_v58  ;;  %v377_v62 = vmul.f32 %v376_v60, %v759_v20 }
 0x439   :  { %v309_v63 = vsel %vm269_vm0, %v305_v61, 0.0  ;;  %v380_v1 = vsel %vm374_vm14, %v377_v62, %v759_v20  ;;  %v395_v20 = vsub.s32 0, %v394_v18 }
 0x43a   :  { %310 = vadd.xlane.f32.xlu0 %v309_v63  ;;  %v389_v2 = vmul.f32 %v380_v1, %v380_v1 }
 0x43b   :  { %v396_v24 = vrot.slane %v380_v1, %v395_v20 }
 0x43c   :  { %v390_v3 = vsel %vm344_vm11, %v389_v2, 0.0 }
 0x43d   :  { %391 = vadd.xlane.f32.xlu1 %v390_v3 }
 0x4c3   :  { %v308_v4 = vpop.xlane.xlu1 %307 }
 0x4c4   :  { %652 = vrsqrt.f32 %v308_v4  ;;  %vm314_vm15 = vcmp.eq.f32.partialorder %v308_v4, inf  ;;  %v317_v9 = vand.u32 2147483648, %v308_v4  ;;  %vm316_vm1 = vcmp.eq.f32.partialorder %v308_v4, 0.0 }
 0x4c7   :  { %v311_v5 = vpop.xlane.xlu0 %310 }
 0x4c8   :  { %654 = vrsqrt.f32 %v311_v5  ;;  %vm321_vm2 = vcmp.eq.f32.partialorder %v311_v5, inf  ;;  %v324_v15 = vand.u32 2147483648, %v311_v5  ;;  %vm323_vm11 = vcmp.eq.f32.partialorder %v311_v5, 0.0 }
 0x4ca   :  { %v392_v36 = vpop.xlane.xlu1 %391 }
 0x4cb   :  { %v412_v39 = vrot.slane %v392_v36, %v395_v20 }
 0x4ce   :  { %v653_v7 = vpop.eup %652 }
 0x4cf   :  { %v313_v8 = vmul.f32 %v653_v7, %v308_v4 }
 0x4d1   :  { %v315_v10 = vsel %vm314_vm15, %v308_v4, %v313_v8 }
 0x4d2   :  { %v655_v11 = vpop.eup %654  ;;  %v318_v12 = vsel %vm316_vm1, %v317_v9, %v315_v10 }
 0x4d3   :  { %v320_v13 = vmul.f32 %v655_v11, %v311_v5  ;;  %v326_v14 = vmax.f32 %v318_v12, 1e-15 }
 0x4d5   :  { %656 = vrcp.f32 %v326_v14  ;;  %v322_v59 = vsel %vm321_vm2, %v311_v5, %v320_v13  ;;  %vm328_vm3 = vcmp.gt.f32.partialorder %v326_v14, 0.996 }
 0x4d6   :  { %v325_v16 = vsel %vm323_vm11, %v324_v15, %v322_v59 }
 0x4d7   :  { %v327_v0 = vmax.f32 %v325_v16, 1e-15 }
 0x4d9   :  { %658 = vrcp.f32 %v327_v0  ;;  %vm329_vm4 = vcmp.gt.f32.partialorder %v327_v0, 0.996 }
 0x4df   :  { %v657_v19 = vpop.eup %656 }
 0x4e0   :  { %v332_v21 = vmul.f32 0.996, %v657_v19 }
 0x4e2   :  { %v334_v22 = vmul.f32 %v332_v21, %v302_v51 }
 0x4e3   :  { %v659_v23 = vpop.eup %658 }
 0x4e4   :  { %v340_v25 = vsel %vm328_vm3, %v334_v22, %v302_v51  ;;  %v333_v6 = vmul.f32 0.996, %v659_v23  ;;  %vm555_vm3 = vcmask 257024  }
 0x4e5   :  { %v397_v26 = vmul.f32 %v396_v24, %v340_v25  ;;  %v381_v29 = vmul.f32 %v340_v25, %v340_v25 }
 0x4e6   :  { %v335_v27 = vmul.f32 %v333_v6, %v303_v58 }
 0x4e7   :  { %v399_v28 = vsel %vm269_vm0, %v397_v26, 0.0  ;;  %v383_v33 = vsel %vm269_vm0, %v381_v29, 0.0 }
 0x4e8   :  { %400 = vadd.xlane.f32.xlu0 %v399_v28  ;;  %v341_v30 = vsel %vm329_vm4, %v335_v27, %v303_v58 }
 0x4e9   :  { %v398_v31 = vmul.f32 %v396_v24, %v341_v30  ;;  %v382_v34 = vmul.f32 %v341_v30, %v341_v30 }
 0x4eb   :  { %v402_v32 = vsel %vm269_vm0, %v398_v31, 0.0  ;;  %v386_v35 = vsel %vm269_vm0, %v382_v34, 0.0 }
 0x4ec   :  { %403 = vadd.xlane.f32.xlu1 %v402_v32  ;;  %384 = vadd.xlane.f32.xlu0 %v383_v33 }
 0x4f0   :  { %387 = vadd.xlane.f32.xlu1 %v386_v35 }
 0x575   :  { %v401_v37 = vpop.xlane.xlu0 %400 }
 0x576   :  { %v405_v38 = vmul.f32 2.0, %v401_v37 }
 0x578   :  { %v407_v42 = vadd.f32 1.0, %v405_v38 }
 0x579   :  { %v385_v40 = vpop.xlane.xlu0 %384  ;;  %v404_v41 = vpop.xlane.xlu1 %403 }
 0x57a   :  { %v423_v43 = vmul.f32 %v412_v39, %v385_v40  ;;  %v406_v44 = vmul.f32 2.0, %v404_v41  ;;  %v413_v50 = vadd.f32 %v412_v39, %v407_v42  ;;  %v417_v51 = vsub.f32 1.0, %v385_v40 }
 0x57c   :  { %v425_v45 = vadd.f32 %v423_v43, %v407_v42  ;;  %v408_v48 = vadd.f32 1.0, %v406_v44  ;;  %v415_v54 = vmul.f32 %v413_v50, %v340_v25  ;;  %v419_v55 = vmul.f32 %v417_v51, %v396_v24 }
 0x57d   :  { %v388_v46 = vpop.xlane.xlu1 %387 }
 0x57e   :  { %v427_v47 = vmax.f32 %v425_v45, 1e-15  ;;  %v424_v49 = vmul.f32 %v412_v39, %v388_v46  ;;  %v414_v56 = vadd.f32 %v412_v39, %v408_v48  ;;  %v418_v57 = vsub.f32 1.0, %v388_v46 }
 0x57f   :  { %v421_v58 = vadd.f32 %v419_v55, %v415_v54 }
 0x580   :  { %660 = vrcp.f32 %v427_v47  ;;  %v426_v52 = vadd.f32 %v424_v49, %v408_v48  ;;  %v416_v61 = vmul.f32 %v414_v56, %v341_v30  ;;  %v420_v62 = vmul.f32 %v418_v57, %v396_v24 }
 0x582   :  { %v428_v53 = vmax.f32 %v426_v52, 1e-15  ;;  %v422_v2 = vadd.f32 %v420_v62, %v416_v61 }
 0x584   :  { %662 = vrcp.f32 %v428_v53 }
 0x58a   :  { %v661_v60 = vpop.eup %660 }
 0x58b   :  { %v430_v63 = vmul.f32 %v661_v60, %v421_v58 }
 0x58d   :  { %v433_v1 = vmul.f32 %v430_v63, %v430_v63 }
 0x58e   :  { %v663_v3 = vpop.eup %662 }
 0x58f   :  { %v435_v4 = vsel %vm269_vm0, %v433_v1, 0.0  ;;  %v432_v5 = vmul.f32 %v663_v3, %v422_v2 }
 0x590   :  { %436 = vadd.xlane.f32.xlu0 %v435_v4 }
 0x591   :  { %v434_v7 = vmul.f32 %v432_v5, %v432_v5 }
 0x593   :  { %v438_v8 = vsel %vm269_vm0, %v434_v7, 0.0 }
 0x594   :  { %439 = vadd.xlane.f32.xlu1 %v438_v8 }
 0x61d   :  { %v437_v9 = vpop.xlane.xlu0 %436 }
 0x61e   :  { %664 = vrsqrt.f32 %v437_v9  ;;  %vm443_vm5 = vcmp.eq.f32.partialorder %v437_v9, inf  ;;  %v446_v13 = vand.u32 2147483648, %v437_v9  ;;  %vm445_vm6 = vcmp.eq.f32.partialorder %v437_v9, 0.0 }
 0x621   :  { %v440_v10 = vpop.xlane.xlu1 %439 }
 0x622   :  { %666 = vrsqrt.f32 %v440_v10  ;;  %vm450_vm7 = vcmp.eq.f32.partialorder %v440_v10, inf  ;;  %v453_v0 = vand.u32 2147483648, %v440_v10  ;;  %vm452_vm8 = vcmp.eq.f32.partialorder %v440_v10, 0.0 }
 0x628   :  { %v665_v11 = vpop.eup %664 }
 0x629   :  { %v442_v12 = vmul.f32 %v665_v11, %v437_v9 }
 0x62b   :  { %v444_v14 = vsel %vm443_vm5, %v437_v9, %v442_v12 }
 0x62c   :  { %v447_v15 = vsel %vm445_vm6, %v446_v13, %v444_v14  ;;  %v667_v59 = vpop.eup %666 }
 0x62d   :  { %v455_v16 = vmax.f32 %v447_v15, 1e-15  ;;  %v449_v17 = vmul.f32 %v667_v59, %v440_v10 }
 0x62f   :  { %668 = vrcp.f32 %v455_v16  ;;  %v451_v18 = vsel %vm450_vm7, %v440_v10, %v449_v17  ;;  %vm457_vm9 = vcmp.gt.f32.partialorder %v455_v16, 0.996 }
 0x630   :  { %v454_v19 = vsel %vm452_vm8, %v453_v0, %v451_v18 }
 0x631   :  { %v456_v20 = vmax.f32 %v454_v19, 1e-15 }
 0x633   :  { %670 = vrcp.f32 %v456_v20  ;;  %vm458_vm10 = vcmp.gt.f32.partialorder %v456_v20, 0.996 }
 0x639   :  { %v669_v21 = vpop.eup %668 }
 0x63a   :  { %v461_v22 = vmul.f32 0.996, %v669_v21 }
 0x63c   :  { %v463_v23 = vmul.f32 %v461_v22, %v430_v63 }
 0x63d   :  { %v671_v24 = vpop.eup %670 }
 0x63e   :  { %v777_v25 = vsel %vm457_vm9, %v463_v23, %v430_v63  ;;  %v462_v26 = vmul.f32 0.996, %v671_v24 }
 0x63f   :  { %v471_v6 = vmul.f32 %v777_v25, %v777_v25 }
 0x640   :  { %v464_v28 = vmul.f32 %v462_v26, %v432_v5 }
 0x641   :  { %v473_v27 = vsel %vm269_vm0, %v471_v6, 0.0 }
 0x642   :  { %474 = vadd.xlane.f32.xlu0 %v473_v27  ;;  %v782_v29 = vsel %vm458_vm10, %v464_v28, %v432_v5 }
 0x643   :  { %v472_v30 = vmul.f32 %v782_v29, %v782_v29 }
 0x645   :  { %v476_v31 = vsel %vm269_vm0, %v472_v30, 0.0 }
 0x646   :  { %477 = vadd.xlane.f32.xlu1 %v476_v31 }
 0x6cf   :  { %v475_v32 = vpop.xlane.xlu0 %474 }
 0x6d0   :  { %672 = vrsqrt.f32 %v475_v32  ;;  %vm481_vm12 = vcmp.eq.f32.partialorder %v475_v32, inf  ;;  %v484_v36 = vand.u32 2147483648, %v475_v32  ;;  %vm483_vm13 = vcmp.eq.f32.partialorder %v475_v32, 0.0 }
 0x6d3   :  { %v478_v33 = vpop.xlane.xlu1 %477 }
 0x6d4   :  { %674 = vrsqrt.f32 %v478_v33  ;;  %vm488_vm14 = vcmp.eq.f32.partialorder %v478_v33, inf  ;;  %v491_v44 = vand.u32 2147483648, %v478_v33  ;;  %vm490_vm0 = vcmp.eq.f32.partialorder %v478_v33, 0.0 }
 0x6da   :  { %v673_v34 = vpop.eup %672 }
 0x6db   :  { %v480_v35 = vmul.f32 %v673_v34, %v475_v32 }
 0x6dd   :  { %v482_v37 = vsel %vm481_vm12, %v475_v32, %v480_v35 }
 0x6de   :  { %v485_v38 = vsel %vm483_vm13, %v484_v36, %v482_v37  ;;  %v675_v39 = vpop.eup %674 }
 0x6df   :  { %v493_v40 = vmax.f32 %v485_v38, 1e-15  ;;  %v487_v41 = vmul.f32 %v675_v39, %v478_v33 }
 0x6e1   :  { %v571_v42 = vclamps-f32 %v493_v40, 0.9999999  ;;  %v489_v43 = vsel %vm488_vm14, %v478_v33, %v487_v41 }
 0x6e2   :  { %v492_v47 = vsel %vm490_vm0, %v491_v44, %v489_v43 }
 0x6e3   :  { %v499_v45 = vadd.f32 1.0, %v571_v42  ;;  %v517_v46 = vsub.f32 0.0, %v571_v42  ;;  %v494_v49 = vmax.f32 %v492_v47, 1e-15  ;;  %v502_v51 = vmul.f32 -0.5, %v571_v42 }
 0x6e4   :  { %v505_v60 = vand.u32 2147483647, %v571_v42 }
 0x6e5   :  { %676 = vlog2.f32 %v499_v45  ;;  %v519_v48 = vadd.f32 1.0, %v517_v46  ;;  %v572_v50 = vclamps-f32 %v494_v49, 0.9999999  ;;  %v522_v52 = vmul.f32 -0.5, %v517_v46 }
 0x6e6   :  { %v503_v55 = vadd.f32 1.0, %v502_v51  ;;  %v525_v61 = vand.u32 2147483647, %v517_v46  ;;  %vm506_vm15 = vcmp.lt.f32.partialorder %v505_v60, 0.0004427343 }
 0x6e7   :  { %678 = vlog2.f32 %v519_v48  ;;  %v508_v53 = vadd.f32 1.0, %v572_v50  ;;  %v518_v54 = vsub.f32 0.0, %v572_v50  ;;  %v523_v57 = vadd.f32 1.0, %v522_v52 }
 0x6e8   :  { %v504_v1 = vmul.f32 %v571_v42, %v503_v55  ;;  %v511_v4 = vmul.f32 -0.5, %v572_v50  ;;  %vm526_vm1 = vcmp.lt.f32.partialorder %v525_v61, 0.0004427343  ;;  %v514_v14 = vand.u32 2147483647, %v572_v50 }
 0x6e9   :  { %680 = vlog2.f32 %v508_v53  ;;  %v528_v56 = vadd.f32 1.0, %v518_v54  ;;  %v524_v3 = vmul.f32 %v523_v57, %v517_v46  ;;  %v531_v5 = vmul.f32 -0.5, %v518_v54 }
 0x6ea   :  { %682 = vrcp.f32 %v493_v40  ;;  %v512_v11 = vadd.f32 1.0, %v511_v4  ;;  %v534_v15 = vand.u32 2147483647, %v518_v54  ;;  %vm515_vm2 = vcmp.lt.f32.partialorder %v514_v14, 0.0004427343 }
 0x6eb   :  { %684 = vlog2.f32 %v528_v56  ;;  %v532_v12 = vadd.f32 1.0, %v531_v5 }
 0x6ec   :  { %686 = vrcp.f32 %v494_v49  ;;  %v513_v18 = vmul.f32 %v572_v50, %v512_v11  ;;  %vm535_vm11 = vcmp.lt.f32.partialorder %v534_v15, 0.0004427343 }
 0x6ed   :  { %v533_v20 = vmul.f32 %v532_v12, %v518_v54 }
 0x6ef   :  { %v677_v58 = vpop.eup %676 }
 0x6f0   :  { %v501_v62 = vmul.f32 0.6931472, %v677_v58 }
 0x6f1   :  { %v679_v63 = vpop.eup %678 }
 0x6f2   :  { %v521_v2 = vmul.f32 0.6931472, %v679_v63  ;;  %v507_v7 = vsel %vm506_vm15, %v504_v1, %v501_v62 }
 0x6f3   :  { %v681_v10 = vpop.eup %680 }
 0x6f4   :  { %v527_v8 = vsel %vm526_vm1, %v524_v3, %v521_v2  ;;  %v683_v59 = vpop.eup %682  ;;  %v510_v16 = vmul.f32 0.6931472, %v681_v10 }
 0x6f5   :  { %v537_v9 = vsub.f32 %v507_v7, %v527_v8  ;;  %v685_v17 = vpop.eup %684 }
 0x6f6   :  { %v530_v19 = vmul.f32 0.6931472, %v685_v17  ;;  %v516_v22 = vsel %vm515_vm2, %v513_v18, %v510_v16  ;;  %v687_v27 = vpop.eup %686 }
 0x6f7   :  { %v539_v13 = vmul.f32 0.5, %v537_v9 }
 0x6f8   :  { %v536_v23 = vsel %vm535_vm11, %v533_v20, %v530_v19 }
 0x6f9   :  { %v543_v0 = vmul.f32 %v683_v59, %v539_v13  ;;  %v538_v6 = vsub.f32 %v516_v22, %v536_v23 }
 0x6fb   :  { %v545_v21 = vmul.f32 %v543_v0, %v777_v25  ;;  %v540_v26 = vmul.f32 0.5, %v538_v6 }
 0x6fd   :  { %v575_v24 = vpack.c.bf16 %v545_v21, %v545_v21  ;;  %v544_v28 = vmul.f32 %v687_v27, %v540_v26 }
 0x6ff   :  { %556 = vst.msk [vmem:[%s799_s4] sm:$0xf] %vm555_vm3, %v575_v24  ;;  %v546_v30 = vmul.f32 %v544_v28, %v782_v29 }
 0x701   :  { %v576_v31 = vpack.c.bf16 %v546_v30, %v546_v30 }
 0x703   :  { %557 = vst.msk [vmem:[%s799_s4 + $0x4] sm:$0xf] %vm555_vm3, %v576_v31 }

// kernel: hyp_gcn3_forward.8
= control target key start
LH: loop header
LB: loop body
LE: loop exit
PB: predicated region body
PF: predicated region fallthrough
CT: control target
= control target key end

     0   :  { %vm16_vm0 = vcmask 261120   ;;  %v507_v0 = vmov 0.0   ;;  %vm508_vm1 = vmmov 0   ;;  %vm36_vm2 = vcmask 130048   ;;  %s572_s1 = inlined_call_operand.vmem [shape: bf16[16,32], index: 1, kind: input, shape index: {}]   ;;  %s573_s0 = inlined_call_operand.vmem [shape: bf16[16,16], index: 0, kind: input, shape index: {}]   ;;  %s574_s2 = inlined_call_operand.vmem [shape: bf16[16,32], index: 2, kind: output, shape index: {}]  }
   0x1   :  { %17 = vst.msk [vmem:[#allocation2] sm:$0xff] %vm16_vm0, %v507_v0  ;;  %18 = vst.msk [vmem:[#allocation2 + $0x8] sm:$0xff] %vm16_vm0, %v507_v0  ;;  %425 = vmatprep.subr.bf16.mxu0 %v507_v0  ;;  %v433_v1 = vld [vmem:[%s572_s1] sm:$0xff]   ;;  %427 = vmatprep.mubr.msk.bf16.mxu0 %vm508_vm1, %v507_v0 }
   0x2   :  { %v434_v2 = vld [vmem:[%s573_s0] sm:$0xff]   ;;  %426 = vmatpush3.bf16.msra.mxu0 %v433_v1 }
   0x5   :  { %428 = vmatmul.mubr.msk.bf16.vlgmr.msra.gmra.mrb[0].mxu0 %vm36_vm2, %v434_v2 }
   0x8   :  { %v19_v3 = vld [vmem:[#allocation2] sm:$0xff]  ;;  %v20_v5 = vld [vmem:[#allocation2 + $0x8] sm:$0xff] }
  0xd8   :  { %v74_v4 = vpop.f32.mrb[0].mxu0 }
  0xd9   :  { %v81_v6 = vadd.f32 %v74_v4, %v19_v3  ;;  %v429_v7 = vpop.f32.mrb[1].mxu0 }
  0xda   :  { %v77_v8 = vpop.f32.mrb[2].mxu0 }
  0xdb   :  { %84 = vst.msk [vmem:[#allocation2] sm:$0xff] %vm16_vm0, %v81_v6  ;;  %v82_v9 = vadd.f32 %v77_v8, %v20_v5  ;;  %v430_v10 = vpop.f32.mrb[3].mxu0 }
  0xdd   :  { %85 = vst.msk [vmem:[#allocation2 + $0x8] sm:$0xff] %vm16_vm0, %v82_v9 }
  0xe2   :  { %v89_v11 = vld [vmem:[#allocation2] sm:$0xff] }
  0xe3   :  { %v91_v12 = vmul.f32 %v89_v11, %v89_v11 }
  0xe4   :  { %v90_v13 = vld [vmem:[#allocation2 + $0x8] sm:$0xff] }
  0xe5   :  { %v93_v14 = vsel %vm16_vm0, %v91_v12, 0.0  ;;  %v92_v15 = vmul.f32 %v90_v13, %v90_v13 }
  0xe6   :  { %94 = vadd.xlane.f32.xlu0 %v93_v14 }
  0xe7   :  { %v96_v16 = vsel %vm16_vm0, %v92_v15, 0.0 }
  0xea   :  { %97 = vadd.xlane.f32.xlu0 %v96_v16 }
 0x173   :  { %v95_v17 = vpop.xlane.xlu0 %94 }
 0x174   :  { %435 = vrsqrt.f32 %v95_v17  ;;  %vm101_vm3 = vcmp.eq.f32.partialorder %v95_v17, inf  ;;  %v104_v21 = vand.u32 2147483648, %v95_v17  ;;  %vm103_vm4 = vcmp.eq.f32.partialorder %v95_v17, 0.0 }
 0x177   :  { %v98_v18 = vpop.xlane.xlu0 %97 }
 0x178   :  { %437 = vrsqrt.f32 %v98_v18  ;;  %vm108_vm5 = vcmp.eq.f32.partialorder %v98_v18, inf  ;;  %v111_v27 = vand.u32 2147483648, %v98_v18  ;;  %vm110_vm6 = vcmp.eq.f32.partialorder %v98_v18, 0.0 }
 0x17e   :  { %v436_v19 = vpop.eup %435 }
 0x17f   :  { %v100_v20 = vmul.f32 %v436_v19, %v95_v17 }
 0x181   :  { %v102_v22 = vsel %vm101_vm3, %v95_v17, %v100_v20 }
 0x182   :  { %v438_v23 = vpop.eup %437  ;;  %v105_v24 = vsel %vm103_vm4, %v104_v21, %v102_v22 }
 0x183   :  { %v113_v25 = vmax.f32 %v105_v24, 1e-15  ;;  %v107_v26 = vmul.f32 %v438_v23, %v98_v18 }
 0x185   :  { %v411_v28 = vclamps-f32 %v113_v25, 15.0  ;;  %v109_v29 = vsel %vm108_vm5, %v98_v18, %v107_v26 }
 0x186   :  { %v112_v30 = vsel %vm110_vm6, %v111_v27, %v109_v29 }
 0x187   :  { %439 = vtanh.f32 %v411_v28  ;;  %v114_v31 = vmax.f32 %v112_v30, 1e-15 }
 0x188   :  { %441 = vrcp.f32 %v113_v25 }
 0x189   :  { %v412_v32 = vclamps-f32 %v114_v31, 15.0 }
 0x18b   :  { %443 = vtanh.f32 %v412_v32 }
 0x18c   :  { %445 = vrcp.f32 %v114_v31 }
 0x191   :  { %v440_v33 = vpop.eup %439 }
 0x192   :  { %v121_v34 = vmul.f32 %v440_v33, %v89_v11  ;;  %v442_v35 = vpop.eup %441 }
 0x194   :  { %v125_v36 = vmul.f32 %v442_v35, %v121_v34 }
 0x195   :  { %v444_v37 = vpop.eup %443 }
 0x196   :  { %v127_v38 = vmul.f32 %v125_v36, %v125_v36  ;;  %v122_v39 = vmul.f32 %v444_v37, %v90_v13  ;;  %v446_v40 = vpop.eup %445 }
 0x198   :  { %v129_v41 = vsel %vm16_vm0, %v127_v38, 0.0  ;;  %v126_v42 = vmul.f32 %v446_v40, %v122_v39 }
 0x199   :  { %130 = vadd.xlane.f32.xlu1 %v129_v41 }
 0x19a   :  { %v128_v43 = vmul.f32 %v126_v42, %v126_v42 }
 0x19c   :  { %v132_v44 = vsel %vm16_vm0, %v128_v43, 0.0 }
 0x19d   :  { %133 = vadd.xlane.f32.xlu1 %v132_v44 }
 0x226   :  { %v131_v45 = vpop.xlane.xlu1 %130 }
 0x227   :  { %447 = vrsqrt.f32 %v131_v45  ;;  %vm137_vm7 = vcmp.eq.f32.partialorder %v131_v45, inf  ;;  %v140_v49 = vand.u32 2147483648, %v131_v45  ;;  %vm139_vm8 = vcmp.eq.f32.partialorder %v131_v45, 0.0 }
 0x22a   :  { %v134_v46 = vpop.xlane.xlu1 %133 }
 0x22b   :  { %449 = vrsqrt.f32 %v134_v46  ;;  %vm144_vm9 = vcmp.eq.f32.partialorder %v134_v46, inf  ;;  %v147_v55 = vand.u32 2147483648, %v134_v46  ;;  %vm146_vm10 = vcmp.eq.f32.partialorder %v134_v46, 0.0 }
 0x231   :  { %v448_v47 = vpop.eup %447 }
 0x232   :  { %v136_v48 = vmul.f32 %v448_v47, %v131_v45 }
 0x234   :  { %v138_v50 = vsel %vm137_vm7, %v131_v45, %v136_v48 }
 0x235   :  { %v450_v51 = vpop.eup %449  ;;  %v141_v52 = vsel %vm139_vm8, %v140_v49, %v138_v50 }
 0x236   :  { %v143_v53 = vmul.f32 %v450_v51, %v134_v46  ;;  %v149_v54 = vmax.f32 %v141_v52, 1e-15 }
 0x238   :  { %451 = vrcp.f32 %v149_v54  ;;  %v145_v56 = vsel %vm144_vm9, %v134_v46, %v143_v53  ;;  %vm151_vm11 = vcmp.gt.f32.partialorder %v149_v54, 0.996 }
 0x239   :  { %v148_v57 = vsel %vm146_vm10, %v147_v55, %v145_v56 }
 0x23a   :  { %v150_v58 = vmax.f32 %v148_v57, 1e-15 }
 0x23c   :  { %453 = vrcp.f32 %v150_v58  ;;  %vm152_vm12 = vcmp.gt.f32.partialorder %v150_v58, 0.996 }
 0x242   :  { %v452_v59 = vpop.eup %451 }
 0x243   :  { %v155_v60 = vmul.f32 0.996, %v452_v59 }
 0x245   :  { %v157_v61 = vmul.f32 %v155_v60, %v125_v36 }
 0x246   :  { %v454_v62 = vpop.eup %453 }
 0x247   :  { %v538_v63 = vsel %vm151_vm11, %v157_v61, %v125_v36  ;;  %v156_v0 = vmul.f32 0.996, %v454_v62 }
 0x248   :  { %v165_v1 = vmul.f32 %v538_v63, %v538_v63 }
 0x249   :  { %v158_v2 = vmul.f32 %v156_v0, %v126_v42 }
 0x24a   :  { %v167_v3 = vsel %vm16_vm0, %v165_v1, 0.0 }
 0x24b   :  { %168 = vadd.xlane.f32.xlu0 %v167_v3  ;;  %v543_v4 = vsel %vm152_vm12, %v158_v2, %v126_v42 }
 0x24c   :  { %v166_v5 = vmul.f32 %v543_v4, %v543_v4 }
 0x24e   :  { %v170_v6 = vsel %vm16_vm0, %v166_v5, 0.0 }
 0x24f   :  { %171 = vadd.xlane.f32.xlu1 %v170_v6 }
 0x2d8   :  { %v169_v7 = vpop.xlane.xlu0 %168 }
 0x2d9   :  { %455 = vrsqrt.f32 %v169_v7  ;;  %vm175_vm13 = vcmp.eq.f32.partialorder %v169_v7, inf  ;;  %v178_v11 = vand.u32 2147483648, %v169_v7  ;;  %vm177_vm14 = vcmp.eq.f32.partialorder %v169_v7, 0.0 }
 0x2dc   :  { %v172_v8 = vpop.xlane.xlu1 %171 }
 0x2dd   :  { %457 = vrsqrt.f32 %v172_v8  ;;  %vm182_vm15 = vcmp.eq.f32.partialorder %v172_v8, inf  ;;  %v185_v17 = vand.u32 2147483648, %v172_v8  ;;  %vm184_vm1 = vcmp.eq.f32.partialorder %v172_v8, 0.0 }
 0x2e3   :  { %v456_v9 = vpop.eup %455 }
 0x2e4   :  { %v174_v10 = vmul.f32 %v456_v9, %v169_v7 }
 0x2e6   :  { %v176_v12 = vsel %vm175_vm13, %v169_v7, %v174_v10 }
 0x2e7   :  { %v458_v13 = vpop.eup %457  ;;  %v179_v14 = vsel %vm177_vm14, %v178_v11, %v176_v12 }
 0x2e8   :  { %v187_v15 = vmax.f32 %v179_v14, 1e-15  ;;  %v181_v16 = vmul.f32 %v458_v13, %v172_v8 }
 0x2ea   :  { %v413_v18 = vclamps-f32 %v187_v15, 0.9999999  ;;  %v183_v19 = vsel %vm182_vm15, %v172_v8, %v181_v16 }
 0x2eb   :  { %v186_v20 = vsel %vm184_vm1, %v185_v17, %v183_v19 }
 0x2ec   :  { %v188_v21 = vmax.f32 %v186_v20, 1e-15  ;;  %v193_v22 = vadd.f32 1.0, %v413_v18  ;;  %v211_v23 = vsub.f32 0.0, %v413_v18  ;;  %v196_v28 = vmul.f32 -0.5, %v413_v18 }
 0x2ed   :  { %v199_v32 = vand.u32 2147483647, %v413_v18 }
 0x2ee   :  { %v414_v24 = vclamps-f32 %v188_v21, 0.9999999  ;;  %459 = vlog2.f32 %v193_v22  ;;  %v213_v25 = vadd.f32 1.0, %v211_v23  ;;  %v216_v30 = vmul.f32 -0.5, %v211_v23 }
 0x2ef   :  { %v197_v31 = vadd.f32 1.0, %v196_v28  ;;  %v219_v37 = vand.u32 2147483647, %v211_v23  ;;  %vm200_vm2 = vcmp.lt.f32.partialorder %v199_v32, 0.0004427343 }
 0x2f0   :  { %v202_v26 = vadd.f32 1.0, %v414_v24  ;;  %461 = vlog2.f32 %v213_v25  ;;  %v212_v27 = vsub.f32 0.0, %v414_v24  ;;  %v217_v33 = vadd.f32 1.0, %v216_v30 }
 0x2f1   :  { %v205_v34 = vmul.f32 -0.5, %v414_v24  ;;  %v198_v40 = vmul.f32 %v413_v18, %v197_v31  ;;  %vm220_vm3 = vcmp.lt.f32.partialorder %v219_v37, 0.0004427343  ;;  %v208_v46 = vand.u32 2147483647, %v414_v24 }
 0x2f2   :  { %463 = vlog2.f32 %v202_v26  ;;  %v222_v29 = vadd.f32 1.0, %v212_v27  ;;  %v225_v35 = vmul.f32 -0.5, %v212_v27  ;;  %v218_v43 = vmul.f32 %v217_v33, %v211_v23 }
 0x2f3   :  { %v206_v44 = vadd.f32 1.0, %v205_v34  ;;  %v228_v47 = vand.u32 2147483647, %v212_v27  ;;  %vm209_vm4 = vcmp.lt.f32.partialorder %v208_v46, 0.0004427343 }
 0x2f4   :  { %465 = vlog2.f32 %v222_v29  ;;  %v226_v45 = vadd.f32 1.0, %v225_v35 }
 0x2f5   :  { %467 = vrcp.f32 %v187_v15  ;;  %v207_v53 = vmul.f32 %v414_v24, %v206_v44  ;;  %vm229_vm5 = vcmp.lt.f32.partialorder %v228_v47, 0.0004427343 }
 0x2f6   :  { %469 = vrcp.f32 %v188_v21  ;;  %v227_v55 = vmul.f32 %v226_v45, %v212_v27 }
 0x2f8   :  { %v460_v36 = vpop.eup %459 }
 0x2f9   :  { %v195_v38 = vmul.f32 0.6931472, %v460_v36 }
 0x2fa   :  { %v462_v39 = vpop.eup %461 }
 0x2fb   :  { %v215_v42 = vmul.f32 0.6931472, %v462_v39  ;;  %v201_v48 = vsel %vm200_vm2, %v198_v40, %v195_v38 }
 0x2fc   :  { %v464_v41 = vpop.eup %463 }
 0x2fd   :  { %v221_v49 = vsel %vm220_vm3, %v218_v43, %v215_v42  ;;  %v204_v50 = vmul.f32 0.6931472, %v464_v41 }
 0x2fe   :  { %v466_v51 = vpop.eup %465  ;;  %v231_v52 = vsub.f32 %v201_v48, %v221_v49 }
 0x2ff   :  { %v224_v54 = vmul.f32 0.6931472, %v466_v51  ;;  %v468_v57 = vpop.eup %467  ;;  %v210_v58 = vsel %vm209_vm4, %v207_v53, %v204_v50 }
 0x300   :  { %v233_v56 = vmul.f32 0.5, %v231_v52  ;;  %v470_v62 = vpop.eup %469 }
 0x301   :  { %v230_v59 = vsel %vm229_vm5, %v227_v55, %v224_v54 }
 0x302   :  { %v237_v60 = vmul.f32 %v468_v57, %v233_v56  ;;  %v232_v61 = vsub.f32 %v210_v58, %v230_v59 }
 0x304   :  { %v239_v0 = vmul.f32 %v237_v60, %v538_v63  ;;  %v234_v1 = vmul.f32 0.5, %v232_v61 }
 0x306   :  { %v241_v2 = vmax.f32 %v239_v0, 0.0  ;;  %v238_v3 = vmul.f32 %v470_v62, %v234_v1 }
 0x308   :  { %v243_v5 = vmul.f32 %v241_v2, %v241_v2  ;;  %v240_v6 = vmul.f32 %v238_v3, %v543_v4 }
 0x30a   :  { %v245_v7 = vsel %vm16_vm0, %v243_v5, 0.0  ;;  %v242_v8 = vmax.f32 %v240_v6, 0.0 }
 0x30b   :  { %246 = vadd.xlane.f32.xlu0 %v245_v7 }
 0x30c   :  { %v244_v9 = vmul.f32 %v242_v8, %v242_v8 }
 0x30e   :  { %v248_v10 = vsel %vm16_vm0, %v244_v9, 0.0 }
 0x30f   :  { %249 = vadd.xlane.f32.xlu1 %v248_v10 }
 0x398   :  { %v247_v11 = vpop.xlane.xlu0 %246 }
 0x399   :  { %471 = vrsqrt.f32 %v247_v11  ;;  %vm253_vm6 = vcmp.eq.f32.partialorder %v247_v11, inf  ;;  %v256_v14 = vand.u32 2147483648, %v247_v11  ;;  %vm255_vm7 = vcmp.eq.f32.partialorder %v247_v11, 0.0 }
 0x39c   :  { %v250_v12 = vpop.xlane.xlu1 %249 }
 0x39d   :  { %473 = vrsqrt.f32 %v250_v12  ;;  %vm260_vm8 = vcmp.eq.f32.partialorder %v250_v12, inf  ;;  %v263_v19 = vand.u32 2147483648, %v250_v12  ;;  %vm262_vm9 = vcmp.eq.f32.partialorder %v250_v12, 0.0 }
 0x3a3   :  { %v472_v13 = vpop.eup %471 }
 0x3a4   :  { %v252_v63 = vmul.f32 %v472_v13, %v247_v11 }
 0x3a6   :  { %v254_v15 = vsel %vm253_vm6, %v247_v11, %v252_v63 }
 0x3a7   :  { %v474_v16 = vpop.eup %473  ;;  %v257_v4 = vsel %vm255_vm7, %v256_v14, %v254_v15 }
 0x3a8   :  { %v265_v17 = vmax.f32 %v257_v4, 1e-15  ;;  %v259_v18 = vmul.f32 %v474_v16, %v250_v12 }
 0x3aa   :  { %v415_v20 = vclamps-f32 %v265_v17, 15.0  ;;  %v261_v21 = vsel %vm260_vm8, %v250_v12, %v259_v18  ;;  %vm401_vm8 = vcmask 257024  }
 0x3ab   :  { %v264_v22 = vsel %vm262_vm9, %v263_v19, %v261_v21 }
 0x3ac   :  { %475 = vtanh.f32 %v415_v20  ;;  %v266_v23 = vmax.f32 %v264_v22, 1e-15 }
 0x3ad   :  { %477 = vrcp.f32 %v265_v17 }
 0x3ae   :  { %v416_v24 = vclamps-f32 %v266_v23, 15.0 }
 0x3b0   :  { %479 = vtanh.f32 %v416_v24 }
 0x3b1   :  { %481 = vrcp.f32 %v266_v23 }
 0x3b6   :  { %v476_v25 = vpop.eup %475 }
 0x3b7   :  { %v273_v26 = vmul.f32 %v476_v25, %v241_v2  ;;  %v478_v27 = vpop.eup %477 }
 0x3b9   :  { %v277_v28 = vmul.f32 %v478_v27, %v273_v26 }
 0x3ba   :  { %v480_v29 = vpop.eup %479 }
 0x3bb   :  { %v279_v30 = vmul.f32 %v277_v28, %v277_v28  ;;  %v274_v31 = vmul.f32 %v480_v29, %v242_v8  ;;  %v482_v32 = vpop.eup %481 }
 0x3bd   :  { %v281_v33 = vsel %vm16_vm0, %v279_v30, 0.0  ;;  %v278_v34 = vmul.f32 %v482_v32, %v274_v31 }
 0x3be   :  { %282 = vadd.xlane.f32.xlu0 %v281_v33 }
 0x3bf   :  { %v280_v35 = vmul.f32 %v278_v34, %v278_v34 }
 0x3c1   :  { %v284_v36 = vsel %vm16_vm0, %v280_v35, 0.0 }
 0x3c2   :  { %285 = vadd.xlane.f32.xlu1 %v284_v36 }
 0x44b   :  { %v283_v37 = vpop.xlane.xlu0 %282 }
 0x44c   :  { %483 = vrsqrt.f32 %v283_v37  ;;  %vm289_vm10 = vcmp.eq.f32.partialorder %v283_v37, inf  ;;  %v292_v41 = vand.u32 2147483648, %v283_v37  ;;  %vm291_vm11 = vcmp.eq.f32.partialorder %v283_v37, 0.0 }
 0x44f   :  { %v286_v38 = vpop.xlane.xlu1 %285 }
 0x450   :  { %485 = vrsqrt.f32 %v286_v38  ;;  %vm296_vm12 = vcmp.eq.f32.partialorder %v286_v38, inf  ;;  %v299_v47 = vand.u32 2147483648, %v286_v38  ;;  %vm298_vm13 = vcmp.eq.f32.partialorder %v286_v38, 0.0 }
 0x456   :  { %v484_v39 = vpop.eup %483 }
 0x457   :  { %v288_v40 = vmul.f32 %v484_v39, %v283_v37 }
 0x459   :  { %v290_v42 = vsel %vm289_vm10, %v283_v37, %v288_v40 }
 0x45a   :  { %v486_v43 = vpop.eup %485  ;;  %v293_v44 = vsel %vm291_vm11, %v292_v41, %v290_v42 }
 0x45b   :  { %v295_v45 = vmul.f32 %v486_v43, %v286_v38  ;;  %v301_v46 = vmax.f32 %v293_v44, 1e-15 }
 0x45d   :  { %487 = vrcp.f32 %v301_v46  ;;  %v297_v48 = vsel %vm296_vm12, %v286_v38, %v295_v45  ;;  %vm303_vm14 = vcmp.gt.f32.partialorder %v301_v46, 0.996 }
 0x45e   :  { %v300_v49 = vsel %vm298_vm13, %v299_v47, %v297_v48 }
 0x45f   :  { %v302_v50 = vmax.f32 %v300_v49, 1e-15 }
 0x461   :  { %489 = vrcp.f32 %v302_v50  ;;  %vm304_vm15 = vcmp.gt.f32.partialorder %v302_v50, 0.996 }
 0x467   :  { %v488_v51 = vpop.eup %487 }
 0x468   :  { %v307_v52 = vmul.f32 0.996, %v488_v51 }
 0x46a   :  { %v309_v53 = vmul.f32 %v307_v52, %v277_v28 }
 0x46b   :  { %v490_v54 = vpop.eup %489 }
 0x46c   :  { %v554_v55 = vsel %vm303_vm14, %v309_v53, %v277_v28  ;;  %v308_v56 = vmul.f32 0.996, %v490_v54 }
 0x46d   :  { %v317_v57 = vmul.f32 %v554_v55, %v554_v55 }
 0x46e   :  { %v310_v58 = vmul.f32 %v308_v56, %v278_v34 }
 0x46f   :  { %v319_v59 = vsel %vm16_vm0, %v317_v57, 0.0 }
 0x470   :  { %320 = vadd.xlane.f32.xlu0 %v319_v59  ;;  %v559_v60 = vsel %vm304_vm15, %v310_v58, %v278_v34 }
 0x471   :  { %v318_v61 = vmul.f32 %v559_v60, %v559_v60 }
 0x473   :  { %v322_v62 = vsel %vm16_vm0, %v318_v61, 0.0 }
 0x474   :  { %323 = vadd.xlane.f32.xlu1 %v322_v62 }
 0x4fd   :  { %v321_v0 = vpop.xlane.xlu0 %320 }
 0x4fe   :  { %491 = vrsqrt.f32 %v321_v0  ;;  %vm327_vm1 = vcmp.eq.f32.partialorder %v321_v0, inf  ;;  %v330_v5 = vand.u32 2147483648, %v321_v0  ;;  %vm329_vm2 = vcmp.eq.f32.partialorder %v321_v0, 0.0 }
 0x501   :  { %v324_v1 = vpop.xlane.xlu1 %323 }
 0x502   :  { %493 = vrsqrt.f32 %v324_v1  ;;  %vm334_vm3 = vcmp.eq.f32.partialorder %v324_v1, inf  ;;  %v337_v11 = vand.u32 2147483648, %v324_v1  ;;  %vm336_vm0 = vcmp.eq.f32.partialorder %v324_v1, 0.0 }
 0x508   :  { %v492_v2 = vpop.eup %491 }
 0x509   :  { %v326_v3 = vmul.f32 %v492_v2, %v321_v0 }
 0x50b   :  { %v328_v6 = vsel %vm327_vm1, %v321_v0, %v326_v3 }
 0x50c   :  { %v494_v7 = vpop.eup %493  ;;  %v331_v8 = vsel %vm329_vm2, %v330_v5, %v328_v6 }
 0x50d   :  { %v339_v9 = vmax.f32 %v331_v8, 1e-15  ;;  %v333_v10 = vmul.f32 %v494_v7, %v324_v1 }
 0x50f   :  { %v417_v12 = vclamps-f32 %v339_v9, 0.9999999  ;;  %v335_v13 = vsel %vm334_vm3, %v324_v1, %v333_v10 }
 0x510   :  { %v338_v63 = vsel %vm336_vm0, %v337_v11, %v335_v13 }
 0x511   :  { %v345_v14 = vadd.f32 1.0, %v417_v12  ;;  %v363_v15 = vsub.f32 0.0, %v417_v12  ;;  %v340_v16 = vmax.f32 %v338_v63, 1e-15  ;;  %v348_v20 = vmul.f32 -0.5, %v417_v12 }
 0x512   :  { %v351_v26 = vand.u32 2147483647, %v417_v12 }
 0x513   :  { %495 = vlog2.f32 %v345_v14  ;;  %v365_v4 = vadd.f32 1.0, %v363_v15  ;;  %v418_v17 = vclamps-f32 %v340_v16, 0.9999999  ;;  %v368_v21 = vmul.f32 -0.5, %v363_v15 }
 0x514   :  { %v349_v23 = vadd.f32 1.0, %v348_v20  ;;  %v371_v27 = vand.u32 2147483647, %v363_v15  ;;  %vm352_vm4 = vcmp.lt.f32.partialorder %v351_v26, 0.0004427343 }
 0x515   :  { %497 = vlog2.f32 %v365_v4  ;;  %v354_v18 = vadd.f32 1.0, %v418_v17  ;;  %v364_v19 = vsub.f32 0.0, %v418_v17  ;;  %v369_v24 = vadd.f32 1.0, %v368_v21 }
 0x516   :  { %v357_v29 = vmul.f32 -0.5, %v418_v17  ;;  %v350_v32 = vmul.f32 %v417_v12, %v349_v23  ;;  %vm372_vm5 = vcmp.lt.f32.partialorder %v371_v27, 0.0004427343  ;;  %v360_v41 = vand.u32 2147483647, %v418_v17 }
 0x517   :  { %499 = vlog2.f32 %v354_v18  ;;  %v374_v22 = vadd.f32 1.0, %v364_v19  ;;  %v377_v30 = vmul.f32 -0.5, %v364_v19  ;;  %v370_v34 = vmul.f32 %v369_v24, %v363_v15 }
 0x518   :  { %v358_v38 = vadd.f32 1.0, %v357_v29  ;;  %v380_v42 = vand.u32 2147483647, %v364_v19  ;;  %vm361_vm6 = vcmp.lt.f32.partialorder %v360_v41, 0.0004427343 }
 0x519   :  { %501 = vlog2.f32 %v374_v22  ;;  %v378_v39 = vadd.f32 1.0, %v377_v30 }
 0x51a   :  { %503 = vrcp.f32 %v339_v9  ;;  %v359_v47 = vmul.f32 %v418_v17, %v358_v38  ;;  %vm381_vm7 = vcmp.lt.f32.partialorder %v380_v42, 0.0004427343 }
 0x51b   :  { %505 = vrcp.f32 %v340_v16  ;;  %v379_v49 = vmul.f32 %v378_v39, %v364_v19 }
 0x51d   :  { %v496_v25 = vpop.eup %495 }
 0x51e   :  { %v347_v28 = vmul.f32 0.6931472, %v496_v25 }
 0x51f   :  { %v498_v31 = vpop.eup %497 }
 0x520   :  { %v367_v33 = vmul.f32 0.6931472, %v498_v31  ;;  %v353_v36 = vsel %vm352_vm4, %v350_v32, %v347_v28 }
 0x521   :  { %v500_v35 = vpop.eup %499 }
 0x522   :  { %v373_v37 = vsel %vm372_vm5, %v370_v34, %v367_v33  ;;  %v356_v43 = vmul.f32 0.6931472, %v500_v35 }
 0x523   :  { %v383_v40 = vsub.f32 %v353_v36, %v373_v37  ;;  %v502_v44 = vpop.eup %501 }
 0x524   :  { %v504_v46 = vpop.eup %503  ;;  %v376_v48 = vmul.f32 0.6931472, %v502_v44  ;;  %v362_v51 = vsel %vm361_vm6, %v359_v47, %v356_v43 }
 0x525   :  { %v385_v45 = vmul.f32 0.5, %v383_v40  ;;  %v506_v56 = vpop.eup %505 }
 0x526   :  { %v382_v52 = vsel %vm381_vm7, %v379_v49, %v376_v48 }
 0x527   :  { %v389_v50 = vmul.f32 %v504_v46, %v385_v45  ;;  %v384_v54 = vsub.f32 %v362_v51, %v382_v52 }
 0x529   :  { %v391_v53 = vmul.f32 %v389_v50, %v554_v55  ;;  %v386_v58 = vmul.f32 0.5, %v384_v54 }
 0x52b   :  { %v421_v57 = vpack.c.bf16 %v391_v53, %v391_v53  ;;  %v390_v59 = vmul.f32 %v506_v56, %v386_v58 }
 0x52d   :  { %402 = vst.msk [vmem:[%s574_s2] sm:$0xf] %vm401_vm8, %v421_v57  ;;  %v392_v61 = vmul.f32 %v390_v59, %v559_v60 }
 0x52f   :  { %v422_v62 = vpack.c.bf16 %v392_v61, %v392_v61 }
 0x531   :  { %403 = vst.msk [vmem:[%s574_s2 + $0x4] sm:$0xf] %vm401_vm8, %v422_v62 }

// kernel: hyp_gcn3_forward.9
= control target key start
LH: loop header
LB: loop body
LE: loop exit
PB: predicated region body
PF: predicated region fallthrough
CT: control target
= control target key end

     0   :  { %v515_v0 = vmov 0   ;;  %vm197_vm0 = vcmask 253952   ;;  %vm39_vm1 = vcmask 261120   ;;  %s604_s1 = inlined_call_operand.vmem [shape: f32[16,1], index: 1, kind: input, shape index: {}]   ;;  %s605_s2 = inlined_call_operand.vmem [shape: f32[32,32], index: 2, kind: input, shape index: {}]   ;;  %s606_s3 = inlined_call_operand.vmem [shape: f32[1,32], index: 3, kind: input, shape index: {}]   ;;  %s607_s0 = inlined_call_operand.vmem [shape: bf16[16,32], index: 0, kind: input, shape index: {}]   ;;  %s608_s4 = inlined_call_operand.vmem [shape: bf16[16,32], index: 4, kind: output, shape index: {}]  }
   0x1   :  { %456 = vset.pattern.permute.xlu0 %v515_v0  ;;  %v21_v1 = vld [vmem:[%s604_s1] sm:$0xff]  ;;  %v36_v3 = vld [vmem:[%s605_s2 + $0x8] sm:$0xff]  ;;  %v37_v4 = vld [vmem:[%s605_s2 + $0x10] sm:$0xff] }
   0x2   :  { %v35_v2 = vld [vmem:[%s605_s2] sm:$0xff]  ;;  %25 = vperm.xlu0 %456, %v21_v1   ;;  %v22_v5 = vld [vmem:[%s604_s1 + $0x8] sm:$0xff]  ;;  %v38_v7 = vld [vmem:[%s605_s2 + $0x18] sm:$0xff] }
   0x3   :  { %v447_v6 = vpack.c.bf16 %v36_v3, %v35_v2  ;;  %v451_v8 = vpack.c.bf16 %v38_v7, %v37_v4  ;;  %v195_v9 = vld [vmem:[%s606_s3] sm:$0x1] }
   0x4   :  { %v196_v10 = vmul.f32 %v195_v9, %v195_v9  ;;  %v427_v12 = vld [vmem:[%s607_s0] sm:$0xff]  }
   0x5   :  { %448 = vmatprep.subr.bf16.mxu0 %v447_v6  ;;  %v428_v13 = vunpack.c.l.bf16 %v427_v12  ;;  %v429_v16 = vunpack.c.h.bf16 %v427_v12 }
   0x6   :  { %30 = vperm.xlu0 %456, %v22_v5   ;;  %450 = vmatpush3.bf16.msra.mxu0 %v447_v6  ;;  %v198_v11 = vsel %vm197_vm0, %v196_v10, 0.0 }
   0x7   :  { %452 = vmatprep.subr.bf16.mxu0 %v451_v8  ;;  %199 = vadd.xlane.f32.xlu1 %v198_v11 }
   0xa   :  { %454 = vmatpush3.bf16.msra.mxu0 %v451_v8 }
  0x81   :  { %v26_v14 = vpop.permute.xlu0 %25 }
  0x82   :  { %v33_v15 = vmul.f32 %v428_v13, %v26_v14 }
  0x84   :  { %444 = vmatprep.mubr.msk.f32.mxu0 %vm39_vm1, %v33_v15 }
  0x85   :  { %v31_v17 = vpop.permute.xlu0 %30 }
  0x86   :  { %v34_v18 = vmul.f32 %v429_v16, %v31_v17 }
  0x88   :  { %445 = vmatmul.mubr.msk.f32.vlgmr.msra.gmra.mrb[0].mxu0 %vm39_vm1, %v34_v18 }
  0x94   :  { %v200_v19 = vpop.xlane.xlu1 %199 }
  0x95   :  { %457 = vrsqrt.f32 %v200_v19  ;;  %vm203_vm2 = vcmp.eq.f32.partialorder %v200_v19, inf  ;;  %v206_v22 = vand.u32 2147483648, %v200_v19  ;;  %vm205_vm3 = vcmp.eq.f32.partialorder %v200_v19, 0.0 }
  0x9f   :  { %v458_v20 = vpop.eup %457 }
  0xa0   :  { %v202_v21 = vmul.f32 %v458_v20, %v200_v19 }
  0xa2   :  { %v204_v23 = vsel %vm203_vm2, %v200_v19, %v202_v21 }
  0xa3   :  { %v207_v24 = vsel %vm205_vm3, %v206_v22, %v204_v23 }
  0xa4   :  { %v208_v25 = vmax.f32 %v207_v24, 1e-15 }
  0xa6   :  { %v419_v26 = vclamps-f32 %v208_v25, 15.0 }
  0xa8   :  { %459 = vtanh.f32 %v419_v26 }
  0xa9   :  { %461 = vrcp.f32 %v208_v25 }
  0xb2   :  { %v460_v27 = vpop.eup %459 }
  0xb3   :  { %v212_v28 = vmul.f32 %v460_v27, %v195_v9  ;;  %v462_v29 = vpop.eup %461 }
  0xb5   :  { %v568_v30 = vmul.f32 %v462_v29, %v212_v28 }
  0xb7   :  { %v215_v35 = vmul.f32 %v568_v30, %v568_v30 }
  0xb9   :  { %v216_v38 = vsel %vm197_vm0, %v215_v35, 0.0 }
 0x15b   :  { %v446_v31 = vpop.f32.mrb[0].mxu0 }
 0x15c   :  { %v122_v32 = vmul.f32 %v446_v31, %v446_v31  ;;  %v112_v33 = vpop.f32.mrb[1].mxu0 }
 0x15d   :  { %v121_v34 = vmul.f32 %v112_v33, %v112_v33 }
 0x15e   :  { %v126_v36 = vsel %vm39_vm1, %v122_v32, 0.0 }
 0x15f   :  { %127 = vadd.xlane.f32.xlu0 %v126_v36  ;;  %v123_v37 = vsel %vm39_vm1, %v121_v34, 0.0 }
 0x160   :  { %124 = vadd.xlane.f32.xlu1 %v123_v37 }
 0x164   :  { %217 = vadd.xlane.f32.xlu1 %v216_v38 }
 0x1ec   :  { %v128_v39 = vpop.xlane.xlu0 %127 }
 0x1ed   :  { %463 = vrsqrt.f32 %v128_v39  ;;  %v125_v40 = vpop.xlane.xlu1 %124  ;;  %vm138_vm4 = vcmp.eq.f32.partialorder %v128_v39, inf  ;;  %v141_v45 = vand.u32 2147483648, %v128_v39  ;;  %vm140_vm5 = vcmp.eq.f32.partialorder %v128_v39, 0.0 }
 0x1ee   :  { %465 = vrsqrt.f32 %v125_v40  ;;  %vm131_vm6 = vcmp.eq.f32.partialorder %v125_v40, inf  ;;  %v134_v48 = vand.u32 2147483648, %v125_v40  ;;  %vm133_vm7 = vcmp.eq.f32.partialorder %v125_v40, 0.0 }
 0x1f1   :  { %v218_v41 = vpop.xlane.xlu1 %217 }
 0x1f2   :  { %467 = vrsqrt.f32 %v218_v41  ;;  %vm221_vm8 = vcmp.eq.f32.partialorder %v218_v41, inf  ;;  %v224_v54 = vand.u32 2147483648, %v218_v41  ;;  %vm223_vm9 = vcmp.eq.f32.partialorder %v218_v41, 0.0 }
 0x1f7   :  { %v464_v42 = vpop.eup %463 }
 0x1f8   :  { %v466_v43 = vpop.eup %465  ;;  %v137_v44 = vmul.f32 %v464_v42, %v128_v39 }
 0x1f9   :  { %v130_v46 = vmul.f32 %v466_v43, %v125_v40 }
 0x1fa   :  { %v139_v47 = vsel %vm138_vm4, %v128_v39, %v137_v44 }
 0x1fb   :  { %v142_v49 = vsel %vm140_vm5, %v141_v45, %v139_v47  ;;  %v132_v50 = vsel %vm131_vm6, %v125_v40, %v130_v46 }
 0x1fc   :  { %v468_v51 = vpop.eup %467  ;;  %v144_v52 = vmax.f32 %v142_v49, 1e-15  ;;  %v135_v53 = vsel %vm133_vm7, %v134_v48, %v132_v50 }
 0x1fd   :  { %v143_v55 = vmax.f32 %v135_v53, 1e-15  ;;  %v220_v56 = vmul.f32 %v468_v51, %v218_v41 }
 0x1fe   :  { %v418_v57 = vclamps-f32 %v144_v52, 15.0  ;;  %469 = vrcp.f32 %v144_v52 }
 0x1ff   :  { %v417_v58 = vclamps-f32 %v143_v55, 15.0  ;;  %v222_v59 = vsel %vm221_vm8, %v218_v41, %v220_v56 }
 0x200   :  { %471 = vtanh.f32 %v418_v57  ;;  %v225_v60 = vsel %vm223_vm9, %v224_v54, %v222_v59 }
 0x201   :  { %473 = vtanh.f32 %v417_v58  ;;  %v226_v61 = vmax.f32 %v225_v60, 1e-15 }
 0x202   :  { %475 = vrcp.f32 %v143_v55 }
 0x203   :  { %477 = vrcp.f32 %v226_v61  ;;  %vm227_vm10 = vcmp.gt.f32.partialorder %v226_v61, 0.996 }
 0x208   :  { %v470_v62 = vpop.eup %469 }
 0x20a   :  { %v472_v63 = vpop.eup %471 }
 0x20b   :  { %v474_v0 = vpop.eup %473  ;;  %v152_v1 = vmul.f32 %v472_v63, %v446_v31 }
 0x20c   :  { %v476_v2 = vpop.eup %475  ;;  %v151_v3 = vmul.f32 %v474_v0, %v112_v33 }
 0x20d   :  { %v478_v4 = vpop.eup %477  ;;  %v156_v6 = vmul.f32 %v470_v62, %v152_v1 }
 0x20e   :  { %v155_v5 = vmul.f32 %v476_v2, %v151_v3  ;;  %v229_v7 = vmul.f32 0.996, %v478_v4 }
 0x20f   :  { %v158_v11 = vmul.f32 %v156_v6, %v156_v6 }
 0x210   :  { %v157_v8 = vmul.f32 %v155_v5, %v155_v5  ;;  %v230_v9 = vmul.f32 %v229_v7, %v568_v30 }
 0x211   :  { %v162_v13 = vsel %vm39_vm1, %v158_v11, 0.0 }
 0x212   :  { %v159_v10 = vsel %vm39_vm1, %v157_v8, 0.0  ;;  %v233_v12 = vsel %vm227_vm10, %v230_v9, %v568_v30  ;;  %v246_v30 = vlaneseq }
 0x213   :  { %160 = vadd.xlane.f32.xlu1 %v159_v10  ;;  %v242_v14 = vmul.f32 %v233_v12, %v233_v12 }
 0x214   :  { %v247_v32 = vshrl.u32 %v246_v30, 7 }
 0x215   :  { %v243_v15 = vsel %vm197_vm0, %v242_v14, 0.0 }
 0x216   :  { %v248_v35 = vsub.s32 0, %v247_v32 }
 0x217   :  { %163 = vadd.xlane.f32.xlu1 %v162_v13 }
 0x218   :  { %v249_v39 = vrot.slane %v233_v12, %v248_v35 }
 0x21b   :  { %244 = vadd.xlane.f32.xlu1 %v243_v15 }
 0x2a0   :  { %v161_v16 = vpop.xlane.xlu1 %160 }
 0x2a1   :  { %479 = vrsqrt.f32 %v161_v16  ;;  %vm167_vm11 = vcmp.eq.f32.partialorder %v161_v16, inf  ;;  %v170_v20 = vand.u32 2147483648, %v161_v16  ;;  %vm169_vm12 = vcmp.eq.f32.partialorder %v161_v16, 0.0 }
 0x2a4   :  { %v164_v17 = vpop.xlane.xlu1 %163 }
 0x2a5   :  { %481 = vrsqrt.f32 %v164_v17  ;;  %vm174_vm13 = vcmp.eq.f32.partialorder %v164_v17, inf  ;;  %v177_v26 = vand.u32 2147483648, %v164_v17  ;;  %vm176_vm14 = vcmp.eq.f32.partialorder %v164_v17, 0.0 }
 0x2a8   :  { %v245_v50 = vpop.xlane.xlu1 %244 }
 0x2a9   :  { %v265_v54 = vrot.slane %v245_v50, %v248_v35 }
 0x2ab   :  { %v480_v18 = vpop.eup %479 }
 0x2ac   :  { %v166_v19 = vmul.f32 %v480_v18, %v161_v16 }
 0x2ae   :  { %v168_v21 = vsel %vm167_vm11, %v161_v16, %v166_v19 }
 0x2af   :  { %v482_v22 = vpop.eup %481  ;;  %v171_v23 = vsel %vm169_vm12, %v170_v20, %v168_v21 }
 0x2b0   :  { %v173_v24 = vmul.f32 %v482_v22, %v164_v17  ;;  %v179_v25 = vmax.f32 %v171_v23, 1e-15 }
 0x2b2   :  { %v175_v27 = vsel %vm174_vm13, %v164_v17, %v173_v24  ;;  %483 = vrcp.f32 %v179_v25  ;;  %vm181_vm0 = vcmp.gt.f32.partialorder %v179_v25, 0.996 }
 0x2b3   :  { %v178_v28 = vsel %vm176_vm14, %v177_v26, %v175_v27 }
 0x2b4   :  { %v180_v29 = vmax.f32 %v178_v28, 1e-15 }
 0x2b6   :  { %485 = vrcp.f32 %v180_v29  ;;  %vm182_vm15 = vcmp.gt.f32.partialorder %v180_v29, 0.996 }
 0x2bc   :  { %v484_v31 = vpop.eup %483 }
 0x2bd   :  { %v185_v33 = vmul.f32 0.996, %v484_v31 }
 0x2bf   :  { %v187_v37 = vmul.f32 %v185_v33, %v155_v5 }
 0x2c0   :  { %v486_v34 = vpop.eup %485 }
 0x2c1   :  { %v186_v36 = vmul.f32 0.996, %v486_v34  ;;  %v193_v41 = vsel %vm181_vm0, %v187_v37, %v155_v5 }
 0x2c2   :  { %v250_v44 = vmul.f32 %v249_v39, %v193_v41  ;;  %v234_v46 = vmul.f32 %v193_v41, %v193_v41 }
 0x2c3   :  { %v188_v38 = vmul.f32 %v186_v36, %v156_v6 }
 0x2c4   :  { %v252_v45 = vsel %vm39_vm1, %v250_v44, 0.0  ;;  %v236_v47 = vsel %vm39_vm1, %v234_v46, 0.0 }
 0x2c5   :  { %v194_v40 = vsel %vm182_vm15, %v188_v38, %v156_v6  ;;  %vm408_vm15 = vcmask 257024  }
 0x2c6   :  { %v251_v42 = vmul.f32 %v249_v39, %v194_v40  ;;  %v235_v48 = vmul.f32 %v194_v40, %v194_v40 }
 0x2c8   :  { %v255_v43 = vsel %vm39_vm1, %v251_v42, 0.0  ;;  %v239_v49 = vsel %vm39_vm1, %v235_v48, 0.0 }
 0x2c9   :  { %256 = vadd.xlane.f32.xlu1 %v255_v43 }
 0x2cd   :  { %253 = vadd.xlane.f32.xlu1 %v252_v45 }
 0x2d1   :  { %237 = vadd.xlane.f32.xlu1 %v236_v47 }
 0x2d5   :  { %240 = vadd.xlane.f32.xlu1 %v239_v49 }
 0x356   :  { %v257_v51 = vpop.xlane.xlu1 %256 }
 0x357   :  { %v259_v56 = vmul.f32 2.0, %v257_v51 }
 0x359   :  { %v261_v61 = vadd.f32 1.0, %v259_v56 }
 0x35a   :  { %v254_v52 = vpop.xlane.xlu1 %253 }
 0x35b   :  { %v258_v53 = vmul.f32 2.0, %v254_v52  ;;  %v267_v7 = vadd.f32 %v265_v54, %v261_v61 }
 0x35d   :  { %v260_v57 = vadd.f32 1.0, %v258_v53  ;;  %v269_v11 = vmul.f32 %v267_v7, %v194_v40 }
 0x35e   :  { %v238_v55 = vpop.xlane.xlu1 %237 }
 0x35f   :  { %v276_v58 = vmul.f32 %v265_v54, %v238_v55  ;;  %v266_v1 = vadd.f32 %v265_v54, %v260_v57  ;;  %v270_v2 = vsub.f32 1.0, %v238_v55 }
 0x361   :  { %v278_v59 = vadd.f32 %v276_v58, %v260_v57  ;;  %v268_v4 = vmul.f32 %v266_v1, %v193_v41  ;;  %v272_v5 = vmul.f32 %v270_v2, %v249_v39 }
 0x362   :  { %v241_v60 = vpop.xlane.xlu1 %240 }
 0x363   :  { %v280_v62 = vmax.f32 %v278_v59, 1e-15  ;;  %v277_v63 = vmul.f32 %v265_v54, %v241_v60  ;;  %v271_v6 = vsub.f32 1.0, %v241_v60  ;;  %v274_v8 = vadd.f32 %v272_v5, %v268_v4 }
 0x365   :  { %487 = vrcp.f32 %v280_v62  ;;  %v279_v0 = vadd.f32 %v277_v63, %v261_v61  ;;  %v273_v9 = vmul.f32 %v271_v6, %v249_v39 }
 0x367   :  { %v281_v3 = vmax.f32 %v279_v0, 1e-15  ;;  %v275_v13 = vadd.f32 %v273_v9, %v269_v11 }
 0x369   :  { %489 = vrcp.f32 %v281_v3 }
 0x36f   :  { %v488_v10 = vpop.eup %487 }
 0x370   :  { %v283_v12 = vmul.f32 %v488_v10, %v274_v8 }
 0x372   :  { %v286_v14 = vmul.f32 %v283_v12, %v283_v12 }
 0x373   :  { %v490_v15 = vpop.eup %489 }
 0x374   :  { %v288_v16 = vsel %vm39_vm1, %v286_v14, 0.0  ;;  %v285_v17 = vmul.f32 %v490_v15, %v275_v13 }
 0x375   :  { %289 = vadd.xlane.f32.xlu0 %v288_v16 }
 0x376   :  { %v287_v18 = vmul.f32 %v285_v17, %v285_v17 }
 0x378   :  { %v291_v19 = vsel %vm39_vm1, %v287_v18, 0.0 }
 0x379   :  { %292 = vadd.xlane.f32.xlu1 %v291_v19 }
 0x402   :  { %v290_v20 = vpop.xlane.xlu0 %289 }
 0x403   :  { %491 = vrsqrt.f32 %v290_v20  ;;  %vm296_vm2 = vcmp.eq.f32.partialorder %v290_v20, inf  ;;  %v299_v24 = vand.u32 2147483648, %v290_v20  ;;  %vm298_vm3 = vcmp.eq.f32.partialorder %v290_v20, 0.0 }
 0x406   :  { %v293_v21 = vpop.xlane.xlu1 %292 }
 0x407   :  { %493 = vrsqrt.f32 %v293_v21  ;;  %vm303_vm4 = vcmp.eq.f32.partialorder %v293_v21, inf  ;;  %v306_v30 = vand.u32 2147483648, %v293_v21  ;;  %vm305_vm5 = vcmp.eq.f32.partialorder %v293_v21, 0.0 }
 0x40d   :  { %v492_v22 = vpop.eup %491 }
 0x40e   :  { %v295_v23 = vmul.f32 %v492_v22, %v290_v20 }
 0x410   :  { %v297_v25 = vsel %vm296_vm2, %v290_v20, %v295_v23 }
 0x411   :  { %v494_v26 = vpop.eup %493  ;;  %v300_v27 = vsel %vm298_vm3, %v299_v24, %v297_v25 }
 0x412   :  { %v302_v28 = vmul.f32 %v494_v26, %v293_v21  ;;  %v308_v29 = vmax.f32 %v300_v27, 1e-15 }
 0x414   :  { %495 = vrcp.f32 %v308_v29  ;;  %v304_v31 = vsel %vm303_vm4, %v293_v21, %v302_v28  ;;  %vm310_vm6 = vcmp.gt.f32.partialorder %v308_v29, 0.996 }
 0x415   :  { %v307_v32 = vsel %vm305_vm5, %v306_v30, %v304_v31 }
 0x416   :  { %v309_v33 = vmax.f32 %v307_v32, 1e-15 }
 0x418   :  { %497 = vrcp.f32 %v309_v33  ;;  %vm311_vm7 = vcmp.gt.f32.partialorder %v309_v33, 0.996 }
 0x41e   :  { %v496_v34 = vpop.eup %495 }
 0x41f   :  { %v314_v35 = vmul.f32 0.996, %v496_v34 }
 0x421   :  { %v316_v36 = vmul.f32 %v314_v35, %v283_v12 }
 0x422   :  { %v498_v37 = vpop.eup %497 }
 0x423   :  { %v586_v38 = vsel %vm310_vm6, %v316_v36, %v283_v12  ;;  %v315_v39 = vmul.f32 0.996, %v498_v37 }
 0x424   :  { %v324_v40 = vmul.f32 %v586_v38, %v586_v38 }
 0x425   :  { %v317_v41 = vmul.f32 %v315_v39, %v285_v17 }
 0x426   :  { %v326_v42 = vsel %vm39_vm1, %v324_v40, 0.0 }
 0x427   :  { %327 = vadd.xlane.f32.xlu0 %v326_v42  ;;  %v591_v43 = vsel %vm311_vm7, %v317_v41, %v285_v17 }
 0x428   :  { %v325_v44 = vmul.f32 %v591_v43, %v591_v43 }
 0x42a   :  { %v329_v45 = vsel %vm39_vm1, %v325_v44, 0.0 }
 0x42b   :  { %330 = vadd.xlane.f32.xlu1 %v329_v45 }
 0x4b4   :  { %v328_v46 = vpop.xlane.xlu0 %327 }
 0x4b5   :  { %499 = vrsqrt.f32 %v328_v46  ;;  %vm334_vm8 = vcmp.eq.f32.partialorder %v328_v46, inf  ;;  %v337_v50 = vand.u32 2147483648, %v328_v46  ;;  %vm336_vm9 = vcmp.eq.f32.partialorder %v328_v46, 0.0 }
 0x4b8   :  { %v331_v47 = vpop.xlane.xlu1 %330 }
 0x4b9   :  { %501 = vrsqrt.f32 %v331_v47  ;;  %vm341_vm10 = vcmp.eq.f32.partialorder %v331_v47, inf  ;;  %v344_v56 = vand.u32 2147483648, %v331_v47  ;;  %vm343_vm1 = vcmp.eq.f32.partialorder %v331_v47, 0.0 }
 0x4bf   :  { %v500_v48 = vpop.eup %499 }
 0x4c0   :  { %v333_v49 = vmul.f32 %v500_v48, %v328_v46 }
 0x4c2   :  { %v335_v51 = vsel %vm334_vm8, %v328_v46, %v333_v49 }
 0x4c3   :  { %v502_v52 = vpop.eup %501  ;;  %v338_v53 = vsel %vm336_vm9, %v337_v50, %v335_v51 }
 0x4c4   :  { %v346_v54 = vmax.f32 %v338_v53, 1e-15  ;;  %v340_v55 = vmul.f32 %v502_v52, %v331_v47 }
 0x4c6   :  { %v420_v57 = vclamps-f32 %v346_v54, 0.9999999  ;;  %v342_v58 = vsel %vm341_vm10, %v331_v47, %v340_v55 }
 0x4c7   :  { %v345_v59 = vsel %vm343_vm1, %v344_v56, %v342_v58 }
 0x4c8   :  { %v352_v60 = vadd.f32 1.0, %v420_v57  ;;  %v370_v61 = vsub.f32 0.0, %v420_v57  ;;  %v347_v62 = vmax.f32 %v345_v59, 1e-15  ;;  %v355_v3 = vmul.f32 -0.5, %v420_v57 }
 0x4c9   :  { %v358_v9 = vand.u32 2147483647, %v420_v57 }
 0x4ca   :  { %503 = vlog2.f32 %v352_v60  ;;  %v372_v63 = vadd.f32 1.0, %v370_v61  ;;  %v421_v0 = vclamps-f32 %v347_v62, 0.9999999  ;;  %v375_v4 = vmul.f32 -0.5, %v370_v61 }
 0x4cb   :  { %v356_v6 = vadd.f32 1.0, %v355_v3  ;;  %v378_v10 = vand.u32 2147483647, %v370_v61  ;;  %vm359_vm11 = vcmp.lt.f32.partialorder %v358_v9, 0.0004427343 }
 0x4cc   :  { %505 = vlog2.f32 %v372_v63  ;;  %v361_v1 = vadd.f32 1.0, %v421_v0  ;;  %v371_v2 = vsub.f32 0.0, %v421_v0  ;;  %v376_v7 = vadd.f32 1.0, %v375_v4 }
 0x4cd   :  { %v364_v12 = vmul.f32 -0.5, %v421_v0  ;;  %v357_v15 = vmul.f32 %v420_v57, %v356_v6  ;;  %vm379_vm12 = vcmp.lt.f32.partialorder %v378_v10, 0.0004427343  ;;  %v367_v24 = vand.u32 2147483647, %v421_v0 }
 0x4ce   :  { %507 = vlog2.f32 %v361_v1  ;;  %v381_v5 = vadd.f32 1.0, %v371_v2  ;;  %v384_v13 = vmul.f32 -0.5, %v371_v2  ;;  %v377_v17 = vmul.f32 %v376_v7, %v370_v61 }
 0x4cf   :  { %v365_v21 = vadd.f32 1.0, %v364_v12  ;;  %v387_v25 = vand.u32 2147483647, %v371_v2  ;;  %vm368_vm13 = vcmp.lt.f32.partialorder %v367_v24, 0.0004427343 }
 0x4d0   :  { %509 = vlog2.f32 %v381_v5  ;;  %v385_v22 = vadd.f32 1.0, %v384_v13 }
 0x4d1   :  { %511 = vrcp.f32 %v346_v54  ;;  %v366_v30 = vmul.f32 %v421_v0, %v365_v21  ;;  %vm388_vm14 = vcmp.lt.f32.partialorder %v387_v25, 0.0004427343 }
 0x4d2   :  { %513 = vrcp.f32 %v347_v62  ;;  %v386_v32 = vmul.f32 %v385_v22, %v371_v2 }
 0x4d4   :  { %v504_v8 = vpop.eup %503 }
 0x4d5   :  { %v354_v11 = vmul.f32 0.6931472, %v504_v8 }
 0x4d6   :  { %v506_v14 = vpop.eup %505 }
 0x4d7   :  { %v374_v16 = vmul.f32 0.6931472, %v506_v14  ;;  %v360_v19 = vsel %vm359_vm11, %v357_v15, %v354_v11 }
 0x4d8   :  { %v508_v18 = vpop.eup %507 }
 0x4d9   :  { %v380_v20 = vsel %vm379_vm12, %v377_v17, %v374_v16  ;;  %v363_v26 = vmul.f32 0.6931472, %v508_v18 }
 0x4da   :  { %v390_v23 = vsub.f32 %v360_v19, %v380_v20  ;;  %v510_v27 = vpop.eup %509 }
 0x4db   :  { %v512_v29 = vpop.eup %511  ;;  %v383_v31 = vmul.f32 0.6931472, %v510_v27  ;;  %v369_v34 = vsel %vm368_vm13, %v366_v30, %v363_v26 }
 0x4dc   :  { %v392_v28 = vmul.f32 0.5, %v390_v23  ;;  %v514_v39 = vpop.eup %513 }
 0x4dd   :  { %v389_v35 = vsel %vm388_vm14, %v386_v32, %v383_v31 }
 0x4de   :  { %v396_v33 = vmul.f32 %v512_v29, %v392_v28  ;;  %v391_v37 = vsub.f32 %v369_v34, %v389_v35 }
 0x4e0   :  { %v398_v36 = vmul.f32 %v396_v33, %v586_v38  ;;  %v393_v41 = vmul.f32 0.5, %v391_v37 }
 0x4e2   :  { %v424_v40 = vpack.c.bf16 %v398_v36, %v398_v36  ;;  %v397_v42 = vmul.f32 %v514_v39, %v393_v41 }
 0x4e4   :  { %409 = vst.msk [vmem:[%s608_s4] sm:$0xf] %vm408_vm15, %v424_v40  ;;  %v399_v44 = vmul.f32 %v397_v42, %v591_v43 }
 0x4e6   :  { %v425_v45 = vpack.c.bf16 %v399_v44, %v399_v44 }
 0x4e8   :  { %410 = vst.msk [vmem:[%s608_s4 + $0x4] sm:$0xf] %vm408_vm15, %v425_v45 }

// kernel: hyp_gcn3_forward.13
= control target key start
LH: loop header
LB: loop body
LE: loop exit
PB: predicated region body
PF: predicated region fallthrough
CT: control target
= control target key end

     0   :  { %v39_v1 = vlaneseq  ;;  %v450_v2 = vmov 0.0   ;;  %vm451_vm0 = vmmov 0   ;;  %vm35_vm2 = vcmask 254976   ;;  %s557_s0 = inlined_call_operand.vmem [shape: bf16[16,32], index: 0, kind: input, shape index: {}]   ;;  %s558_s1 = inlined_call_operand.vmem [shape: bf16[16,32], index: 1, kind: input, shape index: {}]   ;;  %s559_s2 = inlined_call_operand.vmem [shape: bf16[16,32], index: 2, kind: input, shape index: {}]   ;;  %s560_s3 = inlined_call_operand.vmem [shape: s32[1,16], index: 3, kind: input, shape index: {}]   ;;  %s561_s4 = inlined_call_operand.vmem [shape: f32[1,16], index: 4, kind: input, shape index: {}]   ;;  %s562_s5 = inlined_call_operand.vmem [shape: f32[1,16], index: 5, kind: input, shape index: {}]   ;;  %s563_s6 = inlined_call_operand.vmem [shape: f32[32,4], index: 6, kind: input, shape index: {}]   ;;  %s564_s7 = inlined_call_operand.vmem [shape: f32[1,4], index: 7, kind: input, shape index: {}]   ;;  %s565_s8 = inlined_call_operand.hbm [shape: f32[2,4], index: 8, kind: output, shape index: {}]  }
   0x1   :  { %v419_v0 = vld [vmem:[%s557_s0] sm:$0xff]   ;;  %380 = vmatprep.subr.bf16.mxu0 %v450_v2  ;;  %386 = vmatprep.subr.bf16.mxu1 %v450_v2 }
   0x2   :  { %v420_v3 = vld [vmem:[%s558_s1] sm:$0xff]   ;;  %381 = vmatpush3.bf16.msra.mxu0 %v419_v0  ;;  %382 = vmatprep.mubr.msk.bf16.mxu0 %vm451_vm0, %v450_v2  ;;  %v40_v4 = vshrl.u32 %v39_v1, 7 }
   0x3   :  { %v357_v5 = vld [vmem:[%s560_s3] ss:$0 sm:$0xff]  ;;  %387 = vmatpush3.bf16.msra.mxu1 %v420_v3  ;;  %388 = vmatprep.mubr.msk.bf16.mxu1 %vm451_vm0, %v450_v2 }
   0x4   :  { %v359_v6 = vld [vmem:[%s561_s4] ss:$0 sm:$0xff]  ;;  %392 = vmatprep.subr.bf16.mxu0 %v450_v2  ;;  %vm46_vm1 = vcmp.eq.s32.totalorder %v40_v4, %v357_v5 }
   0x5   :  { %v360_v7 = vld [vmem:[%s562_s5] ss:$0 sm:$0xff] }
   0x6   :  { %13 = vsyncpa [#allocation6], 0  ;;  %v358_v8 = vsel %vm46_vm1, 1.0, %v450_v2  ;;  %36 = vst.msk [vmem:[#allocation2] sm:$0x3] %vm35_vm2, %v450_v2  ;;  %vm77_vm3 = vcmask 130048  }
   0x7   :  { %37 = vst.msk [vmem:[#allocation3] sm:$0x3] %vm35_vm2, %v450_v2  ;;  %38 = vst.msk [vmem:[#allocation4] sm:$0x3] %vm35_vm2, %v450_v2  ;;  %v56_v9 = vmul.f32 %v359_v6, %v358_v8  ;;  %v65_v10 = vmul.f32 %v360_v7, %v358_v8  ;;  %v421_v11 = vld [vmem:[%s559_s2] sm:$0xff]   ;;  %v67_v14 = vpack.c.bf16 %v358_v8, %v358_v8  ;;  %v244_v16 = vld [vmem:[%s563_s6 + $0x8] sm:$0xff] }
   0x8   :  { %v243_v15 = vld [vmem:[%s563_s6] sm:$0xff]  ;;  %v245_v17 = vld [vmem:[%s563_s6 + $0x10] sm:$0xff]  ;;  %v452_v18 = vmov 0.0|0.0   ;;  %v246_v20 = vld [vmem:[%s563_s6 + $0x18] sm:$0xff]  ;;  %vm254_vm4 = vcmask 261120   ;;  %vm328_vm5 = vcmask 25600  }
   0x9   :  { %v57_v12 = vpack.c.bf16 %v56_v9, %v56_v9  ;;  %v66_v13 = vpack.c.bf16 %v65_v10, %v65_v10  ;;  %409 = vmatprep.subr.bf16.mxu1 %v452_v18  ;;  %v410_v19 = vpack.c.bf16 %v244_v16, %v243_v15  ;;  %v413_v21 = vpack.c.bf16 %v246_v20, %v245_v17  ;;  %v367_v48 = vld [vmem:[%s564_s7] ss:$0 sm:$0xff]  ;;  %s453_s7 = smov [#allocation5]  }
   0xa   :  { %s349_s20 = sshll.u32 %s453_s7, 4  ;;  %s350_s20 = int_to_ptr.vmem [resolvable:$true] %s349_s20 }
   0xb   :  { %383 = vmatmul.mubr.msk.bf16.vlgmr.msra.gmra.mrb[0].mxu0 %vm77_vm3, %v57_v12  ;;  %389 = vmatmul.mubr.msk.bf16.vlgmr.msra.gmra.mrb[0].mxu1 %vm77_vm3, %v66_v13  ;;  %s426_s21 = scalar_lea.vmem %s350_s20, 32  ;;  %p431_p1 = scmp.lt.s32.totalorder %s350_s20, %s350_s20 }
   0xc   :  { %393 = vmatpush3.bf16.msra.mxu0 %v421_v11  ;;  %394 = vmatprep.mubr.msk.bf16.mxu0 %vm451_vm0, %v450_v2  ;;  %p427_p0 = scmp.ne.s32.totalorder %s350_s20, %s426_s21  ;;  %p432_p2 = scmp.lt.s32.totalorder %s426_s21, %s426_s21 }
   0xd   :  { %406 = vmatprep.mubr.msk.f32.mxu1 %vm451_vm0, %v450_v2  ;;  %411 = vmatpush3.bf16.msra.mxu1 %v410_v19  ;;  %v68_v22 = vld [vmem:[#allocation2] sm:$0x3] }
   0xe   :  { %412 = vmatprep.subr.bf16.mxu1 %v452_v18  ;;  %v124_v23 = vld [vmem:[#allocation3] sm:$0x3]  ;;  %v178_v34 = vld [vmem:[#allocation4] sm:$0x3]  ;;  %p433_p3 = por %p432_p2, %p431_p1 }
  0x10   :  { %p434_p4 = pnand %p433_p3, %p427_p0 }
  0x11   :  { %414 = vmatpush3.bf16.msra.mxu1 %v413_v21 }
  0x13   :  { %395 = vmatmul.mubr.msk.bf16.vlgmr.msra.gmra.mrb[4].mxu0 %vm77_vm3, %v67_v14 }
  0xde   :  { %v115_v24 = vpop.f32.mrb[0].mxu0  ;;  %v170_v25 = vpop.f32.mrb[0].mxu1 }
  0xdf   :  { %v121_v26 = vadd.f32 %v115_v24, %v68_v22  ;;  %v176_v27 = vadd.f32 %v170_v25, %v124_v23  ;;  %v384_v28 = vpop.f32.mrb[1].mxu0  ;;  %v390_v29 = vpop.f32.mrb[1].mxu1 }
  0xe0   :  { %v118_v30 = vpop.f32.mrb[2].mxu0  ;;  %v173_v31 = vpop.f32.mrb[2].mxu1 }
  0xe1   :  { %123 = vst.msk [vmem:[#allocation2] sm:$0x3] %vm35_vm2, %v121_v26  ;;  %177 = vst.msk [vmem:[#allocation3] sm:$0x3] %vm35_vm2, %v176_v27  ;;  %v385_v32 = vpop.f32.mrb[3].mxu0  ;;  %v391_v33 = vpop.f32.mrb[3].mxu1 }
  0xe6   :  { %v224_v35 = vpop.f32.mrb[4].mxu0 }
  0xe7   :  { %v230_v36 = vadd.f32 %v224_v35, %v178_v34  ;;  %v396_v37 = vpop.f32.mrb[5].mxu0 }
  0xe8   :  { %v227_v38 = vpop.f32.mrb[6].mxu0  ;;  %v235_v40 = vld [vmem:[#allocation2] sm:$0x3]  ;;  %v237_v41 = vld [vmem:[#allocation3] sm:$0x3] }
  0xe9   :  { %231 = vst.msk [vmem:[#allocation4] sm:$0x3] %vm35_vm2, %v230_v36  ;;  %v397_v39 = vpop.f32.mrb[7].mxu0  ;;  %v236_v42 = vmax.f32 %v235_v40, 0.0  ;;  %v238_v43 = vmax.f32 %v237_v41, 0.0 }
  0xeb   :  { %v239_v45 = vadd.f32 %v238_v43, %v236_v42 }
  0xf0   :  { %v240_v44 = vld [vmem:[#allocation4] sm:$0x3] }
  0xf1   :  { %v241_v46 = vmax.f32 %v240_v44, 0.0 }
  0xf3   :  { %v242_v47 = vadd.f32 %v241_v46, %v239_v45 }
  0xf5   :  { %407 = vmatmul.mubr.msk.f32.vlgmr.msra.gmra.mrb[4].mxu1 %vm254_vm4, %v242_v47 }
 0x1c8   :  { %v324_v49 = vpop.f32.mrb[4].mxu1 }
 0x1c9   :  { %v325_v50 = vadd.f32 %v367_v48, %v324_v49  ;;  %v408_v51 = vpop.f32.mrb[5].mxu1 }
 0x1cb   :  { %v329_v52 = vsel %vm328_vm5, %v325_v50, -inf }
 0x1cc   :  { %330 = vmax.xlane.f32.xlu0 %v329_v52 }
 0x259   :  { %v331_v53 = vpop.xlane.xlu0 %330 }
 0x25a   :  { %v332_v54 = vsub.f32 %v325_v50, %v331_v53 }
 0x25c   :  { %v333_v55 = vmul.f32 1.442695, %v332_v54 }
 0x25e   :  { %422 = vpow2.f32 %v333_v55 }
 0x268   :  { %v423_v56 = vpop.eup %422 }
 0x269   :  { %v335_v57 = vsel %vm328_vm5, %v423_v56, 0.0 }
 0x26a   :  { %336 = vadd.xlane.f32.xlu0 %v335_v57 }
 0x2f7   :  { %v337_v58 = vpop.xlane.xlu0 %336 }
 0x2f8   :  { %424 = vlog2.f32 %v337_v58 }
 0x302   :  { %v425_v59 = vpop.eup %424 }
 0x303   :  { %v339_v60 = vmul.f32 0.6931472, %v425_v59 }
 0x305   :  { %v340_v61 = vadd.f32 %v339_v60, %v331_v53 }
 0x307   :  { %v341_v62 = vsub.f32 %v325_v50, %v340_v61 }
 0x309   :  { %342 = vst.msk [vmem:[#allocation5] sm:$0x3] %vm328_vm5, %v341_v62 }
 0x30a   :  { %437 = shalt.err (!%p434_p4)
}
 0x30b   :  { %s438_s24 = scalar_lea.hbm %s565_s8, 32 }
 0x30c   :  { %p439_p5 = scmp.ne.s32.totalorder %s565_s8, %s438_s24  ;;  %p442_p6 = scmp.lt.u32.totalorder %s438_s24, %s565_s8 }
 0x30e   :  { %p444_p7 = pnand %p442_p6, %p439_p5 }
 0x310   :  { %447 = shalt.err (!%p444_p7)
}
 0x311   :  { %352 = dma.vmem_to_hbm [thread:$0]  %s350_s20, 32, %s565_s8, [#allocation6]  }
 0x312   :  { %448 = dma.done.wait [#allocation6], 32  }
 0x313   :  { %449 = vsyncadd [#allocation6], 4294967264 }
 0x314   :  { %356 = vsyncpa [#allocation6], 1 }

</bundles_post_ra>
